<compile_context>
chip_gen: v7x
topology: tpu7x:2x2x1
jax: 0.10.0
libtpu: 0.0.40
codegen_flags: <defaults>
</compile_context>

<pallas_src>
import functools
import math

import jax
import jax.numpy as jnp
from jax import lax
from jax.experimental import pallas as pl
from jax.experimental.pallas import tpu as pltpu


NEG_INF = -1e9


# ----------------------------------------------------------------------------- small helpers
def _round_up(x, m):
    return ((x + m - 1) // m) * m


def _pick_tile(dim, max_tile, mult):
    """Largest tile <= max_tile that is a multiple of `mult` and divides `dim`; else the full dim."""
    if dim <= max_tile:
        return dim
    t = (max_tile // mult) * mult
    while t >= mult:
        if dim % t == 0:
            return t
        t -= mult
    return dim


def _vmem_limit(bytes_estimate):
    """Scoped-VMEM limit for attention calls: never below the stock defaults, capped at 64 MiB."""
    return int(min(max(bytes_estimate, 32 * 1024 * 1024), 64 * 1024 * 1024))


# ----------------------------------------------------------------------------- kernels
def _matmul_kernel(*refs, relu, has_res):
    """Tiled matmul: grid (M/tm, N/tn, K/tk); f32 VMEM accumulator; fused bias/residual/relu."""
    if has_res:
        x_ref, w_ref, b_ref, res_ref, o_ref, acc_ref = refs
    else:
        x_ref, w_ref, b_ref, o_ref, acc_ref = refs
        res_ref = None

    @pl.when(pl.program_id(2) == 0)
    def _init():
        acc_ref[...] = jnp.zeros_like(acc_ref)

    # inputs arrive bf16 -> MXU-native, no per-tile cast needed.
    acc_ref[...] += jnp.dot(x_ref[...], w_ref[...], preferred_element_type=jnp.float32)

    @pl.when(pl.program_id(2) == pl.num_programs(2) - 1)
    def _finalize():
        y = acc_ref[...] + b_ref[...]
        if has_res:
            y = y + res_ref[...].astype(jnp.float32)
        if relu:
            y = jnp.maximum(y, 0.0)
        o_ref[...] = y.astype(o_ref.dtype)


def _ln_matmul_kernel(x_ref, g_ref, bt_ref, w_ref, b_ref, o_ref, h_ref, *, relu, eps):
    """Fused LayerNorm(x) @ W + b [+relu]; grid (M/tm, N/tn); K (=d_model) kept whole.

    The normalized row tile is computed once per M tile (j == 0) and cached in VMEM (h_ref)
    so it is not recomputed for every N tile.
    """
    @pl.when(pl.program_id(1) == 0)
    def _layernorm():
        x = x_ref[...].astype(jnp.float32)            # (tm, K)
        n = x.shape[-1]
        mean = jnp.mean(x, axis=-1, keepdims=True)
        # course LayerNorm: unbiased std (divide by n-1), eps added to std
        var = jnp.sum((x - mean) ** 2, axis=-1, keepdims=True) / (n - 1)
        h = g_ref[...] * (x - mean) / (jnp.sqrt(var) + eps) + bt_ref[...]
        h_ref[...] = h.astype(h_ref.dtype)

    y = jnp.dot(h_ref[...], w_ref[...], preferred_element_type=jnp.float32) + b_ref[...]
    if relu:
        y = jnp.maximum(y, 0.0)
    o_ref[...] = y.astype(o_ref.dtype)


def _attend(q, k, v, bias, heads, scale):
    """All-head attention for one (batch, q-tile). q:(tq,D) k/v:(Sk,D) bf16; bias -> (tq,Sk) f32."""
    D = q.shape[-1]
    dk = D // heads
    qs = q * scale                                    # fold 1/sqrt(dk) into q once (single VPU pass)
    contract_last = (((1,), (1,)), ((), ()))          # contract last dims: no explicit K transpose
    outs = []
    # TODO(synk): replace the unrolled per-head loop with a heads-batched lax.dot_general once
    # non-leading batch dims lower reliably in Mosaic; kept unrolled for robustness at dk < 128.
    for h in range(heads):
        lo = h * dk
        s = lax.dot_general(qs[:, lo:lo + dk], k[:, lo:lo + dk], contract_last,
                            preferred_element_type=jnp.float32)
        s = s + bias                                  # mask bias hoisted out of the head loop
        s = s - jnp.max(s, axis=-1, keepdims=True)
        p = jnp.exp(s)
        p = p * pl.reciprocal(jnp.sum(p, axis=-1, keepdims=True), approx=True)
        outs.append(jnp.dot(p.astype(v.dtype), v[:, lo:lo + dk],
                            preferred_element_type=jnp.float32))
    return jnp.concatenate(outs, axis=-1)             # single lane-dense (tq, D) result


def _self_attn_kernel(qkv_ref, pad_ref, o_ref, *, heads, scale, causal, tq):
    """qkv_ref: (Sk, 3D) bf16 (whole batch element, VMEM-resident across q tiles);
    pad_ref: (1, Sk) f32 key-pad mask; o_ref: (tq, D)."""
    D = o_ref.shape[-1]
    Sk = qkv_ref.shape[0]
    q0 = pl.multiple_of(pl.program_id(1) * tq, tq)

    q_rows = qkv_ref[pl.ds(q0, tq), :]                # (tq, 3D) - only the q tile's rows
    q = q_rows[:, :D]
    kv = qkv_ref[...]                                 # (Sk, 3D) resident block
    k = kv[:, D:2 * D]
    v = kv[:, 2 * D:]

    bias = jnp.where(pad_ref[...] > 0.0, 0.0, NEG_INF)            # (1, Sk) key-pad bias
    if causal:
        # causal (subsequent) mask regenerated in-kernel; never shipped from HBM
        q_pos = q0 + lax.broadcasted_iota(jnp.int32, (tq, Sk), 0)
        k_pos = lax.broadcasted_iota(jnp.int32, (tq, Sk), 1)
        bias = bias + jnp.where(k_pos <= q_pos, 0.0, NEG_INF)

    o_ref[...] = _attend(q, k, v, bias, heads, scale).astype(o_ref.dtype)


def _cross_attn_kernel(q_ref, kv_ref, pad_ref, o_ref, *, heads, scale):
    """q_ref: (tq, D); kv_ref: (Sk, 2D) resident across q tiles; pad_ref: (1, Sk)."""
    D = o_ref.shape[-1]
    kv = kv_ref[...]
    bias = jnp.where(pad_ref[...] > 0.0, 0.0, NEG_INF)
    o_ref[...] = _attend(q_ref[...], kv[:, :D], kv[:, D:], bias, heads, scale).astype(o_ref.dtype)


# ----------------------------------------------------------------------------- pallas_call wrappers
def linear(x, w, b, *, relu=False, residual=None, out_dtype=jnp.bfloat16):
    """x: (..., K) @ w(K, N) + b [+ residual] -> (..., N).  Tiled (M,N,K) grid with f32 accumulator."""
    lead = x.shape[:-1]
    K = x.shape[-1]
    N = w.shape[1]
    x2 = x.reshape(-1, K)
    if x2.dtype != jnp.bfloat16:
        x2 = x2.astype(jnp.bfloat16)
    M = x2.shape[0]
    Mp = _round_up(M, 8)                               # keep sublane dim aligned; sliced off below
    if Mp != M:
        x2 = jnp.pad(x2, ((0, Mp - M), (0, 0)))

    tm = _pick_tile(Mp, 512, 8)
    tn = _pick_tile(N, 512, 128)
    tk = _pick_tile(K, 512, 128)
    grid = (Mp // tm, N // tn, K // tk)

    has_res = residual is not None
    in_specs = [
        pl.BlockSpec((tm, tk), lambda i, j, k: (i, k)),
        pl.BlockSpec((tk, tn), lambda i, j, k: (k, j)),
        pl.BlockSpec((1, tn), lambda i, j, k: (0, j)),
    ]
    inputs = [x2, w, b.reshape(1, N)]
    if has_res:
        r2 = residual.reshape(-1, N)
        if r2.dtype != jnp.bfloat16:
            r2 = r2.astype(jnp.bfloat16)
        if Mp != M:
            r2 = jnp.pad(r2, ((0, Mp - M), (0, 0)))
        in_specs.append(pl.BlockSpec((tm, tn), lambda i, j, k: (i, j)))
        inputs.append(r2)

    out = pl.pallas_call(
        functools.partial(_matmul_kernel, relu=relu, has_res=has_res),
        out_shape=jax.ShapeDtypeStruct((Mp, N), out_dtype),
        grid=grid,
        in_specs=in_specs,
        out_specs=pl.BlockSpec((tm, tn), lambda i, j, k: (i, j)),
        scratch_shapes=[pltpu.VMEM((tm, tn), jnp.float32)],
        compiler_params=pltpu.CompilerParams(
            dimension_semantics=("parallel", "parallel", "arbitrary")),
    )(*inputs)
    if Mp != M:
        out = out[:M]
    return out.reshape(lead + (N,))


def ln_linear(x, g, bt, w, b, *, relu=False, eps=1e-6):
    """LayerNorm(x) @ w + b [+relu], fused.  Grid (M/tm, N/tn); K = d_model whole; LN cached in VMEM."""
    lead = x.shape[:-1]
    K = x.shape[-1]
    N = w.shape[1]
    x2 = x.reshape(-1, K)
    M = x2.shape[0]
    Mp = _round_up(M, 8)
    if Mp != M:
        x2 = jnp.pad(x2, ((0, Mp - M), (0, 0)))

    tm = _pick_tile(Mp, 512, 8)
    tn = _pick_tile(N, 512, 128)
    grid = (Mp // tm, N // tn)

    out = pl.pallas_call(
        functools.partial(_ln_matmul_kernel, relu=relu, eps=eps),
        out_shape=jax.ShapeDtypeStruct((Mp, N), jnp.bfloat16),
        grid=grid,
        in_specs=[
            pl.BlockSpec((tm, K), lambda i, j: (i, 0)),
            pl.BlockSpec((1, K), lambda i, j: (0, 0)),
            pl.BlockSpec((1, K), lambda i, j: (0, 0)),
            pl.BlockSpec((K, tn), lambda i, j: (0, j)),
            pl.BlockSpec((1, tn), lambda i, j: (0, j)),
        ],
        out_specs=pl.BlockSpec((tm, tn), lambda i, j: (i, j)),
        scratch_shapes=[pltpu.VMEM((tm, K), jnp.bfloat16)],
        compiler_params=pltpu.CompilerParams(
            dimension_semantics=("parallel", "arbitrary")),
    )(x2, g.reshape(1, K), bt.reshape(1, K), w, b.reshape(1, N))
    if Mp != M:
        out = out[:M]
    return out.reshape(lead + (N,))


def self_attention(qkv, pad_mask, heads, *, causal):
    """qkv: (B, S, 3D) bf16 fused projection; pad_mask: (B, 1, S) f32 key-pad -> (B, S, D) bf16."""
    B, S, D3 = qkv.shape
    D = D3 // 3
    tq = _pick_tile(S, 256, 8)
    grid = (B, S // tq)
    scale = 1.0 / math.sqrt(D // heads)

    blk_bytes = S * D3 * 2 + S * 4 + tq * D * 2
    vmem = _vmem_limit(2 * blk_bytes + 6 * tq * S * 4 + (4 << 20))

    return pl.pallas_call(
        functools.partial(_self_attn_kernel, heads=heads, scale=scale, causal=causal, tq=tq),
        out_shape=jax.ShapeDtypeStruct((B, S, D), jnp.bfloat16),
        grid=grid,
        in_specs=[
            pl.BlockSpec((None, S, D3), lambda b, qi: (b, 0, 0)),   # resident across q tiles
            pl.BlockSpec((None, 1, S), lambda b, qi: (b, 0, 0)),    # key-pad row only
        ],
        out_specs=pl.BlockSpec((None, tq, D), lambda b, qi: (b, qi, 0)),
        compiler_params=pltpu.CompilerParams(
            dimension_semantics=("parallel", "parallel"),
            vmem_limit_bytes=vmem),
    )(qkv, pad_mask)


def cross_attention(q, kv, pad_mask, heads):
    """q: (B, Sq, D) bf16; kv: (B, Sk, 2D) bf16 fused K|V; pad_mask: (B, 1, Sk) f32 -> (B, Sq, D)."""
    B, Sq, D = q.shape
    Sk = kv.shape[1]
    tq = _pick_tile(Sq, 256, 8)
    grid = (B, Sq // tq)
    scale = 1.0 / math.sqrt(D // heads)

    blk_bytes = tq * D * 2 + Sk * 2 * D * 2 + Sk * 4 + tq * D * 2
    vmem = _vmem_limit(2 * blk_bytes + 6 * tq * Sk * 4 + (4 << 20))

    return pl.pallas_call(
        functools.partial(_cross_attn_kernel, heads=heads, scale=scale),
        out_shape=jax.ShapeDtypeStruct((B, Sq, D), jnp.bfloat16),
        grid=grid,
        in_specs=[
            pl.BlockSpec((None, tq, D), lambda b, qi: (b, qi, 0)),
            pl.BlockSpec((None, Sk, 2 * D), lambda b, qi: (b, 0, 0)),  # resident across q tiles
            pl.BlockSpec((None, 1, Sk), lambda b, qi: (b, 0, 0)),
        ],
        out_specs=pl.BlockSpec((None, tq, D), lambda b, qi: (b, qi, 0)),
        compiler_params=pltpu.CompilerParams(
            dimension_semantics=("parallel", "parallel"),
            vmem_limit_bytes=vmem),
    )(q, kv, pad_mask)


# ----------------------------------------------------------------------------- sublayers / blocks (JAX glue)
def self_attention_sublayer(p, ln_g, ln_b, x, pad_mask, heads, *, causal):
    qkv = ln_linear(x, ln_g, ln_b, p["w_qkv"], p["b_qkv"])             # LN + fused QKV projection
    attn = self_attention(qkv, pad_mask, heads, causal=causal)
    return linear(attn, p["wo"], p["bo"], residual=x)                  # output proj + residual fused


def cross_attention_sublayer(p, ln_g, ln_b, x, enc_out, pad_mask, heads):
    q = ln_linear(x, ln_g, ln_b, p["wq"], p["bq"])                     # LN(x) -> Q
    kv = linear(enc_out, p["w_kv"], p["b_kv"])                         # enc_out -> fused K|V (no LN)
    attn = cross_attention(q, kv, pad_mask, heads)
    return linear(attn, p["wo"], p["bo"], residual=x)


def ffn_sublayer(p, ln_g, ln_b, x):
    h = ln_linear(x, ln_g, ln_b, p["ff_w1"], p["ff_b1"], relu=True)    # LN + W1 + ReLU fused
    return linear(h, p["ff_w2"], p["ff_b2"], residual=x)               # W2 + residual fused


def encoder_block(p, x, src_pad, heads):
    x = self_attention_sublayer(p["self_attn"], p["ln1_g"], p["ln1_b"], x, src_pad, heads, causal=False)
    x = ffn_sublayer(p, p["ln2_g"], p["ln2_b"], x)
    return x


def decoder_block(p, x, enc_out, src_pad, tgt_pad, heads):
    x = self_attention_sublayer(p["self_attn"], p["ln1_g"], p["ln1_b"], x, tgt_pad, heads, causal=True)
    x = cross_attention_sublayer(p["cross_attn"], p["ln2_g"], p["ln2_b"], x, enc_out, src_pad, heads)
    x = ffn_sublayer(p, p["ln3_g"], p["ln3_b"], x)
    return x


def positional_encoding(seq_len, d_model):
    pos = jnp.arange(seq_len, dtype=jnp.float32)[:, None]
    i = jnp.arange(0, d_model, 2, dtype=jnp.float32)
    div = jnp.exp(-jnp.log(10000.0) * i / d_model)
    pe = jnp.zeros((seq_len, d_model), jnp.float32)
    pe = pe.at[:, 0::2].set(jnp.sin(pos * div))
    pe = pe.at[:, 1::2].set(jnp.cos(pos * div))
    return pe


def embed(params, token_ids):
    emb = params["embedding"][token_ids]                               # gather (JAX glue)
    S = token_ids.shape[1]
    return emb + params["pos_enc"][:S][None, :, :]                     # PositionalEncoding; dropout = identity


def transformer_forward(params, source_inputs, target_inputs, source_mask, target_mask,
                        *, heads, vocab_size):
    """Matches Transformer.forward(source_inputs, target_inputs, source_mask, target_mask)."""
    B, Ss = source_inputs.shape
    _, St = target_inputs.shape

    src_emb = embed(params, source_inputs).astype(jnp.bfloat16)
    tgt_emb = embed(params, target_inputs).astype(jnp.bfloat16)

    # Only key-pad rows are shipped to the attention kernels; the decoder's causal part of the
    # (subsequent & pad) target mask is regenerated in-kernel (max over query rows recovers the pad row).
    src_pad = source_mask.reshape(B, 1, Ss).astype(jnp.float32)
    tgt_pad = jnp.max(target_mask.astype(jnp.float32), axis=1, keepdims=True)   # (B, 1, St)

    x = src_emb
    for bp in params["encoder_blocks"]:
        x = encoder_block(bp, x, src_pad, heads)
    enc_out = x

    y = tgt_emb
    for bp in params["decoder_blocks"]:
        y = decoder_block(bp, y, enc_out, src_pad, tgt_pad, heads)

    logits = linear(y, params["out_w"], params["out_b"], out_dtype=jnp.float32)  # (B, St, vocab_pad)
    return logits[..., :vocab_size]                                    # strip lane padding


# ----------------------------------------------------------------------------- parameter init (deterministic)
def _xavier(key, shape):
    fan_in, fan_out = shape[0], shape[1]
    a = math.sqrt(6.0 / (fan_in + fan_out))
    return jax.random.uniform(key, shape, jnp.float32, -a, a)


def _init_attn(key, d_model, cross):
    ks = jax.random.split(key, 4)
    wq = _xavier(ks[0], (d_model, d_model))
    wk = _xavier(ks[1], (d_model, d_model))
    wv = _xavier(ks[2], (d_model, d_model))
    wo = _xavier(ks[3], (d_model, d_model))
    z = jnp.zeros((d_model,), jnp.float32)
    p = {"wo": wo.astype(jnp.bfloat16), "bo": z}
    if cross:
        p["wq"] = wq.astype(jnp.bfloat16)
        p["bq"] = z
        p["w_kv"] = jnp.concatenate([wk, wv], axis=1).astype(jnp.bfloat16)
        p["b_kv"] = jnp.zeros((2 * d_model,), jnp.float32)
    else:
        p["w_qkv"] = jnp.concatenate([wq, wk, wv], axis=1).astype(jnp.bfloat16)
        p["b_qkv"] = jnp.zeros((3 * d_model,), jnp.float32)
    return p


def _init_block(key, d_model, d_ff, with_cross):
    ks = jax.random.split(key, 4)
    ones = jnp.ones((d_model,), jnp.float32)
    zero = jnp.zeros((d_model,), jnp.float32)
    p = {
        "self_attn": _init_attn(ks[0], d_model, cross=False),
        "ff_w1": _xavier(ks[1], (d_model, d_ff)).astype(jnp.bfloat16),
        "ff_b1": jnp.zeros((d_ff,), jnp.float32),
        "ff_w2": _xavier(ks[2], (d_ff, d_model)).astype(jnp.bfloat16),
        "ff_b2": zero,
        "ln1_g": ones, "ln1_b": zero,
        "ln2_g": ones, "ln2_b": zero,
    }
    if with_cross:
        p["cross_attn"] = _init_attn(ks[3], d_model, cross=True)
        p["ln3_g"] = ones
        p["ln3_b"] = zero
    return p


def init_transformer(key, vocab_size, d_model, d_ff, blocks_count, max_len=512):
    keys = jax.random.split(key, 2 * blocks_count + 2)
    vocab_pad = _round_up(vocab_size, 128)            # lane-dense logits store; sliced back in JAX
    out_w = jnp.zeros((d_model, vocab_pad), jnp.float32)
    out_w = out_w.at[:, :vocab_size].set(_xavier(keys[-1], (d_model, vocab_size)))
    params = {
        "embedding": _xavier(keys[0], (vocab_size, d_model)),
        "pos_enc": positional_encoding(max_len, d_model),
        "encoder_blocks": [
            _init_block(keys[1 + i], d_model, d_ff, with_cross=False)
            for i in range(blocks_count)
        ],
        "decoder_blocks": [
            _init_block(keys[1 + blocks_count + i], d_model, d_ff, with_cross=True)
            for i in range(blocks_count)
        ],
        "out_w": out_w.astype(jnp.bfloat16),
        "out_b": jnp.zeros((vocab_pad,), jnp.float32),
    }
    return params


# ----------------------------------------------------------------------------- main
if __name__ == "__main__":
    vocab_size = 50
    d_model = 32
    d_ff = 64
    blocks_count = 2
    heads_count = 4
    B, S_src, S_tgt = 2, 8, 8
    pad_id = 0

    root = jax.random.PRNGKey(0)
    k_params, k_src, k_tgt = jax.random.split(root, 3)
    params = init_transformer(k_params, vocab_size, d_model, d_ff, blocks_count)

    source_inputs = jax.random.randint(k_src, (B, S_src), 1, vocab_size)
    target_inputs = jax.random.randint(k_tgt, (B, S_tgt), 1, vocab_size)
    # introduce some padding so the masks are non-trivial
    source_inputs = source_inputs.at[:, -2:].set(pad_id)
    target_inputs = target_inputs.at[:, -1:].set(pad_id)

    # same mask conventions as the PyTorch model:
    #   source_mask: (B, 1, S_src) pad mask ; target_mask: (B, S_tgt, S_tgt) = subsequent & pad
    source_mask = (source_inputs != pad_id)[:, None, :].astype(jnp.int32)
    subsequent = jnp.tril(jnp.ones((S_tgt, S_tgt), jnp.int32))
    target_mask = (subsequent[None, :, :] * (target_inputs != pad_id)[:, None, :]).astype(jnp.int32)

    fwd = jax.jit(functools.partial(transformer_forward, heads=heads_count, vocab_size=vocab_size))
    logits = fwd(params, source_inputs, target_inputs, source_mask, target_mask)
    jax.block_until_ready(logits)
    assert logits.shape == (B, S_tgt, vocab_size)
    assert bool(jnp.all(jnp.isfinite(logits)))
    print("KERNEL_OK")
</pallas_src>

<mosaic_0001>
module attributes {stable_mosaic.version = 11 : i64} {
  func.func @_matmul_kernel(%arg0: i32, %arg1: i32, %arg2: i32, %arg3: memref<16x32xbf16, #tpu.memory_space<vmem>>, %arg4: memref<32x32xbf16, #tpu.memory_space<vmem>>, %arg5: memref<1x32xf32, #tpu.memory_space<vmem>>, %arg6: memref<16x32xbf16, #tpu.memory_space<vmem>>, %arg7: memref<16x32xbf16, #tpu.memory_space<vmem>>, %arg8: memref<16x32xf32, #tpu.memory_space<vmem>>) attributes {dimension_semantics = [#tpu.dimension_semantics<parallel>, #tpu.dimension_semantics<parallel>, #tpu.dimension_semantics<arbitrary>], iteration_bounds = array<i64: 1, 1, 1>, scalar_prefetch = 0 : i64, scratch_operands = 1 : i64, tpu.core_type = #tpu.core_type<tc>, window_params = [{transform_indices = @transform_0, window_bounds = array<i64: 16, 32>}, {transform_indices = @transform_1, window_bounds = array<i64: 32, 32>}, {transform_indices = @transform_2, window_bounds = array<i64: 1, 32>}, {transform_indices = @transform_3, window_bounds = array<i64: 16, 32>}, {transform_indices = @transform_4, window_bounds = array<i64: 16, 32>}]} {
    %c0_i32 = arith.constant 0 : i32
    %0 = arith.cmpi eq, %arg2, %c0_i32 : i32
    %1 = arith.extui %0 : i1 to i32
    %c0_i32_0 = arith.constant 0 : i32
    %2 = arith.cmpi ne, %1, %c0_i32_0 : i32
    scf.if %2 {
      %cst_10 = arith.constant 0.000000e+00 : f32
      %12 = vector.broadcast %cst_10 : f32 to vector<16x32xf32>
      %c0_11 = arith.constant 0 : index
      %c0_12 = arith.constant 0 : index
      %13 = vector.load %arg8[%c0_11, %c0_12] : memref<16x32xf32, #tpu.memory_space<vmem>>, vector<16x32xf32>
      tpu.vector_store %arg8[%c0_11, %c0_12], %12 {strides = array<i32>} : memref<16x32xf32, #tpu.memory_space<vmem>>, vector<16x32xf32>,
    } else {
    }
    %c0 = arith.constant 0 : index
    %c0_1 = arith.constant 0 : index
    %3 = vector.load %arg8[%c0, %c0_1] : memref<16x32xf32, #tpu.memory_space<vmem>>, vector<16x32xf32>
    %c0_2 = arith.constant 0 : index
    %c0_3 = arith.constant 0 : index
    %4 = vector.load %arg3[%c0_2, %c0_3] : memref<16x32xbf16, #tpu.memory_space<vmem>>, vector<16x32xbf16>
    %c0_4 = arith.constant 0 : index
    %c0_5 = arith.constant 0 : index
    %5 = vector.load %arg4[%c0_4, %c0_5] : memref<32x32xbf16, #tpu.memory_space<vmem>>, vector<32x32xbf16>
    %cst = arith.constant dense<0.000000e+00> : vector<16x32xf32>
    %6 = tpu.matmul %4, %5, %cst {dimension_numbers = #tpu.dot_dimension_numbers<[1], [0], [0], [1], [0, 0, 1, 1], [], []>} : vector<16x32xbf16>, vector<32x32xbf16>, vector<16x32xf32> -> vector<16x32xf32>
    %7 = arith.addf %3, %6 : vector<16x32xf32>
    %c0_6 = arith.constant 0 : index
    %c0_7 = arith.constant 0 : index
    %8 = vector.load %arg8[%c0_6, %c0_7] : memref<16x32xf32, #tpu.memory_space<vmem>>, vector<16x32xf32>
    tpu.vector_store %arg8[%c0_6, %c0_7], %7 {strides = array<i32>} : memref<16x32xf32, #tpu.memory_space<vmem>>, vector<16x32xf32>,
    %c0_i32_8 = arith.constant 0 : i32
    %9 = arith.cmpi eq, %arg2, %c0_i32_8 : i32
    %10 = arith.extui %9 : i1 to i32
    %c0_i32_9 = arith.constant 0 : i32
    %11 = arith.cmpi ne, %10, %c0_i32_9 : i32
    scf.if %11 {
      %c0_10 = arith.constant 0 : index
      %c0_11 = arith.constant 0 : index
      %12 = vector.load %arg8[%c0_10, %c0_11] : memref<16x32xf32, #tpu.memory_space<vmem>>, vector<16x32xf32>
      %c0_12 = arith.constant 0 : index
      %c0_13 = arith.constant 0 : index
      %13 = vector.load %arg5[%c0_12, %c0_13] : memref<1x32xf32, #tpu.memory_space<vmem>>, vector<1x32xf32>
      %14 = vector.broadcast %13 : vector<1x32xf32> to vector<16x32xf32>
      %15 = arith.addf %12, %14 : vector<16x32xf32>
      %c0_14 = arith.constant 0 : index
      %c0_15 = arith.constant 0 : index
      %16 = vector.load %arg6[%c0_14, %c0_15] : memref<16x32xbf16, #tpu.memory_space<vmem>>, vector<16x32xbf16>
      %17 = arith.extf %16 : vector<16x32xbf16> to vector<16x32xf32>
      %18 = arith.addf %15, %17 : vector<16x32xf32>
      %19 = arith.truncf %18 : vector<16x32xf32> to vector<16x32xbf16>
      %c0_16 = arith.constant 0 : index
      %c0_17 = arith.constant 0 : index
      %20 = vector.load %arg7[%c0_16, %c0_17] : memref<16x32xbf16, #tpu.memory_space<vmem>>, vector<16x32xbf16>
      tpu.vector_store %arg7[%c0_16, %c0_17], %19 {strides = array<i32>} : memref<16x32xbf16, #tpu.memory_space<vmem>>, vector<16x32xbf16>,
    } else {
    }
    return
  }
  func.func @transform_0(%arg0: i32, %arg1: i32, %arg2: i32) -> (i32, i32) {
    %c0_i32 = arith.constant 0 : i32
    return %arg0, %arg2 : i32, i32
  }
  func.func @transform_1(%arg0: i32, %arg1: i32, %arg2: i32) -> (i32, i32) {
    %c0_i32 = arith.constant 0 : i32
    return %arg2, %arg1 : i32, i32
  }
  func.func @transform_2(%arg0: i32, %arg1: i32, %arg2: i32) -> (i32, i32) {
    %c0_i32 = arith.constant 0 : i32
    %c0_i32_0 = arith.constant 0 : i32
    return %c0_i32, %arg1 : i32, i32
  }
  func.func @transform_3(%arg0: i32, %arg1: i32, %arg2: i32) -> (i32, i32) {
    %c0_i32 = arith.constant 0 : i32
    return %arg0, %arg1 : i32, i32
  }
  func.func @transform_4(%arg0: i32, %arg1: i32, %arg2: i32) -> (i32, i32) {
    %c0_i32 = arith.constant 0 : i32
    return %arg0, %arg1 : i32, i32
  }
}

module attributes {stable_mosaic.version = 11 : i64} {
  func.func @_ln_matmul_kernel(%arg0: i32, %arg1: i32, %arg2: memref<16x32xbf16, #tpu.memory_space<vmem>>, %arg3: memref<1x32xf32, #tpu.memory_space<vmem>>, %arg4: memref<1x32xf32, #tpu.memory_space<vmem>>, %arg5: memref<32x96xbf16, #tpu.memory_space<vmem>>, %arg6: memref<1x96xf32, #tpu.memory_space<vmem>>, %arg7: memref<16x96xbf16, #tpu.memory_space<vmem>>, %arg8: memref<16x32xbf16, #tpu.memory_space<vmem>>) attributes {dimension_semantics = [#tpu.dimension_semantics<parallel>, #tpu.dimension_semantics<arbitrary>], iteration_bounds = array<i64: 1, 1>, scalar_prefetch = 0 : i64, scratch_operands = 1 : i64, tpu.core_type = #tpu.core_type<tc>, window_params = [{transform_indices = @transform_0, window_bounds = array<i64: 16, 32>}, {pipeline_mode = #tpu.pipeline_mode<synchronous>, transform_indices = @transform_1, window_bounds = array<i64: 1, 32>}, {pipeline_mode = #tpu.pipeline_mode<synchronous>, transform_indices = @transform_2, window_bounds = array<i64: 1, 32>}, {transform_indices = @transform_3, window_bounds = array<i64: 32, 96>}, {transform_indices = @transform_4, window_bounds = array<i64: 1, 96>}, {transform_indices = @transform_5, window_bounds = array<i64: 16, 96>}]} {
    %c0_i32 = arith.constant 0 : i32
    %0 = arith.cmpi eq, %arg1, %c0_i32 : i32
    %1 = arith.extui %0 : i1 to i32
    %c0_i32_0 = arith.constant 0 : i32
    %2 = arith.cmpi ne, %1, %c0_i32_0 : i32
    scf.if %2 {
      %c0_8 = arith.constant 0 : index
      %c0_9 = arith.constant 0 : index
      %11 = vector.load %arg2[%c0_8, %c0_9] : memref<16x32xbf16, #tpu.memory_space<vmem>>, vector<16x32xbf16>
      %12 = arith.extf %11 : vector<16x32xbf16> to vector<16x32xf32>
      %cst_10 = arith.constant dense<0.000000e+00> : vector<16xf32>
      %13 = vector.multi_reduction <add>, %12, %cst_10 [1] : vector<16x32xf32> to vector<16xf32>
      %14 = vector.shape_cast %13 : vector<16xf32> to vector<16x1xf32>
      %cst_11 = arith.constant 3.200000e+01 : f32
      %15 = vector.broadcast %cst_11 : f32 to vector<16x1xf32>
      %16 = arith.divf %14, %15 : vector<16x1xf32>
      %17 = vector.broadcast %16 : vector<16x1xf32> to vector<16x32xf32>
      %18 = arith.subf %12, %17 : vector<16x32xf32>
      %19 = arith.mulf %18, %18 : vector<16x32xf32>
      %cst_12 = arith.constant dense<0.000000e+00> : vector<16xf32>
      %20 = vector.multi_reduction <add>, %19, %cst_12 [1] : vector<16x32xf32> to vector<16xf32>
      %21 = vector.shape_cast %20 : vector<16xf32> to vector<16x1xf32>
      %cst_13 = arith.constant 3.100000e+01 : f32
      %22 = vector.broadcast %cst_13 : f32 to vector<16x1xf32>
      %23 = arith.divf %21, %22 : vector<16x1xf32>
      %c0_14 = arith.constant 0 : index
      %c0_15 = arith.constant 0 : index
      %24 = vector.load %arg3[%c0_14, %c0_15] : memref<1x32xf32, #tpu.memory_space<vmem>>, vector<1x32xf32>
      %25 = vector.broadcast %16 : vector<16x1xf32> to vector<16x32xf32>
      %26 = arith.subf %12, %25 : vector<16x32xf32>
      %27 = vector.broadcast %24 : vector<1x32xf32> to vector<16x32xf32>
      %28 = arith.mulf %27, %26 : vector<16x32xf32>
      %29 = math.sqrt %23 : vector<16x1xf32>
      %cst_16 = arith.constant 9.99999997E-7 : f32
      %30 = vector.broadcast %cst_16 : f32 to vector<16x1xf32>
      %31 = arith.addf %29, %30 : vector<16x1xf32>
      %32 = vector.broadcast %31 : vector<16x1xf32> to vector<16x32xf32>
      %33 = arith.divf %28, %32 : vector<16x32xf32>
      %c0_17 = arith.constant 0 : index
      %c0_18 = arith.constant 0 : index
      %34 = vector.load %arg4[%c0_17, %c0_18] : memref<1x32xf32, #tpu.memory_space<vmem>>, vector<1x32xf32>
      %35 = vector.broadcast %34 : vector<1x32xf32> to vector<16x32xf32>
      %36 = arith.addf %33, %35 : vector<16x32xf32>
      %37 = arith.truncf %36 : vector<16x32xf32> to vector<16x32xbf16>
      %c0_19 = arith.constant 0 : index
      %c0_20 = arith.constant 0 : index
      %38 = vector.load %arg8[%c0_19, %c0_20] : memref<16x32xbf16, #tpu.memory_space<vmem>>, vector<16x32xbf16>
      tpu.vector_store %arg8[%c0_19, %c0_20], %37 {strides = array<i32>} : memref<16x32xbf16, #tpu.memory_space<vmem>>, vector<16x32xbf16>,
    } else {
    }
    %c0 = arith.constant 0 : index
    %c0_1 = arith.constant 0 : index
    %3 = vector.load %arg8[%c0, %c0_1] : memref<16x32xbf16, #tpu.memory_space<vmem>>, vector<16x32xbf16>
    %c0_2 = arith.constant 0 : index
    %c0_3 = arith.constant 0 : index
    %4 = vector.load %arg5[%c0_2, %c0_3] : memref<32x96xbf16, #tpu.memory_space<vmem>>, vector<32x96xbf16>
    %cst = arith.constant dense<0.000000e+00> : vector<16x96xf32>
    %5 = tpu.matmul %3, %4, %cst {dimension_numbers = #tpu.dot_dimension_numbers<[1], [0], [0], [1], [0, 0, 1, 1], [], []>} : vector<16x32xbf16>, vector<32x96xbf16>, vector<16x96xf32> -> vector<16x96xf32>
    %c0_4 = arith.constant 0 : index
    %c0_5 = arith.constant 0 : index
    %6 = vector.load %arg6[%c0_4, %c0_5] : memref<1x96xf32, #tpu.memory_space<vmem>>, vector<1x96xf32>
    %7 = vector.broadcast %6 : vector<1x96xf32> to vector<16x96xf32>
    %8 = arith.addf %5, %7 : vector<16x96xf32>
    %9 = arith.truncf %8 : vector<16x96xf32> to vector<16x96xbf16>
    %c0_6 = arith.constant 0 : index
    %c0_7 = arith.constant 0 : index
    %10 = vector.load %arg7[%c0_6, %c0_7] : memref<16x96xbf16, #tpu.memory_space<vmem>>, vector<16x96xbf16>
    tpu.vector_store %arg7[%c0_6, %c0_7], %9 {strides = array<i32>} : memref<16x96xbf16, #tpu.memory_space<vmem>>, vector<16x96xbf16>,
    return
  }
  func.func @transform_0(%arg0: i32, %arg1: i32) -> (i32, i32) {
    %c0_i32 = arith.constant 0 : i32
    %c0_i32_0 = arith.constant 0 : i32
    return %arg0, %c0_i32 : i32, i32
  }
  func.func @transform_1(%arg0: i32, %arg1: i32) -> (i32, i32) {
    %c0_i32 = arith.constant 0 : i32
    %c0_i32_0 = arith.constant 0 : i32
    %c0_i32_1 = arith.constant 0 : i32
    return %c0_i32, %c0_i32_0 : i32, i32
  }
  func.func @transform_2(%arg0: i32, %arg1: i32) -> (i32, i32) {
    %c0_i32 = arith.constant 0 : i32
    %c0_i32_0 = arith.constant 0 : i32
    %c0_i32_1 = arith.constant 0 : i32
    return %c0_i32, %c0_i32_0 : i32, i32
  }
  func.func @transform_3(%arg0: i32, %arg1: i32) -> (i32, i32) {
    %c0_i32 = arith.constant 0 : i32
    %c0_i32_0 = arith.constant 0 : i32
    return %c0_i32, %arg1 : i32, i32
  }
  func.func @transform_4(%arg0: i32, %arg1: i32) -> (i32, i32) {
    %c0_i32 = arith.constant 0 : i32
    %c0_i32_0 = arith.constant 0 : i32
    return %c0_i32, %arg1 : i32, i32
  }
  func.func @transform_5(%arg0: i32, %arg1: i32) -> (i32, i32) {
    %c0_i32 = arith.constant 0 : i32
    return %arg0, %arg1 : i32, i32
  }
}

module attributes {stable_mosaic.version = 11 : i64} {
  func.func @_self_attn_kernel(%arg0: i32, %arg1: i32, %arg2: memref<1x8x96xbf16, #tpu.memory_space<vmem>>, %arg3: memref<1x1x8xf32, #tpu.memory_space<vmem>>, %arg4: memref<1x8x32xbf16, #tpu.memory_space<vmem>>) attributes {dimension_semantics = [#tpu.dimension_semantics<parallel>, #tpu.dimension_semantics<parallel>], iteration_bounds = array<i64: 2, 1>, scalar_prefetch = 0 : i64, scratch_operands = 0 : i64, tpu.core_type = #tpu.core_type<tc>, window_params = [{transform_indices = @transform_0, window_bounds = array<i64: 1, 8, 96>}, {transform_indices = @transform_1, window_bounds = array<i64: 1, 1, 8>}, {transform_indices = @transform_2, window_bounds = array<i64: 1, 8, 32>}]} {
    %c8_i32 = arith.constant 8 : i32
    %0 = arith.muli %arg1, %c8_i32 : i32
    %1 = tpu.assume_multiple %0, 8 : i32
    %c0 = arith.constant 0 : index
    %2 = arith.index_cast %1 : i32 to index
    %c0_0 = arith.constant 0 : index
    %3 = vector.load %arg2[%c0, %2, %c0_0] : memref<1x8x96xbf16, #tpu.memory_space<vmem>>, vector<1x8x96xbf16>
    %4 = vector.shape_cast %3 : vector<1x8x96xbf16> to vector<8x96xbf16>
    %5 = vector.extract_strided_slice %4 {offsets = [0, 0], sizes = [8, 32], strides = [1, 1]} : vector<8x96xbf16> to vector<8x32xbf16>
    %c0_1 = arith.constant 0 : index
    %c0_2 = arith.constant 0 : index
    %c0_3 = arith.constant 0 : index
    %6 = vector.load %arg2[%c0_1, %c0_2, %c0_3] : memref<1x8x96xbf16, #tpu.memory_space<vmem>>, vector<1x8x96xbf16>
    %7 = vector.shape_cast %6 : vector<1x8x96xbf16> to vector<8x96xbf16>
    %8 = vector.extract_strided_slice %7 {offsets = [0, 32], sizes = [8, 32], strides = [1, 1]} : vector<8x96xbf16> to vector<8x32xbf16>
    %9 = vector.extract_strided_slice %7 {offsets = [0, 64], sizes = [8, 32], strides = [1, 1]} : vector<8x96xbf16> to vector<8x32xbf16>
    %c0_4 = arith.constant 0 : index
    %c0_5 = arith.constant 0 : index
    %c0_6 = arith.constant 0 : index
    %10 = vector.load %arg3[%c0_4, %c0_5, %c0_6] : memref<1x1x8xf32, #tpu.memory_space<vmem>>, vector<1x1x8xf32>
    %11 = vector.shape_cast %10 : vector<1x1x8xf32> to vector<1x8xf32>
    %cst = arith.constant 0.000000e+00 : f32
    %12 = vector.broadcast %cst : f32 to vector<1x8xf32>
    %13 = arith.cmpf ogt, %11, %12 : vector<1x8xf32>
    %cst_7 = arith.constant 0.000000e+00 : f32
    %cst_8 = arith.constant -1.000000e+09 : f32
    %14 = vector.broadcast %cst_7 : f32 to vector<1x8xf32>
    %15 = vector.broadcast %cst_8 : f32 to vector<1x8xf32>
    %16 = arith.select %13, %14, %15 : vector<1x8xi1>, vector<1x8xf32>
    %cst_9 = arith.constant 3.535160e-01 : bf16
    %17 = vector.broadcast %cst_9 : bf16 to vector<8x32xbf16>
    %18 = arith.mulf %5, %17 : vector<8x32xbf16>
    %19 = vector.extract_strided_slice %18 {offsets = [0, 0], sizes = [8, 8], strides = [1, 1]} : vector<8x32xbf16> to vector<8x8xbf16>
    %20 = vector.extract_strided_slice %8 {offsets = [0, 0], sizes = [8, 8], strides = [1, 1]} : vector<8x32xbf16> to vector<8x8xbf16>
    %cst_10 = arith.constant dense<0.000000e+00> : vector<8x8xf32>
    %21 = tpu.matmul %19, %20, %cst_10 {dimension_numbers = #tpu.dot_dimension_numbers<[1], [1], [0], [0], [0, 0, 1, 0], [], []>} : vector<8x8xbf16>, vector<8x8xbf16>, vector<8x8xf32> -> vector<8x8xf32>
    %22 = vector.broadcast %16 : vector<1x8xf32> to vector<8x8xf32>
    %23 = arith.addf %21, %22 : vector<8x8xf32>
    %cst_11 = arith.constant dense<0xFF800000> : vector<8xf32>
    %24 = vector.multi_reduction <maximumf>, %23, %cst_11 [1] : vector<8x8xf32> to vector<8xf32>
    %25 = vector.shape_cast %24 : vector<8xf32> to vector<8x1xf32>
    %26 = vector.broadcast %25 : vector<8x1xf32> to vector<8x8xf32>
    %27 = arith.subf %23, %26 : vector<8x8xf32>
    %28 = math.exp %27 : vector<8x8xf32>
    %cst_12 = arith.constant dense<0.000000e+00> : vector<8xf32>
    %29 = vector.multi_reduction <add>, %28, %cst_12 [1] : vector<8x8xf32> to vector<8xf32>
    %30 = vector.shape_cast %29 : vector<8xf32> to vector<8x1xf32>
    %31 = tpu.reciprocal %30 {approx = true} : vector<8x1xf32> -> vector<8x1xf32>
    %32 = vector.broadcast %31 : vector<8x1xf32> to vector<8x8xf32>
    %33 = arith.mulf %28, %32 : vector<8x8xf32>
    %34 = arith.truncf %33 : vector<8x8xf32> to vector<8x8xbf16>
    %35 = vector.extract_strided_slice %9 {offsets = [0, 0], sizes = [8, 8], strides = [1, 1]} : vector<8x32xbf16> to vector<8x8xbf16>
    %cst_13 = arith.constant dense<0.000000e+00> : vector<8x8xf32>
    %36 = tpu.matmul %34, %35, %cst_13 {dimension_numbers = #tpu.dot_dimension_numbers<[1], [0], [0], [1], [0, 0, 1, 1], [], []>} : vector<8x8xbf16>, vector<8x8xbf16>, vector<8x8xf32> -> vector<8x8xf32>
    %37 = vector.extract_strided_slice %18 {offsets = [0, 8], sizes = [8, 8], strides = [1, 1]} : vector<8x32xbf16> to vector<8x8xbf16>
    %38 = vector.extract_strided_slice %8 {offsets = [0, 8], sizes = [8, 8], strides = [1, 1]} : vector<8x32xbf16> to vector<8x8xbf16>
    %cst_14 = arith.constant dense<0.000000e+00> : vector<8x8xf32>
    %39 = tpu.matmul %37, %38, %cst_14 {dimension_numbers = #tpu.dot_dimension_numbers<[1], [1], [0], [0], [0, 0, 1, 0], [], []>} : vector<8x8xbf16>, vector<8x8xbf16>, vector<8x8xf32> -> vector<8x8xf32>
    %40 = vector.broadcast %16 : vector<1x8xf32> to vector<8x8xf32>
    %41 = arith.addf %39, %40 : vector<8x8xf32>
    %cst_15 = arith.constant dense<0xFF800000> : vector<8xf32>
    %42 = vector.multi_reduction <maximumf>, %41, %cst_15 [1] : vector<8x8xf32> to vector<8xf32>
    %43 = vector.shape_cast %42 : vector<8xf32> to vector<8x1xf32>
    %44 = vector.broadcast %43 : vector<8x1xf32> to vector<8x8xf32>
    %45 = arith.subf %41, %44 : vector<8x8xf32>
    %46 = math.exp %45 : vector<8x8xf32>
    %cst_16 = arith.constant dense<0.000000e+00> : vector<8xf32>
    %47 = vector.multi_reduction <add>, %46, %cst_16 [1] : vector<8x8xf32> to vector<8xf32>
    %48 = vector.shape_cast %47 : vector<8xf32> to vector<8x1xf32>
    %49 = tpu.reciprocal %48 {approx = true} : vector<8x1xf32> -> vector<8x1xf32>
    %50 = vector.broadcast %49 : vector<8x1xf32> to vector<8x8xf32>
    %51 = arith.mulf %46, %50 : vector<8x8xf32>
    %52 = arith.truncf %51 : vector<8x8xf32> to vector<8x8xbf16>
    %53 = vector.extract_strided_slice %9 {offsets = [0, 8], sizes = [8, 8], strides = [1, 1]} : vector<8x32xbf16> to vector<8x8xbf16>
    %cst_17 = arith.constant dense<0.000000e+00> : vector<8x8xf32>
    %54 = tpu.matmul %52, %53, %cst_17 {dimension_numbers = #tpu.dot_dimension_numbers<[1], [0], [0], [1], [0, 0, 1, 1], [], []>} : vector<8x8xbf16>, vector<8x8xbf16>, vector<8x8xf32> -> vector<8x8xf32>
    %55 = vector.extract_strided_slice %18 {offsets = [0, 16], sizes = [8, 8], strides = [1, 1]} : vector<8x32xbf16> to vector<8x8xbf16>
    %56 = vector.extract_strided_slice %8 {offsets = [0, 16], sizes = [8, 8], strides = [1, 1]} : vector<8x32xbf16> to vector<8x8xbf16>
    %cst_18 = arith.constant dense<0.000000e+00> : vector<8x8xf32>
    %57 = tpu.matmul %55, %56, %cst_18 {dimension_numbers = #tpu.dot_dimension_numbers<[1], [1], [0], [0], [0, 0, 1, 0], [], []>} : vector<8x8xbf16>, vector<8x8xbf16>, vector<8x8xf32> -> vector<8x8xf32>
    %58 = vector.broadcast %16 : vector<1x8xf32> to vector<8x8xf32>
    %59 = arith.addf %57, %58 : vector<8x8xf32>
    %cst_19 = arith.constant dense<0xFF800000> : vector<8xf32>
    %60 = vector.multi_reduction <maximumf>, %59, %cst_19 [1] : vector<8x8xf32> to vector<8xf32>
    %61 = vector.shape_cast %60 : vector<8xf32> to vector<8x1xf32>
    %62 = vector.broadcast %61 : vector<8x1xf32> to vector<8x8xf32>
    %63 = arith.subf %59, %62 : vector<8x8xf32>
    %64 = math.exp %63 : vector<8x8xf32>
    %cst_20 = arith.constant dense<0.000000e+00> : vector<8xf32>
    %65 = vector.multi_reduction <add>, %64, %cst_20 [1] : vector<8x8xf32> to vector<8xf32>
    %66 = vector.shape_cast %65 : vector<8xf32> to vector<8x1xf32>
    %67 = tpu.reciprocal %66 {approx = true} : vector<8x1xf32> -> vector<8x1xf32>
    %68 = vector.broadcast %67 : vector<8x1xf32> to vector<8x8xf32>
    %69 = arith.mulf %64, %68 : vector<8x8xf32>
    %70 = arith.truncf %69 : vector<8x8xf32> to vector<8x8xbf16>
    %71 = vector.extract_strided_slice %9 {offsets = [0, 16], sizes = [8, 8], strides = [1, 1]} : vector<8x32xbf16> to vector<8x8xbf16>
    %cst_21 = arith.constant dense<0.000000e+00> : vector<8x8xf32>
    %72 = tpu.matmul %70, %71, %cst_21 {dimension_numbers = #tpu.dot_dimension_numbers<[1], [0], [0], [1], [0, 0, 1, 1], [], []>} : vector<8x8xbf16>, vector<8x8xbf16>, vector<8x8xf32> -> vector<8x8xf32>
    %73 = vector.extract_strided_slice %18 {offsets = [0, 24], sizes = [8, 8], strides = [1, 1]} : vector<8x32xbf16> to vector<8x8xbf16>
    %74 = vector.extract_strided_slice %8 {offsets = [0, 24], sizes = [8, 8], strides = [1, 1]} : vector<8x32xbf16> to vector<8x8xbf16>
    %cst_22 = arith.constant dense<0.000000e+00> : vector<8x8xf32>
    %75 = tpu.matmul %73, %74, %cst_22 {dimension_numbers = #tpu.dot_dimension_numbers<[1], [1], [0], [0], [0, 0, 1, 0], [], []>} : vector<8x8xbf16>, vector<8x8xbf16>, vector<8x8xf32> -> vector<8x8xf32>
    %76 = vector.broadcast %16 : vector<1x8xf32> to vector<8x8xf32>
    %77 = arith.addf %75, %76 : vector<8x8xf32>
    %cst_23 = arith.constant dense<0xFF800000> : vector<8xf32>
    %78 = vector.multi_reduction <maximumf>, %77, %cst_23 [1] : vector<8x8xf32> to vector<8xf32>
    %79 = vector.shape_cast %78 : vector<8xf32> to vector<8x1xf32>
    %80 = vector.broadcast %79 : vector<8x1xf32> to vector<8x8xf32>
    %81 = arith.subf %77, %80 : vector<8x8xf32>
    %82 = math.exp %81 : vector<8x8xf32>
    %cst_24 = arith.constant dense<0.000000e+00> : vector<8xf32>
    %83 = vector.multi_reduction <add>, %82, %cst_24 [1] : vector<8x8xf32> to vector<8xf32>
    %84 = vector.shape_cast %83 : vector<8xf32> to vector<8x1xf32>
    %85 = tpu.reciprocal %84 {approx = true} : vector<8x1xf32> -> vector<8x1xf32>
    %86 = vector.broadcast %85 : vector<8x1xf32> to vector<8x8xf32>
    %87 = arith.mulf %82, %86 : vector<8x8xf32>
    %88 = arith.truncf %87 : vector<8x8xf32> to vector<8x8xbf16>
    %89 = vector.extract_strided_slice %9 {offsets = [0, 24], sizes = [8, 8], strides = [1, 1]} : vector<8x32xbf16> to vector<8x8xbf16>
    %cst_25 = arith.constant dense<0.000000e+00> : vector<8x8xf32>
    %90 = tpu.matmul %88, %89, %cst_25 {dimension_numbers = #tpu.dot_dimension_numbers<[1], [0], [0], [1], [0, 0, 1, 1], [], []>} : vector<8x8xbf16>, vector<8x8xbf16>, vector<8x8xf32> -> vector<8x8xf32>
    %91 = tpu.concatenate %36, %54, %72, %90 in 1 : vector<8x8xf32>, vector<8x8xf32>, vector<8x8xf32>, vector<8x8xf32> -> vector<8x32xf32>
    %92 = arith.truncf %91 : vector<8x32xf32> to vector<8x32xbf16>
    %c0_26 = arith.constant 0 : index
    %c0_27 = arith.constant 0 : index
    %c0_28 = arith.constant 0 : index
    %93 = vector.load %arg4[%c0_26, %c0_27, %c0_28] : memref<1x8x32xbf16, #tpu.memory_space<vmem>>, vector<1x8x32xbf16>
    %94 = vector.shape_cast %93 : vector<1x8x32xbf16> to vector<8x32xbf16>
    %95 = vector.shape_cast %92 : vector<8x32xbf16> to vector<1x8x32xbf16>
    tpu.vector_store %arg4[%c0_26, %c0_27, %c0_28], %95 {strides = array<i32>} : memref<1x8x32xbf16, #tpu.memory_space<vmem>>, vector<1x8x32xbf16>,
    return
  }
  func.func @transform_0(%arg0: i32, %arg1: i32) -> (i32, i32, i32) {
    %c0_i32 = arith.constant 0 : i32
    %c0_i32_0 = arith.constant 0 : i32
    %c0_i32_1 = arith.constant 0 : i32
    return %arg0, %c0_i32, %c0_i32_0 : i32, i32, i32
  }
  func.func @transform_1(%arg0: i32, %arg1: i32) -> (i32, i32, i32) {
    %c0_i32 = arith.constant 0 : i32
    %c0_i32_0 = arith.constant 0 : i32
    %c0_i32_1 = arith.constant 0 : i32
    return %arg0, %c0_i32, %c0_i32_0 : i32, i32, i32
  }
  func.func @transform_2(%arg0: i32, %arg1: i32) -> (i32, i32, i32) {
    %c0_i32 = arith.constant 0 : i32
    %c0_i32_0 = arith.constant 0 : i32
    return %arg0, %arg1, %c0_i32 : i32, i32, i32
  }
}

module attributes {stable_mosaic.version = 11 : i64} {
  func.func @_ln_matmul_kernel(%arg0: i32, %arg1: i32, %arg2: memref<16x32xbf16, #tpu.memory_space<vmem>>, %arg3: memref<1x32xf32, #tpu.memory_space<vmem>>, %arg4: memref<1x32xf32, #tpu.memory_space<vmem>>, %arg5: memref<32x64xbf16, #tpu.memory_space<vmem>>, %arg6: memref<1x64xf32, #tpu.memory_space<vmem>>, %arg7: memref<16x64xbf16, #tpu.memory_space<vmem>>, %arg8: memref<16x32xbf16, #tpu.memory_space<vmem>>) attributes {dimension_semantics = [#tpu.dimension_semantics<parallel>, #tpu.dimension_semantics<arbitrary>], iteration_bounds = array<i64: 1, 1>, scalar_prefetch = 0 : i64, scratch_operands = 1 : i64, tpu.core_type = #tpu.core_type<tc>, window_params = [{transform_indices = @transform_0, window_bounds = array<i64: 16, 32>}, {pipeline_mode = #tpu.pipeline_mode<synchronous>, transform_indices = @transform_1, window_bounds = array<i64: 1, 32>}, {pipeline_mode = #tpu.pipeline_mode<synchronous>, transform_indices = @transform_2, window_bounds = array<i64: 1, 32>}, {transform_indices = @transform_3, window_bounds = array<i64: 32, 64>}, {transform_indices = @transform_4, window_bounds = array<i64: 1, 64>}, {transform_indices = @transform_5, window_bounds = array<i64: 16, 64>}]} {
    %c0_i32 = arith.constant 0 : i32
    %0 = arith.cmpi eq, %arg1, %c0_i32 : i32
    %1 = arith.extui %0 : i1 to i32
    %c0_i32_0 = arith.constant 0 : i32
    %2 = arith.cmpi ne, %1, %c0_i32_0 : i32
    scf.if %2 {
      %c0_9 = arith.constant 0 : index
      %c0_10 = arith.constant 0 : index
      %13 = vector.load %arg2[%c0_9, %c0_10] : memref<16x32xbf16, #tpu.memory_space<vmem>>, vector<16x32xbf16>
      %14 = arith.extf %13 : vector<16x32xbf16> to vector<16x32xf32>
      %cst_11 = arith.constant dense<0.000000e+00> : vector<16xf32>
      %15 = vector.multi_reduction <add>, %14, %cst_11 [1] : vector<16x32xf32> to vector<16xf32>
      %16 = vector.shape_cast %15 : vector<16xf32> to vector<16x1xf32>
      %cst_12 = arith.constant 3.200000e+01 : f32
      %17 = vector.broadcast %cst_12 : f32 to vector<16x1xf32>
      %18 = arith.divf %16, %17 : vector<16x1xf32>
      %19 = vector.broadcast %18 : vector<16x1xf32> to vector<16x32xf32>
      %20 = arith.subf %14, %19 : vector<16x32xf32>
      %21 = arith.mulf %20, %20 : vector<16x32xf32>
      %cst_13 = arith.constant dense<0.000000e+00> : vector<16xf32>
      %22 = vector.multi_reduction <add>, %21, %cst_13 [1] : vector<16x32xf32> to vector<16xf32>
      %23 = vector.shape_cast %22 : vector<16xf32> to vector<16x1xf32>
      %cst_14 = arith.constant 3.100000e+01 : f32
      %24 = vector.broadcast %cst_14 : f32 to vector<16x1xf32>
      %25 = arith.divf %23, %24 : vector<16x1xf32>
      %c0_15 = arith.constant 0 : index
      %c0_16 = arith.constant 0 : index
      %26 = vector.load %arg3[%c0_15, %c0_16] : memref<1x32xf32, #tpu.memory_space<vmem>>, vector<1x32xf32>
      %27 = vector.broadcast %18 : vector<16x1xf32> to vector<16x32xf32>
      %28 = arith.subf %14, %27 : vector<16x32xf32>
      %29 = vector.broadcast %26 : vector<1x32xf32> to vector<16x32xf32>
      %30 = arith.mulf %29, %28 : vector<16x32xf32>
      %31 = math.sqrt %25 : vector<16x1xf32>
      %cst_17 = arith.constant 9.99999997E-7 : f32
      %32 = vector.broadcast %cst_17 : f32 to vector<16x1xf32>
      %33 = arith.addf %31, %32 : vector<16x1xf32>
      %34 = vector.broadcast %33 : vector<16x1xf32> to vector<16x32xf32>
      %35 = arith.divf %30, %34 : vector<16x32xf32>
      %c0_18 = arith.constant 0 : index
      %c0_19 = arith.constant 0 : index
      %36 = vector.load %arg4[%c0_18, %c0_19] : memref<1x32xf32, #tpu.memory_space<vmem>>, vector<1x32xf32>
      %37 = vector.broadcast %36 : vector<1x32xf32> to vector<16x32xf32>
      %38 = arith.addf %35, %37 : vector<16x32xf32>
      %39 = arith.truncf %38 : vector<16x32xf32> to vector<16x32xbf16>
      %c0_20 = arith.constant 0 : index
      %c0_21 = arith.constant 0 : index
      %40 = vector.load %arg8[%c0_20, %c0_21] : memref<16x32xbf16, #tpu.memory_space<vmem>>, vector<16x32xbf16>
      tpu.vector_store %arg8[%c0_20, %c0_21], %39 {strides = array<i32>} : memref<16x32xbf16, #tpu.memory_space<vmem>>, vector<16x32xbf16>,
    } else {
    }
    %c0 = arith.constant 0 : index
    %c0_1 = arith.constant 0 : index
    %3 = vector.load %arg8[%c0, %c0_1] : memref<16x32xbf16, #tpu.memory_space<vmem>>, vector<16x32xbf16>
    %c0_2 = arith.constant 0 : index
    %c0_3 = arith.constant 0 : index
    %4 = vector.load %arg5[%c0_2, %c0_3] : memref<32x64xbf16, #tpu.memory_space<vmem>>, vector<32x64xbf16>
    %cst = arith.constant dense<0.000000e+00> : vector<16x64xf32>
    %5 = tpu.matmul %3, %4, %cst {dimension_numbers = #tpu.dot_dimension_numbers<[1], [0], [0], [1], [0, 0, 1, 1], [], []>} : vector<16x32xbf16>, vector<32x64xbf16>, vector<16x64xf32> -> vector<16x64xf32>
    %c0_4 = arith.constant 0 : index
    %c0_5 = arith.constant 0 : index
    %6 = vector.load %arg6[%c0_4, %c0_5] : memref<1x64xf32, #tpu.memory_space<vmem>>, vector<1x64xf32>
    %7 = vector.broadcast %6 : vector<1x64xf32> to vector<16x64xf32>
    %8 = arith.addf %5, %7 : vector<16x64xf32>
    %cst_6 = arith.constant 0.000000e+00 : f32
    %9 = vector.broadcast %cst_6 : f32 to vector<16x64xf32>
    %10 = arith.maximumf %8, %9 : vector<16x64xf32>
    %11 = arith.truncf %10 : vector<16x64xf32> to vector<16x64xbf16>
    %c0_7 = arith.constant 0 : index
    %c0_8 = arith.constant 0 : index
    %12 = vector.load %arg7[%c0_7, %c0_8] : memref<16x64xbf16, #tpu.memory_space<vmem>>, vector<16x64xbf16>
    tpu.vector_store %arg7[%c0_7, %c0_8], %11 {strides = array<i32>} : memref<16x64xbf16, #tpu.memory_space<vmem>>, vector<16x64xbf16>,
    return
  }
  func.func @transform_0(%arg0: i32, %arg1: i32) -> (i32, i32) {
    %c0_i32 = arith.constant 0 : i32
    %c0_i32_0 = arith.constant 0 : i32
    return %arg0, %c0_i32 : i32, i32
  }
  func.func @transform_1(%arg0: i32, %arg1: i32) -> (i32, i32) {
    %c0_i32 = arith.constant 0 : i32
    %c0_i32_0 = arith.constant 0 : i32
    %c0_i32_1 = arith.constant 0 : i32
    return %c0_i32, %c0_i32_0 : i32, i32
  }
  func.func @transform_2(%arg0: i32, %arg1: i32) -> (i32, i32) {
    %c0_i32 = arith.constant 0 : i32
    %c0_i32_0 = arith.constant 0 : i32
    %c0_i32_1 = arith.constant 0 : i32
    return %c0_i32, %c0_i32_0 : i32, i32
  }
  func.func @transform_3(%arg0: i32, %arg1: i32) -> (i32, i32) {
    %c0_i32 = arith.constant 0 : i32
    %c0_i32_0 = arith.constant 0 : i32
    return %c0_i32, %arg1 : i32, i32
  }
  func.func @transform_4(%arg0: i32, %arg1: i32) -> (i32, i32) {
    %c0_i32 = arith.constant 0 : i32
    %c0_i32_0 = arith.constant 0 : i32
    return %c0_i32, %arg1 : i32, i32
  }
  func.func @transform_5(%arg0: i32, %arg1: i32) -> (i32, i32) {
    %c0_i32 = arith.constant 0 : i32
    return %arg0, %arg1 : i32, i32
  }
}

module attributes {stable_mosaic.version = 11 : i64} {
  func.func @_matmul_kernel(%arg0: i32, %arg1: i32, %arg2: i32, %arg3: memref<16x64xbf16, #tpu.memory_space<vmem>>, %arg4: memref<64x32xbf16, #tpu.memory_space<vmem>>, %arg5: memref<1x32xf32, #tpu.memory_space<vmem>>, %arg6: memref<16x32xbf16, #tpu.memory_space<vmem>>, %arg7: memref<16x32xbf16, #tpu.memory_space<vmem>>, %arg8: memref<16x32xf32, #tpu.memory_space<vmem>>) attributes {dimension_semantics = [#tpu.dimension_semantics<parallel>, #tpu.dimension_semantics<parallel>, #tpu.dimension_semantics<arbitrary>], iteration_bounds = array<i64: 1, 1, 1>, scalar_prefetch = 0 : i64, scratch_operands = 1 : i64, tpu.core_type = #tpu.core_type<tc>, window_params = [{transform_indices = @transform_0, window_bounds = array<i64: 16, 64>}, {transform_indices = @transform_1, window_bounds = array<i64: 64, 32>}, {transform_indices = @transform_2, window_bounds = array<i64: 1, 32>}, {transform_indices = @transform_3, window_bounds = array<i64: 16, 32>}, {transform_indices = @transform_4, window_bounds = array<i64: 16, 32>}]} {
    %c0_i32 = arith.constant 0 : i32
    %0 = arith.cmpi eq, %arg2, %c0_i32 : i32
    %1 = arith.extui %0 : i1 to i32
    %c0_i32_0 = arith.constant 0 : i32
    %2 = arith.cmpi ne, %1, %c0_i32_0 : i32
    scf.if %2 {
      %cst_10 = arith.constant 0.000000e+00 : f32
      %12 = vector.broadcast %cst_10 : f32 to vector<16x32xf32>
      %c0_11 = arith.constant 0 : index
      %c0_12 = arith.constant 0 : index
      %13 = vector.load %arg8[%c0_11, %c0_12] : memref<16x32xf32, #tpu.memory_space<vmem>>, vector<16x32xf32>
      tpu.vector_store %arg8[%c0_11, %c0_12], %12 {strides = array<i32>} : memref<16x32xf32, #tpu.memory_space<vmem>>, vector<16x32xf32>,
    } else {
    }
    %c0 = arith.constant 0 : index
    %c0_1 = arith.constant 0 : index
    %3 = vector.load %arg8[%c0, %c0_1] : memref<16x32xf32, #tpu.memory_space<vmem>>, vector<16x32xf32>
    %c0_2 = arith.constant 0 : index
    %c0_3 = arith.constant 0 : index
    %4 = vector.load %arg3[%c0_2, %c0_3] : memref<16x64xbf16, #tpu.memory_space<vmem>>, vector<16x64xbf16>
    %c0_4 = arith.constant 0 : index
    %c0_5 = arith.constant 0 : index
    %5 = vector.load %arg4[%c0_4, %c0_5] : memref<64x32xbf16, #tpu.memory_space<vmem>>, vector<64x32xbf16>
    %cst = arith.constant dense<0.000000e+00> : vector<16x32xf32>
    %6 = tpu.matmul %4, %5, %cst {dimension_numbers = #tpu.dot_dimension_numbers<[1], [0], [0], [1], [0, 0, 1, 1], [], []>} : vector<16x64xbf16>, vector<64x32xbf16>, vector<16x32xf32> -> vector<16x32xf32>
    %7 = arith.addf %3, %6 : vector<16x32xf32>
    %c0_6 = arith.constant 0 : index
    %c0_7 = arith.constant 0 : index
    %8 = vector.load %arg8[%c0_6, %c0_7] : memref<16x32xf32, #tpu.memory_space<vmem>>, vector<16x32xf32>
    tpu.vector_store %arg8[%c0_6, %c0_7], %7 {strides = array<i32>} : memref<16x32xf32, #tpu.memory_space<vmem>>, vector<16x32xf32>,
    %c0_i32_8 = arith.constant 0 : i32
    %9 = arith.cmpi eq, %arg2, %c0_i32_8 : i32
    %10 = arith.extui %9 : i1 to i32
    %c0_i32_9 = arith.constant 0 : i32
    %11 = arith.cmpi ne, %10, %c0_i32_9 : i32
    scf.if %11 {
      %c0_10 = arith.constant 0 : index
      %c0_11 = arith.constant 0 : index
      %12 = vector.load %arg8[%c0_10, %c0_11] : memref<16x32xf32, #tpu.memory_space<vmem>>, vector<16x32xf32>
      %c0_12 = arith.constant 0 : index
      %c0_13 = arith.constant 0 : index
      %13 = vector.load %arg5[%c0_12, %c0_13] : memref<1x32xf32, #tpu.memory_space<vmem>>, vector<1x32xf32>
      %14 = vector.broadcast %13 : vector<1x32xf32> to vector<16x32xf32>
      %15 = arith.addf %12, %14 : vector<16x32xf32>
      %c0_14 = arith.constant 0 : index
      %c0_15 = arith.constant 0 : index
      %16 = vector.load %arg6[%c0_14, %c0_15] : memref<16x32xbf16, #tpu.memory_space<vmem>>, vector<16x32xbf16>
      %17 = arith.extf %16 : vector<16x32xbf16> to vector<16x32xf32>
      %18 = arith.addf %15, %17 : vector<16x32xf32>
      %19 = arith.truncf %18 : vector<16x32xf32> to vector<16x32xbf16>
      %c0_16 = arith.constant 0 : index
      %c0_17 = arith.constant 0 : index
      %20 = vector.load %arg7[%c0_16, %c0_17] : memref<16x32xbf16, #tpu.memory_space<vmem>>, vector<16x32xbf16>
      tpu.vector_store %arg7[%c0_16, %c0_17], %19 {strides = array<i32>} : memref<16x32xbf16, #tpu.memory_space<vmem>>, vector<16x32xbf16>,
    } else {
    }
    return
  }
  func.func @transform_0(%arg0: i32, %arg1: i32, %arg2: i32) -> (i32, i32) {
    %c0_i32 = arith.constant 0 : i32
    return %arg0, %arg2 : i32, i32
  }
  func.func @transform_1(%arg0: i32, %arg1: i32, %arg2: i32) -> (i32, i32) {
    %c0_i32 = arith.constant 0 : i32
    return %arg2, %arg1 : i32, i32
  }
  func.func @transform_2(%arg0: i32, %arg1: i32, %arg2: i32) -> (i32, i32) {
    %c0_i32 = arith.constant 0 : i32
    %c0_i32_0 = arith.constant 0 : i32
    return %c0_i32, %arg1 : i32, i32
  }
  func.func @transform_3(%arg0: i32, %arg1: i32, %arg2: i32) -> (i32, i32) {
    %c0_i32 = arith.constant 0 : i32
    return %arg0, %arg1 : i32, i32
  }
  func.func @transform_4(%arg0: i32, %arg1: i32, %arg2: i32) -> (i32, i32) {
    %c0_i32 = arith.constant 0 : i32
    return %arg0, %arg1 : i32, i32
  }
}

module attributes {stable_mosaic.version = 11 : i64} {
  func.func @_matmul_kernel(%arg0: i32, %arg1: i32, %arg2: i32, %arg3: memref<16x32xbf16, #tpu.memory_space<vmem>>, %arg4: memref<32x64xbf16, #tpu.memory_space<vmem>>, %arg5: memref<1x64xf32, #tpu.memory_space<vmem>>, %arg6: memref<16x64xbf16, #tpu.memory_space<vmem>>, %arg7: memref<16x64xf32, #tpu.memory_space<vmem>>) attributes {dimension_semantics = [#tpu.dimension_semantics<parallel>, #tpu.dimension_semantics<parallel>, #tpu.dimension_semantics<arbitrary>], iteration_bounds = array<i64: 1, 1, 1>, scalar_prefetch = 0 : i64, scratch_operands = 1 : i64, tpu.core_type = #tpu.core_type<tc>, window_params = [{transform_indices = @transform_0, window_bounds = array<i64: 16, 32>}, {transform_indices = @transform_1, window_bounds = array<i64: 32, 64>}, {transform_indices = @transform_2, window_bounds = array<i64: 1, 64>}, {transform_indices = @transform_3, window_bounds = array<i64: 16, 64>}]} {
    %c0_i32 = arith.constant 0 : i32
    %0 = arith.cmpi eq, %arg2, %c0_i32 : i32
    %1 = arith.extui %0 : i1 to i32
    %c0_i32_0 = arith.constant 0 : i32
    %2 = arith.cmpi ne, %1, %c0_i32_0 : i32
    scf.if %2 {
      %cst_10 = arith.constant 0.000000e+00 : f32
      %12 = vector.broadcast %cst_10 : f32 to vector<16x64xf32>
      %c0_11 = arith.constant 0 : index
      %c0_12 = arith.constant 0 : index
      %13 = vector.load %arg7[%c0_11, %c0_12] : memref<16x64xf32, #tpu.memory_space<vmem>>, vector<16x64xf32>
      tpu.vector_store %arg7[%c0_11, %c0_12], %12 {strides = array<i32>} : memref<16x64xf32, #tpu.memory_space<vmem>>, vector<16x64xf32>,
    } else {
    }
    %c0 = arith.constant 0 : index
    %c0_1 = arith.constant 0 : index
    %3 = vector.load %arg7[%c0, %c0_1] : memref<16x64xf32, #tpu.memory_space<vmem>>, vector<16x64xf32>
    %c0_2 = arith.constant 0 : index
    %c0_3 = arith.constant 0 : index
    %4 = vector.load %arg3[%c0_2, %c0_3] : memref<16x32xbf16, #tpu.memory_space<vmem>>, vector<16x32xbf16>
    %c0_4 = arith.constant 0 : index
    %c0_5 = arith.constant 0 : index
    %5 = vector.load %arg4[%c0_4, %c0_5] : memref<32x64xbf16, #tpu.memory_space<vmem>>, vector<32x64xbf16>
    %cst = arith.constant dense<0.000000e+00> : vector<16x64xf32>
    %6 = tpu.matmul %4, %5, %cst {dimension_numbers = #tpu.dot_dimension_numbers<[1], [0], [0], [1], [0, 0, 1, 1], [], []>} : vector<16x32xbf16>, vector<32x64xbf16>, vector<16x64xf32> -> vector<16x64xf32>
    %7 = arith.addf %3, %6 : vector<16x64xf32>
    %c0_6 = arith.constant 0 : index
    %c0_7 = arith.constant 0 : index
    %8 = vector.load %arg7[%c0_6, %c0_7] : memref<16x64xf32, #tpu.memory_space<vmem>>, vector<16x64xf32>
    tpu.vector_store %arg7[%c0_6, %c0_7], %7 {strides = array<i32>} : memref<16x64xf32, #tpu.memory_space<vmem>>, vector<16x64xf32>,
    %c0_i32_8 = arith.constant 0 : i32
    %9 = arith.cmpi eq, %arg2, %c0_i32_8 : i32
    %10 = arith.extui %9 : i1 to i32
    %c0_i32_9 = arith.constant 0 : i32
    %11 = arith.cmpi ne, %10, %c0_i32_9 : i32
    scf.if %11 {
      %c0_10 = arith.constant 0 : index
      %c0_11 = arith.constant 0 : index
      %12 = vector.load %arg7[%c0_10, %c0_11] : memref<16x64xf32, #tpu.memory_space<vmem>>, vector<16x64xf32>
      %c0_12 = arith.constant 0 : index
      %c0_13 = arith.constant 0 : index
      %13 = vector.load %arg5[%c0_12, %c0_13] : memref<1x64xf32, #tpu.memory_space<vmem>>, vector<1x64xf32>
      %14 = vector.broadcast %13 : vector<1x64xf32> to vector<16x64xf32>
      %15 = arith.addf %12, %14 : vector<16x64xf32>
      %16 = arith.truncf %15 : vector<16x64xf32> to vector<16x64xbf16>
      %c0_14 = arith.constant 0 : index
      %c0_15 = arith.constant 0 : index
      %17 = vector.load %arg6[%c0_14, %c0_15] : memref<16x64xbf16, #tpu.memory_space<vmem>>, vector<16x64xbf16>
      tpu.vector_store %arg6[%c0_14, %c0_15], %16 {strides = array<i32>} : memref<16x64xbf16, #tpu.memory_space<vmem>>, vector<16x64xbf16>,
    } else {
    }
    return
  }
  func.func @transform_0(%arg0: i32, %arg1: i32, %arg2: i32) -> (i32, i32) {
    %c0_i32 = arith.constant 0 : i32
    return %arg0, %arg2 : i32, i32
  }
  func.func @transform_1(%arg0: i32, %arg1: i32, %arg2: i32) -> (i32, i32) {
    %c0_i32 = arith.constant 0 : i32
    return %arg2, %arg1 : i32, i32
  }
  func.func @transform_2(%arg0: i32, %arg1: i32, %arg2: i32) -> (i32, i32) {
    %c0_i32 = arith.constant 0 : i32
    %c0_i32_0 = arith.constant 0 : i32
    return %c0_i32, %arg1 : i32, i32
  }
  func.func @transform_3(%arg0: i32, %arg1: i32, %arg2: i32) -> (i32, i32) {
    %c0_i32 = arith.constant 0 : i32
    return %arg0, %arg1 : i32, i32
  }
}

module attributes {stable_mosaic.version = 11 : i64} {
  func.func @_ln_matmul_kernel(%arg0: i32, %arg1: i32, %arg2: memref<16x32xbf16, #tpu.memory_space<vmem>>, %arg3: memref<1x32xf32, #tpu.memory_space<vmem>>, %arg4: memref<1x32xf32, #tpu.memory_space<vmem>>, %arg5: memref<32x32xbf16, #tpu.memory_space<vmem>>, %arg6: memref<1x32xf32, #tpu.memory_space<vmem>>, %arg7: memref<16x32xbf16, #tpu.memory_space<vmem>>, %arg8: memref<16x32xbf16, #tpu.memory_space<vmem>>) attributes {dimension_semantics = [#tpu.dimension_semantics<parallel>, #tpu.dimension_semantics<arbitrary>], iteration_bounds = array<i64: 1, 1>, scalar_prefetch = 0 : i64, scratch_operands = 1 : i64, tpu.core_type = #tpu.core_type<tc>, window_params = [{transform_indices = @transform_0, window_bounds = array<i64: 16, 32>}, {pipeline_mode = #tpu.pipeline_mode<synchronous>, transform_indices = @transform_1, window_bounds = array<i64: 1, 32>}, {pipeline_mode = #tpu.pipeline_mode<synchronous>, transform_indices = @transform_2, window_bounds = array<i64: 1, 32>}, {transform_indices = @transform_3, window_bounds = array<i64: 32, 32>}, {transform_indices = @transform_4, window_bounds = array<i64: 1, 32>}, {transform_indices = @transform_5, window_bounds = array<i64: 16, 32>}]} {
    %c0_i32 = arith.constant 0 : i32
    %0 = arith.cmpi eq, %arg1, %c0_i32 : i32
    %1 = arith.extui %0 : i1 to i32
    %c0_i32_0 = arith.constant 0 : i32
    %2 = arith.cmpi ne, %1, %c0_i32_0 : i32
    scf.if %2 {
      %c0_8 = arith.constant 0 : index
      %c0_9 = arith.constant 0 : index
      %11 = vector.load %arg2[%c0_8, %c0_9] : memref<16x32xbf16, #tpu.memory_space<vmem>>, vector<16x32xbf16>
      %12 = arith.extf %11 : vector<16x32xbf16> to vector<16x32xf32>
      %cst_10 = arith.constant dense<0.000000e+00> : vector<16xf32>
      %13 = vector.multi_reduction <add>, %12, %cst_10 [1] : vector<16x32xf32> to vector<16xf32>
      %14 = vector.shape_cast %13 : vector<16xf32> to vector<16x1xf32>
      %cst_11 = arith.constant 3.200000e+01 : f32
      %15 = vector.broadcast %cst_11 : f32 to vector<16x1xf32>
      %16 = arith.divf %14, %15 : vector<16x1xf32>
      %17 = vector.broadcast %16 : vector<16x1xf32> to vector<16x32xf32>
      %18 = arith.subf %12, %17 : vector<16x32xf32>
      %19 = arith.mulf %18, %18 : vector<16x32xf32>
      %cst_12 = arith.constant dense<0.000000e+00> : vector<16xf32>
      %20 = vector.multi_reduction <add>, %19, %cst_12 [1] : vector<16x32xf32> to vector<16xf32>
      %21 = vector.shape_cast %20 : vector<16xf32> to vector<16x1xf32>
      %cst_13 = arith.constant 3.100000e+01 : f32
      %22 = vector.broadcast %cst_13 : f32 to vector<16x1xf32>
      %23 = arith.divf %21, %22 : vector<16x1xf32>
      %c0_14 = arith.constant 0 : index
      %c0_15 = arith.constant 0 : index
      %24 = vector.load %arg3[%c0_14, %c0_15] : memref<1x32xf32, #tpu.memory_space<vmem>>, vector<1x32xf32>
      %25 = vector.broadcast %16 : vector<16x1xf32> to vector<16x32xf32>
      %26 = arith.subf %12, %25 : vector<16x32xf32>
      %27 = vector.broadcast %24 : vector<1x32xf32> to vector<16x32xf32>
      %28 = arith.mulf %27, %26 : vector<16x32xf32>
      %29 = math.sqrt %23 : vector<16x1xf32>
      %cst_16 = arith.constant 9.99999997E-7 : f32
      %30 = vector.broadcast %cst_16 : f32 to vector<16x1xf32>
      %31 = arith.addf %29, %30 : vector<16x1xf32>
      %32 = vector.broadcast %31 : vector<16x1xf32> to vector<16x32xf32>
      %33 = arith.divf %28, %32 : vector<16x32xf32>
      %c0_17 = arith.constant 0 : index
      %c0_18 = arith.constant 0 : index
      %34 = vector.load %arg4[%c0_17, %c0_18] : memref<1x32xf32, #tpu.memory_space<vmem>>, vector<1x32xf32>
      %35 = vector.broadcast %34 : vector<1x32xf32> to vector<16x32xf32>
      %36 = arith.addf %33, %35 : vector<16x32xf32>
      %37 = arith.truncf %36 : vector<16x32xf32> to vector<16x32xbf16>
      %c0_19 = arith.constant 0 : index
      %c0_20 = arith.constant 0 : index
      %38 = vector.load %arg8[%c0_19, %c0_20] : memref<16x32xbf16, #tpu.memory_space<vmem>>, vector<16x32xbf16>
      tpu.vector_store %arg8[%c0_19, %c0_20], %37 {strides = array<i32>} : memref<16x32xbf16, #tpu.memory_space<vmem>>, vector<16x32xbf16>,
    } else {
    }
    %c0 = arith.constant 0 : index
    %c0_1 = arith.constant 0 : index
    %3 = vector.load %arg8[%c0, %c0_1] : memref<16x32xbf16, #tpu.memory_space<vmem>>, vector<16x32xbf16>
    %c0_2 = arith.constant 0 : index
    %c0_3 = arith.constant 0 : index
    %4 = vector.load %arg5[%c0_2, %c0_3] : memref<32x32xbf16, #tpu.memory_space<vmem>>, vector<32x32xbf16>
    %cst = arith.constant dense<0.000000e+00> : vector<16x32xf32>
    %5 = tpu.matmul %3, %4, %cst {dimension_numbers = #tpu.dot_dimension_numbers<[1], [0], [0], [1], [0, 0, 1, 1], [], []>} : vector<16x32xbf16>, vector<32x32xbf16>, vector<16x32xf32> -> vector<16x32xf32>
    %c0_4 = arith.constant 0 : index
    %c0_5 = arith.constant 0 : index
    %6 = vector.load %arg6[%c0_4, %c0_5] : memref<1x32xf32, #tpu.memory_space<vmem>>, vector<1x32xf32>
    %7 = vector.broadcast %6 : vector<1x32xf32> to vector<16x32xf32>
    %8 = arith.addf %5, %7 : vector<16x32xf32>
    %9 = arith.truncf %8 : vector<16x32xf32> to vector<16x32xbf16>
    %c0_6 = arith.constant 0 : index
    %c0_7 = arith.constant 0 : index
    %10 = vector.load %arg7[%c0_6, %c0_7] : memref<16x32xbf16, #tpu.memory_space<vmem>>, vector<16x32xbf16>
    tpu.vector_store %arg7[%c0_6, %c0_7], %9 {strides = array<i32>} : memref<16x32xbf16, #tpu.memory_space<vmem>>, vector<16x32xbf16>,
    return
  }
  func.func @transform_0(%arg0: i32, %arg1: i32) -> (i32, i32) {
    %c0_i32 = arith.constant 0 : i32
    %c0_i32_0 = arith.constant 0 : i32
    return %arg0, %c0_i32 : i32, i32
  }
  func.func @transform_1(%arg0: i32, %arg1: i32) -> (i32, i32) {
    %c0_i32 = arith.constant 0 : i32
    %c0_i32_0 = arith.constant 0 : i32
    %c0_i32_1 = arith.constant 0 : i32
    return %c0_i32, %c0_i32_0 : i32, i32
  }
  func.func @transform_2(%arg0: i32, %arg1: i32) -> (i32, i32) {
    %c0_i32 = arith.constant 0 : i32
    %c0_i32_0 = arith.constant 0 : i32
    %c0_i32_1 = arith.constant 0 : i32
    return %c0_i32, %c0_i32_0 : i32, i32
  }
  func.func @transform_3(%arg0: i32, %arg1: i32) -> (i32, i32) {
    %c0_i32 = arith.constant 0 : i32
    %c0_i32_0 = arith.constant 0 : i32
    return %c0_i32, %arg1 : i32, i32
  }
  func.func @transform_4(%arg0: i32, %arg1: i32) -> (i32, i32) {
    %c0_i32 = arith.constant 0 : i32
    %c0_i32_0 = arith.constant 0 : i32
    return %c0_i32, %arg1 : i32, i32
  }
  func.func @transform_5(%arg0: i32, %arg1: i32) -> (i32, i32) {
    %c0_i32 = arith.constant 0 : i32
    return %arg0, %arg1 : i32, i32
  }
}

module attributes {stable_mosaic.version = 11 : i64} {
  func.func @_self_attn_kernel(%arg0: i32, %arg1: i32, %arg2: memref<1x8x96xbf16, #tpu.memory_space<vmem>>, %arg3: memref<1x1x8xf32, #tpu.memory_space<vmem>>, %arg4: memref<1x8x32xbf16, #tpu.memory_space<vmem>>) attributes {dimension_semantics = [#tpu.dimension_semantics<parallel>, #tpu.dimension_semantics<parallel>], iteration_bounds = array<i64: 2, 1>, scalar_prefetch = 0 : i64, scratch_operands = 0 : i64, tpu.core_type = #tpu.core_type<tc>, window_params = [{transform_indices = @transform_0, window_bounds = array<i64: 1, 8, 96>}, {transform_indices = @transform_1, window_bounds = array<i64: 1, 1, 8>}, {transform_indices = @transform_2, window_bounds = array<i64: 1, 8, 32>}]} {
    %c8_i32 = arith.constant 8 : i32
    %0 = arith.muli %arg1, %c8_i32 : i32
    %1 = tpu.assume_multiple %0, 8 : i32
    %c0 = arith.constant 0 : index
    %2 = arith.index_cast %1 : i32 to index
    %c0_0 = arith.constant 0 : index
    %3 = vector.load %arg2[%c0, %2, %c0_0] : memref<1x8x96xbf16, #tpu.memory_space<vmem>>, vector<1x8x96xbf16>
    %4 = vector.shape_cast %3 : vector<1x8x96xbf16> to vector<8x96xbf16>
    %5 = vector.extract_strided_slice %4 {offsets = [0, 0], sizes = [8, 32], strides = [1, 1]} : vector<8x96xbf16> to vector<8x32xbf16>
    %c0_1 = arith.constant 0 : index
    %c0_2 = arith.constant 0 : index
    %c0_3 = arith.constant 0 : index
    %6 = vector.load %arg2[%c0_1, %c0_2, %c0_3] : memref<1x8x96xbf16, #tpu.memory_space<vmem>>, vector<1x8x96xbf16>
    %7 = vector.shape_cast %6 : vector<1x8x96xbf16> to vector<8x96xbf16>
    %8 = vector.extract_strided_slice %7 {offsets = [0, 32], sizes = [8, 32], strides = [1, 1]} : vector<8x96xbf16> to vector<8x32xbf16>
    %9 = vector.extract_strided_slice %7 {offsets = [0, 64], sizes = [8, 32], strides = [1, 1]} : vector<8x96xbf16> to vector<8x32xbf16>
    %c0_4 = arith.constant 0 : index
    %c0_5 = arith.constant 0 : index
    %c0_6 = arith.constant 0 : index
    %10 = vector.load %arg3[%c0_4, %c0_5, %c0_6] : memref<1x1x8xf32, #tpu.memory_space<vmem>>, vector<1x1x8xf32>
    %11 = vector.shape_cast %10 : vector<1x1x8xf32> to vector<1x8xf32>
    %cst = arith.constant 0.000000e+00 : f32
    %12 = vector.broadcast %cst : f32 to vector<1x8xf32>
    %13 = arith.cmpf ogt, %11, %12 : vector<1x8xf32>
    %cst_7 = arith.constant 0.000000e+00 : f32
    %cst_8 = arith.constant -1.000000e+09 : f32
    %14 = vector.broadcast %cst_7 : f32 to vector<1x8xf32>
    %15 = vector.broadcast %cst_8 : f32 to vector<1x8xf32>
    %16 = arith.select %13, %14, %15 : vector<1x8xi1>, vector<1x8xf32>
    %17 = tpu.iota {dimensions = array<i32: 0>} : vector<8x8xi32>
    %18 = vector.broadcast %1 : i32 to vector<8x8xi32>
    %19 = arith.addi %18, %17 : vector<8x8xi32>
    %20 = tpu.iota {dimensions = array<i32: 1>} : vector<8x8xi32>
    %21 = arith.cmpi sle, %20, %19 : vector<8x8xi32>
    %cst_9 = arith.constant 0.000000e+00 : f32
    %cst_10 = arith.constant -1.000000e+09 : f32
    %22 = vector.broadcast %cst_9 : f32 to vector<8x8xf32>
    %23 = vector.broadcast %cst_10 : f32 to vector<8x8xf32>
    %24 = arith.select %21, %22, %23 : vector<8x8xi1>, vector<8x8xf32>
    %25 = vector.broadcast %16 : vector<1x8xf32> to vector<8x8xf32>
    %26 = arith.addf %25, %24 : vector<8x8xf32>
    %cst_11 = arith.constant 3.535160e-01 : bf16
    %27 = vector.broadcast %cst_11 : bf16 to vector<8x32xbf16>
    %28 = arith.mulf %5, %27 : vector<8x32xbf16>
    %29 = vector.extract_strided_slice %28 {offsets = [0, 0], sizes = [8, 8], strides = [1, 1]} : vector<8x32xbf16> to vector<8x8xbf16>
    %30 = vector.extract_strided_slice %8 {offsets = [0, 0], sizes = [8, 8], strides = [1, 1]} : vector<8x32xbf16> to vector<8x8xbf16>
    %cst_12 = arith.constant dense<0.000000e+00> : vector<8x8xf32>
    %31 = tpu.matmul %29, %30, %cst_12 {dimension_numbers = #tpu.dot_dimension_numbers<[1], [1], [0], [0], [0, 0, 1, 0], [], []>} : vector<8x8xbf16>, vector<8x8xbf16>, vector<8x8xf32> -> vector<8x8xf32>
    %32 = arith.addf %31, %26 : vector<8x8xf32>
    %cst_13 = arith.constant dense<0xFF800000> : vector<8xf32>
    %33 = vector.multi_reduction <maximumf>, %32, %cst_13 [1] : vector<8x8xf32> to vector<8xf32>
    %34 = vector.shape_cast %33 : vector<8xf32> to vector<8x1xf32>
    %35 = vector.broadcast %34 : vector<8x1xf32> to vector<8x8xf32>
    %36 = arith.subf %32, %35 : vector<8x8xf32>
    %37 = math.exp %36 : vector<8x8xf32>
    %cst_14 = arith.constant dense<0.000000e+00> : vector<8xf32>
    %38 = vector.multi_reduction <add>, %37, %cst_14 [1] : vector<8x8xf32> to vector<8xf32>
    %39 = vector.shape_cast %38 : vector<8xf32> to vector<8x1xf32>
    %40 = tpu.reciprocal %39 {approx = true} : vector<8x1xf32> -> vector<8x1xf32>
    %41 = vector.broadcast %40 : vector<8x1xf32> to vector<8x8xf32>
    %42 = arith.mulf %37, %41 : vector<8x8xf32>
    %43 = arith.truncf %42 : vector<8x8xf32> to vector<8x8xbf16>
    %44 = vector.extract_strided_slice %9 {offsets = [0, 0], sizes = [8, 8], strides = [1, 1]} : vector<8x32xbf16> to vector<8x8xbf16>
    %cst_15 = arith.constant dense<0.000000e+00> : vector<8x8xf32>
    %45 = tpu.matmul %43, %44, %cst_15 {dimension_numbers = #tpu.dot_dimension_numbers<[1], [0], [0], [1], [0, 0, 1, 1], [], []>} : vector<8x8xbf16>, vector<8x8xbf16>, vector<8x8xf32> -> vector<8x8xf32>
    %46 = vector.extract_strided_slice %28 {offsets = [0, 8], sizes = [8, 8], strides = [1, 1]} : vector<8x32xbf16> to vector<8x8xbf16>
    %47 = vector.extract_strided_slice %8 {offsets = [0, 8], sizes = [8, 8], strides = [1, 1]} : vector<8x32xbf16> to vector<8x8xbf16>
    %cst_16 = arith.constant dense<0.000000e+00> : vector<8x8xf32>
    %48 = tpu.matmul %46, %47, %cst_16 {dimension_numbers = #tpu.dot_dimension_numbers<[1], [1], [0], [0], [0, 0, 1, 0], [], []>} : vector<8x8xbf16>, vector<8x8xbf16>, vector<8x8xf32> -> vector<8x8xf32>
    %49 = arith.addf %48, %26 : vector<8x8xf32>
    %cst_17 = arith.constant dense<0xFF800000> : vector<8xf32>
    %50 = vector.multi_reduction <maximumf>, %49, %cst_17 [1] : vector<8x8xf32> to vector<8xf32>
    %51 = vector.shape_cast %50 : vector<8xf32> to vector<8x1xf32>
    %52 = vector.broadcast %51 : vector<8x1xf32> to vector<8x8xf32>
    %53 = arith.subf %49, %52 : vector<8x8xf32>
    %54 = math.exp %53 : vector<8x8xf32>
    %cst_18 = arith.constant dense<0.000000e+00> : vector<8xf32>
    %55 = vector.multi_reduction <add>, %54, %cst_18 [1] : vector<8x8xf32> to vector<8xf32>
    %56 = vector.shape_cast %55 : vector<8xf32> to vector<8x1xf32>
    %57 = tpu.reciprocal %56 {approx = true} : vector<8x1xf32> -> vector<8x1xf32>
    %58 = vector.broadcast %57 : vector<8x1xf32> to vector<8x8xf32>
    %59 = arith.mulf %54, %58 : vector<8x8xf32>
    %60 = arith.truncf %59 : vector<8x8xf32> to vector<8x8xbf16>
    %61 = vector.extract_strided_slice %9 {offsets = [0, 8], sizes = [8, 8], strides = [1, 1]} : vector<8x32xbf16> to vector<8x8xbf16>
    %cst_19 = arith.constant dense<0.000000e+00> : vector<8x8xf32>
    %62 = tpu.matmul %60, %61, %cst_19 {dimension_numbers = #tpu.dot_dimension_numbers<[1], [0], [0], [1], [0, 0, 1, 1], [], []>} : vector<8x8xbf16>, vector<8x8xbf16>, vector<8x8xf32> -> vector<8x8xf32>
    %63 = vector.extract_strided_slice %28 {offsets = [0, 16], sizes = [8, 8], strides = [1, 1]} : vector<8x32xbf16> to vector<8x8xbf16>
    %64 = vector.extract_strided_slice %8 {offsets = [0, 16], sizes = [8, 8], strides = [1, 1]} : vector<8x32xbf16> to vector<8x8xbf16>
    %cst_20 = arith.constant dense<0.000000e+00> : vector<8x8xf32>
    %65 = tpu.matmul %63, %64, %cst_20 {dimension_numbers = #tpu.dot_dimension_numbers<[1], [1], [0], [0], [0, 0, 1, 0], [], []>} : vector<8x8xbf16>, vector<8x8xbf16>, vector<8x8xf32> -> vector<8x8xf32>
    %66 = arith.addf %65, %26 : vector<8x8xf32>
    %cst_21 = arith.constant dense<0xFF800000> : vector<8xf32>
    %67 = vector.multi_reduction <maximumf>, %66, %cst_21 [1] : vector<8x8xf32> to vector<8xf32>
    %68 = vector.shape_cast %67 : vector<8xf32> to vector<8x1xf32>
    %69 = vector.broadcast %68 : vector<8x1xf32> to vector<8x8xf32>
    %70 = arith.subf %66, %69 : vector<8x8xf32>
    %71 = math.exp %70 : vector<8x8xf32>
    %cst_22 = arith.constant dense<0.000000e+00> : vector<8xf32>
    %72 = vector.multi_reduction <add>, %71, %cst_22 [1] : vector<8x8xf32> to vector<8xf32>
    %73 = vector.shape_cast %72 : vector<8xf32> to vector<8x1xf32>
    %74 = tpu.reciprocal %73 {approx = true} : vector<8x1xf32> -> vector<8x1xf32>
    %75 = vector.broadcast %74 : vector<8x1xf32> to vector<8x8xf32>
    %76 = arith.mulf %71, %75 : vector<8x8xf32>
    %77 = arith.truncf %76 : vector<8x8xf32> to vector<8x8xbf16>
    %78 = vector.extract_strided_slice %9 {offsets = [0, 16], sizes = [8, 8], strides = [1, 1]} : vector<8x32xbf16> to vector<8x8xbf16>
    %cst_23 = arith.constant dense<0.000000e+00> : vector<8x8xf32>
    %79 = tpu.matmul %77, %78, %cst_23 {dimension_numbers = #tpu.dot_dimension_numbers<[1], [0], [0], [1], [0, 0, 1, 1], [], []>} : vector<8x8xbf16>, vector<8x8xbf16>, vector<8x8xf32> -> vector<8x8xf32>
    %80 = vector.extract_strided_slice %28 {offsets = [0, 24], sizes = [8, 8], strides = [1, 1]} : vector<8x32xbf16> to vector<8x8xbf16>
    %81 = vector.extract_strided_slice %8 {offsets = [0, 24], sizes = [8, 8], strides = [1, 1]} : vector<8x32xbf16> to vector<8x8xbf16>
    %cst_24 = arith.constant dense<0.000000e+00> : vector<8x8xf32>
    %82 = tpu.matmul %80, %81, %cst_24 {dimension_numbers = #tpu.dot_dimension_numbers<[1], [1], [0], [0], [0, 0, 1, 0], [], []>} : vector<8x8xbf16>, vector<8x8xbf16>, vector<8x8xf32> -> vector<8x8xf32>
    %83 = arith.addf %82, %26 : vector<8x8xf32>
    %cst_25 = arith.constant dense<0xFF800000> : vector<8xf32>
    %84 = vector.multi_reduction <maximumf>, %83, %cst_25 [1] : vector<8x8xf32> to vector<8xf32>
    %85 = vector.shape_cast %84 : vector<8xf32> to vector<8x1xf32>
    %86 = vector.broadcast %85 : vector<8x1xf32> to vector<8x8xf32>
    %87 = arith.subf %83, %86 : vector<8x8xf32>
    %88 = math.exp %87 : vector<8x8xf32>
    %cst_26 = arith.constant dense<0.000000e+00> : vector<8xf32>
    %89 = vector.multi_reduction <add>, %88, %cst_26 [1] : vector<8x8xf32> to vector<8xf32>
    %90 = vector.shape_cast %89 : vector<8xf32> to vector<8x1xf32>
    %91 = tpu.reciprocal %90 {approx = true} : vector<8x1xf32> -> vector<8x1xf32>
    %92 = vector.broadcast %91 : vector<8x1xf32> to vector<8x8xf32>
    %93 = arith.mulf %88, %92 : vector<8x8xf32>
    %94 = arith.truncf %93 : vector<8x8xf32> to vector<8x8xbf16>
    %95 = vector.extract_strided_slice %9 {offsets = [0, 24], sizes = [8, 8], strides = [1, 1]} : vector<8x32xbf16> to vector<8x8xbf16>
    %cst_27 = arith.constant dense<0.000000e+00> : vector<8x8xf32>
    %96 = tpu.matmul %94, %95, %cst_27 {dimension_numbers = #tpu.dot_dimension_numbers<[1], [0], [0], [1], [0, 0, 1, 1], [], []>} : vector<8x8xbf16>, vector<8x8xbf16>, vector<8x8xf32> -> vector<8x8xf32>
    %97 = tpu.concatenate %45, %62, %79, %96 in 1 : vector<8x8xf32>, vector<8x8xf32>, vector<8x8xf32>, vector<8x8xf32> -> vector<8x32xf32>
    %98 = arith.truncf %97 : vector<8x32xf32> to vector<8x32xbf16>
    %c0_28 = arith.constant 0 : index
    %c0_29 = arith.constant 0 : index
    %c0_30 = arith.constant 0 : index
    %99 = vector.load %arg4[%c0_28, %c0_29, %c0_30] : memref<1x8x32xbf16, #tpu.memory_space<vmem>>, vector<1x8x32xbf16>
    %100 = vector.shape_cast %99 : vector<1x8x32xbf16> to vector<8x32xbf16>
    %101 = vector.shape_cast %98 : vector<8x32xbf16> to vector<1x8x32xbf16>
    tpu.vector_store %arg4[%c0_28, %c0_29, %c0_30], %101 {strides = array<i32>} : memref<1x8x32xbf16, #tpu.memory_space<vmem>>, vector<1x8x32xbf16>,
    return
  }
  func.func @transform_0(%arg0: i32, %arg1: i32) -> (i32, i32, i32) {
    %c0_i32 = arith.constant 0 : i32
    %c0_i32_0 = arith.constant 0 : i32
    %c0_i32_1 = arith.constant 0 : i32
    return %arg0, %c0_i32, %c0_i32_0 : i32, i32, i32
  }
  func.func @transform_1(%arg0: i32, %arg1: i32) -> (i32, i32, i32) {
    %c0_i32 = arith.constant 0 : i32
    %c0_i32_0 = arith.constant 0 : i32
    %c0_i32_1 = arith.constant 0 : i32
    return %arg0, %c0_i32, %c0_i32_0 : i32, i32, i32
  }
  func.func @transform_2(%arg0: i32, %arg1: i32) -> (i32, i32, i32) {
    %c0_i32 = arith.constant 0 : i32
    %c0_i32_0 = arith.constant 0 : i32
    return %arg0, %arg1, %c0_i32 : i32, i32, i32
  }
}

module attributes {stable_mosaic.version = 11 : i64} {
  func.func @_cross_attn_kernel(%arg0: i32, %arg1: i32, %arg2: memref<1x8x32xbf16, #tpu.memory_space<vmem>>, %arg3: memref<1x8x64xbf16, #tpu.memory_space<vmem>>, %arg4: memref<1x1x8xf32, #tpu.memory_space<vmem>>, %arg5: memref<1x8x32xbf16, #tpu.memory_space<vmem>>) attributes {dimension_semantics = [#tpu.dimension_semantics<parallel>, #tpu.dimension_semantics<parallel>], iteration_bounds = array<i64: 2, 1>, scalar_prefetch = 0 : i64, scratch_operands = 0 : i64, tpu.core_type = #tpu.core_type<tc>, window_params = [{transform_indices = @transform_0, window_bounds = array<i64: 1, 8, 32>}, {transform_indices = @transform_1, window_bounds = array<i64: 1, 8, 64>}, {transform_indices = @transform_2, window_bounds = array<i64: 1, 1, 8>}, {transform_indices = @transform_3, window_bounds = array<i64: 1, 8, 32>}]} {
    %c0 = arith.constant 0 : index
    %c0_0 = arith.constant 0 : index
    %c0_1 = arith.constant 0 : index
    %0 = vector.load %arg3[%c0, %c0_0, %c0_1] : memref<1x8x64xbf16, #tpu.memory_space<vmem>>, vector<1x8x64xbf16>
    %1 = vector.shape_cast %0 : vector<1x8x64xbf16> to vector<8x64xbf16>
    %c0_2 = arith.constant 0 : index
    %c0_3 = arith.constant 0 : index
    %c0_4 = arith.constant 0 : index
    %2 = vector.load %arg4[%c0_2, %c0_3, %c0_4] : memref<1x1x8xf32, #tpu.memory_space<vmem>>, vector<1x1x8xf32>
    %3 = vector.shape_cast %2 : vector<1x1x8xf32> to vector<1x8xf32>
    %cst = arith.constant 0.000000e+00 : f32
    %4 = vector.broadcast %cst : f32 to vector<1x8xf32>
    %5 = arith.cmpf ogt, %3, %4 : vector<1x8xf32>
    %cst_5 = arith.constant 0.000000e+00 : f32
    %cst_6 = arith.constant -1.000000e+09 : f32
    %6 = vector.broadcast %cst_5 : f32 to vector<1x8xf32>
    %7 = vector.broadcast %cst_6 : f32 to vector<1x8xf32>
    %8 = arith.select %5, %6, %7 : vector<1x8xi1>, vector<1x8xf32>
    %c0_7 = arith.constant 0 : index
    %c0_8 = arith.constant 0 : index
    %c0_9 = arith.constant 0 : index
    %9 = vector.load %arg2[%c0_7, %c0_8, %c0_9] : memref<1x8x32xbf16, #tpu.memory_space<vmem>>, vector<1x8x32xbf16>
    %10 = vector.shape_cast %9 : vector<1x8x32xbf16> to vector<8x32xbf16>
    %11 = vector.extract_strided_slice %1 {offsets = [0, 0], sizes = [8, 32], strides = [1, 1]} : vector<8x64xbf16> to vector<8x32xbf16>
    %12 = vector.extract_strided_slice %1 {offsets = [0, 32], sizes = [8, 32], strides = [1, 1]} : vector<8x64xbf16> to vector<8x32xbf16>
    %cst_10 = arith.constant 3.535160e-01 : bf16
    %13 = vector.broadcast %cst_10 : bf16 to vector<8x32xbf16>
    %14 = arith.mulf %10, %13 : vector<8x32xbf16>
    %15 = vector.extract_strided_slice %14 {offsets = [0, 0], sizes = [8, 8], strides = [1, 1]} : vector<8x32xbf16> to vector<8x8xbf16>
    %16 = vector.extract_strided_slice %11 {offsets = [0, 0], sizes = [8, 8], strides = [1, 1]} : vector<8x32xbf16> to vector<8x8xbf16>
    %cst_11 = arith.constant dense<0.000000e+00> : vector<8x8xf32>
    %17 = tpu.matmul %15, %16, %cst_11 {dimension_numbers = #tpu.dot_dimension_numbers<[1], [1], [0], [0], [0, 0, 1, 0], [], []>} : vector<8x8xbf16>, vector<8x8xbf16>, vector<8x8xf32> -> vector<8x8xf32>
    %18 = vector.broadcast %8 : vector<1x8xf32> to vector<8x8xf32>
    %19 = arith.addf %17, %18 : vector<8x8xf32>
    %cst_12 = arith.constant dense<0xFF800000> : vector<8xf32>
    %20 = vector.multi_reduction <maximumf>, %19, %cst_12 [1] : vector<8x8xf32> to vector<8xf32>
    %21 = vector.shape_cast %20 : vector<8xf32> to vector<8x1xf32>
    %22 = vector.broadcast %21 : vector<8x1xf32> to vector<8x8xf32>
    %23 = arith.subf %19, %22 : vector<8x8xf32>
    %24 = math.exp %23 : vector<8x8xf32>
    %cst_13 = arith.constant dense<0.000000e+00> : vector<8xf32>
    %25 = vector.multi_reduction <add>, %24, %cst_13 [1] : vector<8x8xf32> to vector<8xf32>
    %26 = vector.shape_cast %25 : vector<8xf32> to vector<8x1xf32>
    %27 = tpu.reciprocal %26 {approx = true} : vector<8x1xf32> -> vector<8x1xf32>
    %28 = vector.broadcast %27 : vector<8x1xf32> to vector<8x8xf32>
    %29 = arith.mulf %24, %28 : vector<8x8xf32>
    %30 = arith.truncf %29 : vector<8x8xf32> to vector<8x8xbf16>
    %31 = vector.extract_strided_slice %12 {offsets = [0, 0], sizes = [8, 8], strides = [1, 1]} : vector<8x32xbf16> to vector<8x8xbf16>
    %cst_14 = arith.constant dense<0.000000e+00> : vector<8x8xf32>
    %32 = tpu.matmul %30, %31, %cst_14 {dimension_numbers = #tpu.dot_dimension_numbers<[1], [0], [0], [1], [0, 0, 1, 1], [], []>} : vector<8x8xbf16>, vector<8x8xbf16>, vector<8x8xf32> -> vector<8x8xf32>
    %33 = vector.extract_strided_slice %14 {offsets = [0, 8], sizes = [8, 8], strides = [1, 1]} : vector<8x32xbf16> to vector<8x8xbf16>
    %34 = vector.extract_strided_slice %11 {offsets = [0, 8], sizes = [8, 8], strides = [1, 1]} : vector<8x32xbf16> to vector<8x8xbf16>
    %cst_15 = arith.constant dense<0.000000e+00> : vector<8x8xf32>
    %35 = tpu.matmul %33, %34, %cst_15 {dimension_numbers = #tpu.dot_dimension_numbers<[1], [1], [0], [0], [0, 0, 1, 0], [], []>} : vector<8x8xbf16>, vector<8x8xbf16>, vector<8x8xf32> -> vector<8x8xf32>
    %36 = vector.broadcast %8 : vector<1x8xf32> to vector<8x8xf32>
    %37 = arith.addf %35, %36 : vector<8x8xf32>
    %cst_16 = arith.constant dense<0xFF800000> : vector<8xf32>
    %38 = vector.multi_reduction <maximumf>, %37, %cst_16 [1] : vector<8x8xf32> to vector<8xf32>
    %39 = vector.shape_cast %38 : vector<8xf32> to vector<8x1xf32>
    %40 = vector.broadcast %39 : vector<8x1xf32> to vector<8x8xf32>
    %41 = arith.subf %37, %40 : vector<8x8xf32>
    %42 = math.exp %41 : vector<8x8xf32>
    %cst_17 = arith.constant dense<0.000000e+00> : vector<8xf32>
    %43 = vector.multi_reduction <add>, %42, %cst_17 [1] : vector<8x8xf32> to vector<8xf32>
    %44 = vector.shape_cast %43 : vector<8xf32> to vector<8x1xf32>
    %45 = tpu.reciprocal %44 {approx = true} : vector<8x1xf32> -> vector<8x1xf32>
    %46 = vector.broadcast %45 : vector<8x1xf32> to vector<8x8xf32>
    %47 = arith.mulf %42, %46 : vector<8x8xf32>
    %48 = arith.truncf %47 : vector<8x8xf32> to vector<8x8xbf16>
    %49 = vector.extract_strided_slice %12 {offsets = [0, 8], sizes = [8, 8], strides = [1, 1]} : vector<8x32xbf16> to vector<8x8xbf16>
    %cst_18 = arith.constant dense<0.000000e+00> : vector<8x8xf32>
    %50 = tpu.matmul %48, %49, %cst_18 {dimension_numbers = #tpu.dot_dimension_numbers<[1], [0], [0], [1], [0, 0, 1, 1], [], []>} : vector<8x8xbf16>, vector<8x8xbf16>, vector<8x8xf32> -> vector<8x8xf32>
    %51 = vector.extract_strided_slice %14 {offsets = [0, 16], sizes = [8, 8], strides = [1, 1]} : vector<8x32xbf16> to vector<8x8xbf16>
    %52 = vector.extract_strided_slice %11 {offsets = [0, 16], sizes = [8, 8], strides = [1, 1]} : vector<8x32xbf16> to vector<8x8xbf16>
    %cst_19 = arith.constant dense<0.000000e+00> : vector<8x8xf32>
    %53 = tpu.matmul %51, %52, %cst_19 {dimension_numbers = #tpu.dot_dimension_numbers<[1], [1], [0], [0], [0, 0, 1, 0], [], []>} : vector<8x8xbf16>, vector<8x8xbf16>, vector<8x8xf32> -> vector<8x8xf32>
    %54 = vector.broadcast %8 : vector<1x8xf32> to vector<8x8xf32>
    %55 = arith.addf %53, %54 : vector<8x8xf32>
    %cst_20 = arith.constant dense<0xFF800000> : vector<8xf32>
    %56 = vector.multi_reduction <maximumf>, %55, %cst_20 [1] : vector<8x8xf32> to vector<8xf32>
    %57 = vector.shape_cast %56 : vector<8xf32> to vector<8x1xf32>
    %58 = vector.broadcast %57 : vector<8x1xf32> to vector<8x8xf32>
    %59 = arith.subf %55, %58 : vector<8x8xf32>
    %60 = math.exp %59 : vector<8x8xf32>
    %cst_21 = arith.constant dense<0.000000e+00> : vector<8xf32>
    %61 = vector.multi_reduction <add>, %60, %cst_21 [1] : vector<8x8xf32> to vector<8xf32>
    %62 = vector.shape_cast %61 : vector<8xf32> to vector<8x1xf32>
    %63 = tpu.reciprocal %62 {approx = true} : vector<8x1xf32> -> vector<8x1xf32>
    %64 = vector.broadcast %63 : vector<8x1xf32> to vector<8x8xf32>
    %65 = arith.mulf %60, %64 : vector<8x8xf32>
    %66 = arith.truncf %65 : vector<8x8xf32> to vector<8x8xbf16>
    %67 = vector.extract_strided_slice %12 {offsets = [0, 16], sizes = [8, 8], strides = [1, 1]} : vector<8x32xbf16> to vector<8x8xbf16>
    %cst_22 = arith.constant dense<0.000000e+00> : vector<8x8xf32>
    %68 = tpu.matmul %66, %67, %cst_22 {dimension_numbers = #tpu.dot_dimension_numbers<[1], [0], [0], [1], [0, 0, 1, 1], [], []>} : vector<8x8xbf16>, vector<8x8xbf16>, vector<8x8xf32> -> vector<8x8xf32>
    %69 = vector.extract_strided_slice %14 {offsets = [0, 24], sizes = [8, 8], strides = [1, 1]} : vector<8x32xbf16> to vector<8x8xbf16>
    %70 = vector.extract_strided_slice %11 {offsets = [0, 24], sizes = [8, 8], strides = [1, 1]} : vector<8x32xbf16> to vector<8x8xbf16>
    %cst_23 = arith.constant dense<0.000000e+00> : vector<8x8xf32>
    %71 = tpu.matmul %69, %70, %cst_23 {dimension_numbers = #tpu.dot_dimension_numbers<[1], [1], [0], [0], [0, 0, 1, 0], [], []>} : vector<8x8xbf16>, vector<8x8xbf16>, vector<8x8xf32> -> vector<8x8xf32>
    %72 = vector.broadcast %8 : vector<1x8xf32> to vector<8x8xf32>
    %73 = arith.addf %71, %72 : vector<8x8xf32>
    %cst_24 = arith.constant dense<0xFF800000> : vector<8xf32>
    %74 = vector.multi_reduction <maximumf>, %73, %cst_24 [1] : vector<8x8xf32> to vector<8xf32>
    %75 = vector.shape_cast %74 : vector<8xf32> to vector<8x1xf32>
    %76 = vector.broadcast %75 : vector<8x1xf32> to vector<8x8xf32>
    %77 = arith.subf %73, %76 : vector<8x8xf32>
    %78 = math.exp %77 : vector<8x8xf32>
    %cst_25 = arith.constant dense<0.000000e+00> : vector<8xf32>
    %79 = vector.multi_reduction <add>, %78, %cst_25 [1] : vector<8x8xf32> to vector<8xf32>
    %80 = vector.shape_cast %79 : vector<8xf32> to vector<8x1xf32>
    %81 = tpu.reciprocal %80 {approx = true} : vector<8x1xf32> -> vector<8x1xf32>
    %82 = vector.broadcast %81 : vector<8x1xf32> to vector<8x8xf32>
    %83 = arith.mulf %78, %82 : vector<8x8xf32>
    %84 = arith.truncf %83 : vector<8x8xf32> to vector<8x8xbf16>
    %85 = vector.extract_strided_slice %12 {offsets = [0, 24], sizes = [8, 8], strides = [1, 1]} : vector<8x32xbf16> to vector<8x8xbf16>
    %cst_26 = arith.constant dense<0.000000e+00> : vector<8x8xf32>
    %86 = tpu.matmul %84, %85, %cst_26 {dimension_numbers = #tpu.dot_dimension_numbers<[1], [0], [0], [1], [0, 0, 1, 1], [], []>} : vector<8x8xbf16>, vector<8x8xbf16>, vector<8x8xf32> -> vector<8x8xf32>
    %87 = tpu.concatenate %32, %50, %68, %86 in 1 : vector<8x8xf32>, vector<8x8xf32>, vector<8x8xf32>, vector<8x8xf32> -> vector<8x32xf32>
    %88 = arith.truncf %87 : vector<8x32xf32> to vector<8x32xbf16>
    %c0_27 = arith.constant 0 : index
    %c0_28 = arith.constant 0 : index
    %c0_29 = arith.constant 0 : index
    %89 = vector.load %arg5[%c0_27, %c0_28, %c0_29] : memref<1x8x32xbf16, #tpu.memory_space<vmem>>, vector<1x8x32xbf16>
    %90 = vector.shape_cast %89 : vector<1x8x32xbf16> to vector<8x32xbf16>
    %91 = vector.shape_cast %88 : vector<8x32xbf16> to vector<1x8x32xbf16>
    tpu.vector_store %arg5[%c0_27, %c0_28, %c0_29], %91 {strides = array<i32>} : memref<1x8x32xbf16, #tpu.memory_space<vmem>>, vector<1x8x32xbf16>,
    return
  }
  func.func @transform_0(%arg0: i32, %arg1: i32) -> (i32, i32, i32) {
    %c0_i32 = arith.constant 0 : i32
    %c0_i32_0 = arith.constant 0 : i32
    return %arg0, %arg1, %c0_i32 : i32, i32, i32
  }
  func.func @transform_1(%arg0: i32, %arg1: i32) -> (i32, i32, i32) {
    %c0_i32 = arith.constant 0 : i32
    %c0_i32_0 = arith.constant 0 : i32
    %c0_i32_1 = arith.constant 0 : i32
    return %arg0, %c0_i32, %c0_i32_0 : i32, i32, i32
  }
  func.func @transform_2(%arg0: i32, %arg1: i32) -> (i32, i32, i32) {
    %c0_i32 = arith.constant 0 : i32
    %c0_i32_0 = arith.constant 0 : i32
    %c0_i32_1 = arith.constant 0 : i32
    return %arg0, %c0_i32, %c0_i32_0 : i32, i32, i32
  }
  func.func @transform_3(%arg0: i32, %arg1: i32) -> (i32, i32, i32) {
    %c0_i32 = arith.constant 0 : i32
    %c0_i32_0 = arith.constant 0 : i32
    return %arg0, %arg1, %c0_i32 : i32, i32, i32
  }
}

module attributes {stable_mosaic.version = 11 : i64} {
  func.func @_matmul_kernel(%arg0: i32, %arg1: i32, %arg2: i32, %arg3: memref<16x32xbf16, #tpu.memory_space<vmem>>, %arg4: memref<32x128xbf16, #tpu.memory_space<vmem>>, %arg5: memref<1x128xf32, #tpu.memory_space<vmem>>, %arg6: memref<16x128xf32, #tpu.memory_space<vmem>>, %arg7: memref<16x128xf32, #tpu.memory_space<vmem>>) attributes {dimension_semantics = [#tpu.dimension_semantics<parallel>, #tpu.dimension_semantics<parallel>, #tpu.dimension_semantics<arbitrary>], iteration_bounds = array<i64: 1, 1, 1>, scalar_prefetch = 0 : i64, scratch_operands = 1 : i64, tpu.core_type = #tpu.core_type<tc>, window_params = [{transform_indices = @transform_0, window_bounds = array<i64: 16, 32>}, {transform_indices = @transform_1, window_bounds = array<i64: 32, 128>}, {transform_indices = @transform_2, window_bounds = array<i64: 1, 128>}, {transform_indices = @transform_3, window_bounds = array<i64: 16, 128>}]} {
    %c0_i32 = arith.constant 0 : i32
    %0 = arith.cmpi eq, %arg2, %c0_i32 : i32
    %1 = arith.extui %0 : i1 to i32
    %c0_i32_0 = arith.constant 0 : i32
    %2 = arith.cmpi ne, %1, %c0_i32_0 : i32
    scf.if %2 {
      %cst_10 = arith.constant 0.000000e+00 : f32
      %12 = vector.broadcast %cst_10 : f32 to vector<16x128xf32>
      %c0_11 = arith.constant 0 : index
      %c0_12 = arith.constant 0 : index
      %13 = vector.load %arg7[%c0_11, %c0_12] : memref<16x128xf32, #tpu.memory_space<vmem>>, vector<16x128xf32>
      tpu.vector_store %arg7[%c0_11, %c0_12], %12 {strides = array<i32>} : memref<16x128xf32, #tpu.memory_space<vmem>>, vector<16x128xf32>,
    } else {
    }
    %c0 = arith.constant 0 : index
    %c0_1 = arith.constant 0 : index
    %3 = vector.load %arg7[%c0, %c0_1] : memref<16x128xf32, #tpu.memory_space<vmem>>, vector<16x128xf32>
    %c0_2 = arith.constant 0 : index
    %c0_3 = arith.constant 0 : index
    %4 = vector.load %arg3[%c0_2, %c0_3] : memref<16x32xbf16, #tpu.memory_space<vmem>>, vector<16x32xbf16>
    %c0_4 = arith.constant 0 : index
    %c0_5 = arith.constant 0 : index
    %5 = vector.load %arg4[%c0_4, %c0_5] : memref<32x128xbf16, #tpu.memory_space<vmem>>, vector<32x128xbf16>
    %cst = arith.constant dense<0.000000e+00> : vector<16x128xf32>
    %6 = tpu.matmul %4, %5, %cst {dimension_numbers = #tpu.dot_dimension_numbers<[1], [0], [0], [1], [0, 0, 1, 1], [], []>} : vector<16x32xbf16>, vector<32x128xbf16>, vector<16x128xf32> -> vector<16x128xf32>
    %7 = arith.addf %3, %6 : vector<16x128xf32>
    %c0_6 = arith.constant 0 : index
    %c0_7 = arith.constant 0 : index
    %8 = vector.load %arg7[%c0_6, %c0_7] : memref<16x128xf32, #tpu.memory_space<vmem>>, vector<16x128xf32>
    tpu.vector_store %arg7[%c0_6, %c0_7], %7 {strides = array<i32>} : memref<16x128xf32, #tpu.memory_space<vmem>>, vector<16x128xf32>,
    %c0_i32_8 = arith.constant 0 : i32
    %9 = arith.cmpi eq, %arg2, %c0_i32_8 : i32
    %10 = arith.extui %9 : i1 to i32
    %c0_i32_9 = arith.constant 0 : i32
    %11 = arith.cmpi ne, %10, %c0_i32_9 : i32
    scf.if %11 {
      %c0_10 = arith.constant 0 : index
      %c0_11 = arith.constant 0 : index
      %12 = vector.load %arg7[%c0_10, %c0_11] : memref<16x128xf32, #tpu.memory_space<vmem>>, vector<16x128xf32>
      %c0_12 = arith.constant 0 : index
      %c0_13 = arith.constant 0 : index
      %13 = vector.load %arg5[%c0_12, %c0_13] : memref<1x128xf32, #tpu.memory_space<vmem>>, vector<1x128xf32>
      %14 = vector.broadcast %13 : vector<1x128xf32> to vector<16x128xf32>
      %15 = arith.addf %12, %14 : vector<16x128xf32>
      %c0_14 = arith.constant 0 : index
      %c0_15 = arith.constant 0 : index
      %16 = vector.load %arg6[%c0_14, %c0_15] : memref<16x128xf32, #tpu.memory_space<vmem>>, vector<16x128xf32>
      tpu.vector_store %arg6[%c0_14, %c0_15], %15 {strides = array<i32>} : memref<16x128xf32, #tpu.memory_space<vmem>>, vector<16x128xf32>,
    } else {
    }
    return
  }
  func.func @transform_0(%arg0: i32, %arg1: i32, %arg2: i32) -> (i32, i32) {
    %c0_i32 = arith.constant 0 : i32
    return %arg0, %arg2 : i32, i32
  }
  func.func @transform_1(%arg0: i32, %arg1: i32, %arg2: i32) -> (i32, i32) {
    %c0_i32 = arith.constant 0 : i32
    return %arg2, %arg1 : i32, i32
  }
  func.func @transform_2(%arg0: i32, %arg1: i32, %arg2: i32) -> (i32, i32) {
    %c0_i32 = arith.constant 0 : i32
    %c0_i32_0 = arith.constant 0 : i32
    return %c0_i32, %arg1 : i32, i32
  }
  func.func @transform_3(%arg0: i32, %arg1: i32, %arg2: i32) -> (i32, i32) {
    %c0_i32 = arith.constant 0 : i32
    return %arg0, %arg1 : i32, i32
  }
}

</mosaic_0001>

<bundles_post_ra>
// kernel: transformer_forward.31
= control target key start
LH: loop header
LB: loop body
LE: loop exit
PB: predicated region body
PF: predicated region fallthrough
CT: control target
= control target key end

     0   :  { %vm22_vm0 = vcmask 261120   ;;  %v163_v0 = vmov 0.0   ;;  %vm164_vm1 = vmmov 0   ;;  %vm127_vm2 = vcmask 257024   ;;  %s216_s1 = inlined_call_operand.vmem [shape: bf16[32,32], index: 1, kind: input, shape index: {}]   ;;  %s217_s0 = inlined_call_operand.vmem [shape: bf16[16,32], index: 0, kind: input, shape index: {}]   ;;  %s218_s3 = inlined_call_operand.vmem [shape: bf16[16,32], index: 3, kind: input, shape index: {}]   ;;  %s219_s2 = inlined_call_operand.vmem [shape: f32[1,32], index: 2, kind: input, shape index: {}]   ;;  %s220_s4 = inlined_call_operand.vmem [shape: bf16[16,32], index: 4, kind: output, shape index: {}]  }
   0x1   :  { %150 = vmatprep.subr.bf16.mxu0 %v163_v0  ;;  %v160_v1 = vld [vmem:[%s216_s1] sm:$0xff]   ;;  %154 = vmatprep.mubr.msk.bf16.mxu0 %vm164_vm1, %v163_v0  ;;  %23 = vst.msk [vmem:[#allocation2] sm:$0xff] %vm22_vm0, %v163_v0  ;;  %24 = vst.msk [vmem:[#allocation2 + $0x8] sm:$0xff] %vm22_vm0, %v163_v0  ;;  %v161_v2 = vld [vmem:[%s216_s1 + $0x8] sm:$0xff]  }
   0x2   :  { %151 = vmatpush3.bf16.msra.mxu0 %v160_v1  ;;  %v162_v3 = vld [vmem:[%s217_s0] sm:$0xff]  }
   0x3   :  { %152 = vmatprep.subr.bf16.mxu0 %v163_v0  ;;  %v144_v12 = vld [vmem:[%s218_s3] sm:$0xff]  }
   0x4   :  { %v138_v13 = vld [vmem:[%s219_s2] ss:$0 sm:$0xff]  ;;  %v145_v14 = vunpack.c.l.bf16 %v144_v12  ;;  %v146_v17 = vunpack.c.h.bf16 %v144_v12 }
   0x6   :  { %153 = vmatpush3.bf16.msra.mxu0 %v161_v2 }
   0x8   :  { %v25_v4 = vld [vmem:[#allocation2] sm:$0xff]  ;;  %v26_v6 = vld [vmem:[#allocation2 + $0x8] sm:$0xff] }
   0x9   :  { %155 = vmatmul.mubr.msk.bf16.vlgmr.msra.gmra.mrb[0].mxu0 %vm22_vm0, %v162_v3 }
  0xdc   :  { %v88_v5 = vpop.f32.mrb[0].mxu0 }
  0xdd   :  { %v95_v7 = vadd.f32 %v88_v5, %v25_v4  ;;  %v156_v8 = vpop.f32.mrb[1].mxu0 }
  0xde   :  { %v91_v9 = vpop.f32.mrb[2].mxu0 }
  0xdf   :  { %97 = vst.msk [vmem:[#allocation2] sm:$0xff] %vm22_vm0, %v95_v7  ;;  %v96_v10 = vadd.f32 %v91_v9, %v26_v6  ;;  %v157_v11 = vpop.f32.mrb[3].mxu0 }
  0xe1   :  { %98 = vst.msk [vmem:[#allocation2 + $0x8] sm:$0xff] %vm22_vm0, %v96_v10 }
  0xe6   :  { %v102_v15 = vld [vmem:[#allocation2] sm:$0xff] }
  0xe7   :  { %v111_v16 = vadd.f32 %v138_v13, %v102_v15 }
  0xe8   :  { %v103_v18 = vld [vmem:[#allocation2 + $0x8] sm:$0xff] }
  0xe9   :  { %v117_v19 = vadd.f32 %v145_v14, %v111_v16  ;;  %v112_v20 = vadd.f32 %v138_v13, %v103_v18 }
  0xeb   :  { %v141_v21 = vpack.c.bf16 %v117_v19, %v117_v19  ;;  %v118_v22 = vadd.f32 %v146_v17, %v112_v20 }
  0xed   :  { %128 = vst.msk [vmem:[%s220_s4] sm:$0xf] %vm127_vm2, %v141_v21  ;;  %v142_v23 = vpack.c.bf16 %v118_v22, %v118_v22 }
  0xef   :  { %129 = vst.msk [vmem:[%s220_s4 + $0x4] sm:$0xf] %vm127_vm2, %v142_v23 }

// kernel: transformer_forward.32
= control target key start
LH: loop header
LB: loop body
LE: loop exit
PB: predicated region body
PF: predicated region fallthrough
CT: control target
= control target key end

     0   :  { %vm29_vm0 = vcmask 261120   ;;  %v215_v16 = vmov 0.0   ;;  %vm216_vm1 = vmmov 0   ;;  %vm171_vm6 = vcmask 519168   ;;  %s277_s0 = inlined_call_operand.vmem [shape: bf16[16,32], index: 0, kind: input, shape index: {}]   ;;  %s278_s3 = inlined_call_operand.vmem [shape: bf16[32,64], index: 3, kind: input, shape index: {}]   ;;  %s279_s1 = inlined_call_operand.vmem [shape: f32[1,32], index: 1, kind: input, shape index: {}]   ;;  %s280_s2 = inlined_call_operand.vmem [shape: f32[1,32], index: 2, kind: input, shape index: {}]   ;;  %s281_s4 = inlined_call_operand.vmem [shape: f32[1,64], index: 4, kind: input, shape index: {}]   ;;  %s282_s5 = inlined_call_operand.vmem [shape: bf16[16,64], index: 5, kind: output, shape index: {}]  }
   0x1   :  { %v189_v0 = vld [vmem:[%s277_s0] sm:$0xff]   ;;  %195 = vmatprep.subr.bf16.mxu0 %v215_v16  ;;  %v206_v17 = vld [vmem:[%s278_s3 + $0x8] sm:$0xff]   ;;  %199 = vmatprep.mubr.msk.bf16.mxu0 %vm216_vm1, %v215_v16 }
   0x2   :  { %v190_v1 = vunpack.c.l.bf16 %v189_v0  ;;  %v191_v2 = vunpack.c.h.bf16 %v189_v0  ;;  %v205_v15 = vld [vmem:[%s278_s3] sm:$0xff]  }
   0x3   :  { %196 = vmatpush3.bf16.msra.mxu0 %v205_v15  ;;  %v178_v34 = vld [vmem:[%s279_s1] ss:$0 sm:$0xff] }
   0x4   :  { %v30_v3 = vsel %vm29_vm0, %v190_v1, 0.0  ;;  %v33_v4 = vsel %vm29_vm0, %v191_v2, 0.0  ;;  %197 = vmatprep.subr.bf16.mxu0 %v215_v16  ;;  %v179_v40 = vld [vmem:[%s280_s2] ss:$0 sm:$0xff] }
   0x5   :  { %31 = vadd.xlane.f32.xlu0 %v30_v3  ;;  %v180_v46 = vld [vmem:[%s281_s4] ss:$0 sm:$0xff] }
   0x7   :  { %198 = vmatpush3.bf16.msra.mxu0 %v206_v17 }
   0x9   :  { %34 = vadd.xlane.f32.xlu0 %v33_v4 }
  0x92   :  { %v32_v5 = vpop.xlane.xlu0 %31 }
  0x93   :  { %v37_v6 = vmul.f32 0.03125, %v32_v5 }
  0x95   :  { %v39_v7 = vsub.f32 %v190_v1, %v37_v6 }
  0x96   :  { %v35_v8 = vpop.xlane.xlu0 %34 }
  0x97   :  { %v38_v9 = vmul.f32 0.03125, %v35_v8  ;;  %v41_v10 = vmul.f32 %v39_v7, %v39_v7  ;;  %v59_v36 = vmul.f32 %v178_v34, %v39_v7 }
  0x99   :  { %v40_v11 = vsub.f32 %v191_v2, %v38_v9  ;;  %v43_v12 = vsel %vm29_vm0, %v41_v10, 0.0 }
  0x9a   :  { %44 = vadd.xlane.f32.xlu1 %v43_v12 }
  0x9b   :  { %v42_v13 = vmul.f32 %v40_v11, %v40_v11  ;;  %v60_v37 = vmul.f32 %v178_v34, %v40_v11 }
  0x9d   :  { %v46_v14 = vsel %vm29_vm0, %v42_v13, 0.0 }
  0x9e   :  { %47 = vadd.xlane.f32.xlu1 %v46_v14 }
 0x127   :  { %v45_v18 = vpop.xlane.xlu1 %44 }
 0x128   :  { %v50_v19 = vmul.f32 0.032258064, %v45_v18 }
 0x12a   :  { %207 = vrsqrt.f32 %v50_v19  ;;  %vm63_vm2 = vcmp.eq.f32.partialorder %v50_v19, inf  ;;  %v66_v24 = vand.u32 2147483648, %v50_v19  ;;  %vm65_vm3 = vcmp.eq.f32.partialorder %v50_v19, 0.0 }
 0x12b   :  { %v48_v20 = vpop.xlane.xlu1 %47 }
 0x12c   :  { %v51_v21 = vmul.f32 0.032258064, %v48_v20 }
 0x12e   :  { %209 = vrsqrt.f32 %v51_v21  ;;  %vm70_vm4 = vcmp.eq.f32.partialorder %v51_v21, inf  ;;  %v73_v30 = vand.u32 2147483648, %v51_v21  ;;  %vm72_vm5 = vcmp.eq.f32.partialorder %v51_v21, 0.0 }
 0x134   :  { %v208_v22 = vpop.eup %207 }
 0x135   :  { %v62_v23 = vmul.f32 %v208_v22, %v50_v19 }
 0x137   :  { %v64_v25 = vsel %vm63_vm2, %v50_v19, %v62_v23 }
 0x138   :  { %v210_v26 = vpop.eup %209  ;;  %v67_v27 = vsel %vm65_vm3, %v66_v24, %v64_v25 }
 0x139   :  { %v75_v28 = vadd.f32 1e-06, %v67_v27  ;;  %v69_v29 = vmul.f32 %v210_v26, %v51_v21 }
 0x13b   :  { %211 = vrcp.f32 %v75_v28  ;;  %v71_v31 = vsel %vm70_vm4, %v51_v21, %v69_v29 }
 0x13c   :  { %v74_v32 = vsel %vm72_vm5, %v73_v30, %v71_v31 }
 0x13d   :  { %v76_v33 = vadd.f32 1e-06, %v74_v32 }
 0x13f   :  { %213 = vrcp.f32 %v76_v33 }
 0x145   :  { %v212_v35 = vpop.eup %211 }
 0x146   :  { %v78_v38 = vmul.f32 %v212_v35, %v59_v36 }
 0x148   :  { %v88_v42 = vadd.f32 %v179_v40, %v78_v38 }
 0x149   :  { %v214_v39 = vpop.eup %213 }
 0x14a   :  { %v80_v41 = vmul.f32 %v214_v39, %v60_v37 }
 0x14c   :  { %v89_v43 = vadd.f32 %v179_v40, %v80_v41 }
 0x14e   :  { %v90_v44 = vpack.c.bf16 %v89_v43, %v88_v42 }
 0x150   :  { %91 = vst.msk [vmem:[#allocation2] sm:$0xff] %vm29_vm0, %v90_v44 }
 0x157   :  { %v92_v45 = vld [vmem:[#allocation2] sm:$0xff] }
 0x158   :  { %200 = vmatmul.mubr.msk.bf16.vlgmr.msra.gmra.mrb[0].mxu0 %vm29_vm0, %v92_v45 }
 0x22b   :  { %v154_v47 = vpop.f32.mrb[0].mxu0 }
 0x22c   :  { %v155_v48 = vadd.f32 %v180_v46, %v154_v47  ;;  %v201_v49 = vpop.f32.mrb[1].mxu0 }
 0x22d   :  { %v157_v50 = vpop.f32.mrb[2].mxu0 }
 0x22e   :  { %v161_v51 = vmax.f32 %v155_v48, 0.0  ;;  %v158_v52 = vadd.f32 %v180_v46, %v157_v50  ;;  %v202_v53 = vpop.f32.mrb[3].mxu0 }
 0x230   :  { %v186_v54 = vpack.c.bf16 %v161_v51, %v161_v51  ;;  %v162_v55 = vmax.f32 %v158_v52, 0.0 }
 0x232   :  { %172 = vst.msk [vmem:[%s282_s5] sm:$0xf] %vm171_vm6, %v186_v54  ;;  %v187_v56 = vpack.c.bf16 %v162_v55, %v162_v55 }
 0x234   :  { %173 = vst.msk [vmem:[%s282_s5 + $0x4] sm:$0xf] %vm171_vm6, %v187_v56 }

// kernel: transformer_forward.29
= control target key start
LH: loop header
LB: loop body
LE: loop exit
PB: predicated region body
PF: predicated region fallthrough
CT: control target
= control target key end

     0   :  { %vm29_vm0 = vcmask 261120   ;;  %v213_v16 = vmov 0.0   ;;  %vm214_vm1 = vmmov 0   ;;  %vm169_vm6 = vcmask 781312   ;;  %s275_s0 = inlined_call_operand.vmem [shape: bf16[16,32], index: 0, kind: input, shape index: {}]   ;;  %s276_s3 = inlined_call_operand.vmem [shape: bf16[32,96], index: 3, kind: input, shape index: {}]   ;;  %s277_s1 = inlined_call_operand.vmem [shape: f32[1,32], index: 1, kind: input, shape index: {}]   ;;  %s278_s2 = inlined_call_operand.vmem [shape: f32[1,32], index: 2, kind: input, shape index: {}]   ;;  %s279_s4 = inlined_call_operand.vmem [shape: f32[1,96], index: 4, kind: input, shape index: {}]   ;;  %s280_s5 = inlined_call_operand.vmem [shape: bf16[16,96], index: 5, kind: output, shape index: {}]  }
   0x1   :  { %v187_v0 = vld [vmem:[%s275_s0] sm:$0xff]   ;;  %193 = vmatprep.subr.bf16.mxu0 %v213_v16  ;;  %v204_v17 = vld [vmem:[%s276_s3 + $0x8] sm:$0xff]   ;;  %197 = vmatprep.mubr.msk.bf16.mxu0 %vm214_vm1, %v213_v16 }
   0x2   :  { %v188_v1 = vunpack.c.l.bf16 %v187_v0  ;;  %v189_v2 = vunpack.c.h.bf16 %v187_v0  ;;  %v203_v15 = vld [vmem:[%s276_s3] sm:$0xff]  }
   0x3   :  { %194 = vmatpush3.bf16.msra.mxu0 %v203_v15  ;;  %v176_v34 = vld [vmem:[%s277_s1] ss:$0 sm:$0xff] }
   0x4   :  { %v30_v3 = vsel %vm29_vm0, %v188_v1, 0.0  ;;  %v33_v4 = vsel %vm29_vm0, %v189_v2, 0.0  ;;  %195 = vmatprep.subr.bf16.mxu0 %v213_v16  ;;  %v177_v40 = vld [vmem:[%s278_s2] ss:$0 sm:$0xff] }
   0x5   :  { %31 = vadd.xlane.f32.xlu0 %v30_v3  ;;  %v178_v46 = vld [vmem:[%s279_s4] ss:$0 sm:$0xff] }
   0x7   :  { %196 = vmatpush3.bf16.msra.mxu0 %v204_v17 }
   0x9   :  { %34 = vadd.xlane.f32.xlu0 %v33_v4 }
  0x92   :  { %v32_v5 = vpop.xlane.xlu0 %31 }
  0x93   :  { %v37_v6 = vmul.f32 0.03125, %v32_v5 }
  0x95   :  { %v39_v7 = vsub.f32 %v188_v1, %v37_v6 }
  0x96   :  { %v35_v8 = vpop.xlane.xlu0 %34 }
  0x97   :  { %v38_v9 = vmul.f32 0.03125, %v35_v8  ;;  %v41_v10 = vmul.f32 %v39_v7, %v39_v7  ;;  %v59_v36 = vmul.f32 %v176_v34, %v39_v7 }
  0x99   :  { %v40_v11 = vsub.f32 %v189_v2, %v38_v9  ;;  %v43_v12 = vsel %vm29_vm0, %v41_v10, 0.0 }
  0x9a   :  { %44 = vadd.xlane.f32.xlu1 %v43_v12 }
  0x9b   :  { %v42_v13 = vmul.f32 %v40_v11, %v40_v11  ;;  %v60_v37 = vmul.f32 %v176_v34, %v40_v11 }
  0x9d   :  { %v46_v14 = vsel %vm29_vm0, %v42_v13, 0.0 }
  0x9e   :  { %47 = vadd.xlane.f32.xlu1 %v46_v14 }
 0x127   :  { %v45_v18 = vpop.xlane.xlu1 %44 }
 0x128   :  { %v50_v19 = vmul.f32 0.032258064, %v45_v18 }
 0x12a   :  { %205 = vrsqrt.f32 %v50_v19  ;;  %vm63_vm2 = vcmp.eq.f32.partialorder %v50_v19, inf  ;;  %v66_v24 = vand.u32 2147483648, %v50_v19  ;;  %vm65_vm3 = vcmp.eq.f32.partialorder %v50_v19, 0.0 }
 0x12b   :  { %v48_v20 = vpop.xlane.xlu1 %47 }
 0x12c   :  { %v51_v21 = vmul.f32 0.032258064, %v48_v20 }
 0x12e   :  { %207 = vrsqrt.f32 %v51_v21  ;;  %vm70_vm4 = vcmp.eq.f32.partialorder %v51_v21, inf  ;;  %v73_v30 = vand.u32 2147483648, %v51_v21  ;;  %vm72_vm5 = vcmp.eq.f32.partialorder %v51_v21, 0.0 }
 0x134   :  { %v206_v22 = vpop.eup %205 }
 0x135   :  { %v62_v23 = vmul.f32 %v206_v22, %v50_v19 }
 0x137   :  { %v64_v25 = vsel %vm63_vm2, %v50_v19, %v62_v23 }
 0x138   :  { %v208_v26 = vpop.eup %207  ;;  %v67_v27 = vsel %vm65_vm3, %v66_v24, %v64_v25 }
 0x139   :  { %v75_v28 = vadd.f32 1e-06, %v67_v27  ;;  %v69_v29 = vmul.f32 %v208_v26, %v51_v21 }
 0x13b   :  { %209 = vrcp.f32 %v75_v28  ;;  %v71_v31 = vsel %vm70_vm4, %v51_v21, %v69_v29 }
 0x13c   :  { %v74_v32 = vsel %vm72_vm5, %v73_v30, %v71_v31 }
 0x13d   :  { %v76_v33 = vadd.f32 1e-06, %v74_v32 }
 0x13f   :  { %211 = vrcp.f32 %v76_v33 }
 0x145   :  { %v210_v35 = vpop.eup %209 }
 0x146   :  { %v78_v38 = vmul.f32 %v210_v35, %v59_v36 }
 0x148   :  { %v88_v42 = vadd.f32 %v177_v40, %v78_v38 }
 0x149   :  { %v212_v39 = vpop.eup %211 }
 0x14a   :  { %v80_v41 = vmul.f32 %v212_v39, %v60_v37 }
 0x14c   :  { %v89_v43 = vadd.f32 %v177_v40, %v80_v41 }
 0x14e   :  { %v90_v44 = vpack.c.bf16 %v89_v43, %v88_v42 }
 0x150   :  { %91 = vst.msk [vmem:[#allocation2] sm:$0xff] %vm29_vm0, %v90_v44 }
 0x157   :  { %v92_v45 = vld [vmem:[#allocation2] sm:$0xff] }
 0x158   :  { %198 = vmatmul.mubr.msk.bf16.vlgmr.msra.gmra.mrb[0].mxu0 %vm29_vm0, %v92_v45 }
 0x22b   :  { %v154_v47 = vpop.f32.mrb[0].mxu0 }
 0x22c   :  { %v155_v48 = vadd.f32 %v178_v46, %v154_v47  ;;  %v199_v49 = vpop.f32.mrb[1].mxu0 }
 0x22d   :  { %v157_v50 = vpop.f32.mrb[2].mxu0 }
 0x22e   :  { %v184_v51 = vpack.c.bf16 %v155_v48, %v155_v48  ;;  %v158_v52 = vadd.f32 %v178_v46, %v157_v50  ;;  %v200_v53 = vpop.f32.mrb[3].mxu0 }
 0x230   :  { %170 = vst.msk [vmem:[%s280_s5] sm:$0xf] %vm169_vm6, %v184_v51  ;;  %v185_v54 = vpack.c.bf16 %v158_v52, %v158_v52 }
 0x232   :  { %171 = vst.msk [vmem:[%s280_s5 + $0x4] sm:$0xf] %vm169_vm6, %v185_v54 }

// kernel: transformer_forward.30
= control target key start
LH: loop header
LB: loop body
LE: loop exit
PB: predicated region body
PF: predicated region fallthrough
CT: control target
= control target key end

     0   :  { %s937_s9 = smov 0   ;;  %s939_s10 = smov 0   ;;  %s1049_s0 = inlined_call_operand.vmem [shape: bf16[2,8,96], index: 0, kind: input, shape index: {}]   ;;  %s1050_s1 = inlined_call_operand.vmem [shape: f32[2,1,8], index: 1, kind: input, shape index: {}]   ;;  %s1051_s2 = inlined_call_operand.vmem [shape: bf16[2,8,32], index: 2, kind: output, shape index: {}]  }
   0x1   :  { %s941_s11 = smov 0  }
   0x2 LB: > { %s24_s12 = sadd.s32 1, %s899_s10  ;;  %p744_p0 = scmp.ge.s32.totalorder %s903_s11, 1  ;;  %s903_s11 = sphi %s941_s11, %s12_s11   ;;  %s899_s10 = sphi %s939_s10, %s1053_s10   ;;  %s895_s9 = sphi %s937_s9, %s1052_s9  }
   0x3   : > { %p26_p1 = scmp.ge.s32.totalorder %s24_s12, 2  ;;  %p133_p2 = scmp.lt.s32.totalorder %s903_s11, 3 }
   0x5   : > { %s1055_s12 = smov (%p26_p1, %s24_s12), 0  ;;  %p134_p3 = pnand %p744_p0, %p133_p2 }
   0x6   : > { %p159_p4 = scmp.lt.s32.totalorder (!%p134_p3), %s895_s9, 1  ;;  %v905_v0 = vmov (!%p134_p3), 0.0   ;;  %vm906_vm0 = vmmov (!%p134_p3), 0   ;;  %s907_s17 = smov (!%p134_p3), 96   ;;  %vm197_vm1 = vcmask (!%p134_p3), 64512   ;;  %v187_v6 = vlaneseq (!%p134_p3) }
   0x7   : > { %137 = sbr.rel (%p134_p3) target bundleno = 1601 (0x641), region = 28  ;;  %775 = vmatprep.subr.bf16.mxu0 (!%p134_p3), %v905_v0  ;;  %777 = vmatprep.mubr.msk.bf16.mxu0 (!%p134_p3), %vm906_vm0, %v905_v0  ;;  %s908_s18 = smov (!%p134_p3), 64   ;;  %v910_v10 = vmov (!%p134_p3), -1e+09   ;;  %vm261_vm3 = vcmask (!%p134_p3), 1043456   ;;  %vm651_vm4 = vcmask (!%p134_p3), 130048  }
   0x8   : > { %781 = vmatprep.subr.bf16.mxu1 (!%p134_p3), %v905_v0  ;;  %783 = vmatprep.mubr.msk.bf16.mxu1 (!%p134_p3), %vm906_vm0, %v905_v0  ;;  %s909_s19 = smov (!%p134_p3), 88   ;;  %v188_v8 = vshrl.u32 (!%p134_p3), %v187_v6, 7  ;;  %s911_s23 = smov (!%p134_p3), 72   ;;  %vm653_vm5 = vcmask (!%p134_p3), 195584   ;;  %vm656_vm6 = vcmask (!%p134_p3), 257024  }
   0x9   : > { %s912_s24 = smov (!%p134_p3), 120   ;;  %s913_s25 = smov (!%p134_p3), 80  }
   0xa   : > { %v189_v9 = vsub.s32 (!%p134_p3), 0, %v188_v8  ;;  %s914_s26 = smov (!%p134_p3), 112   ;;  %s915_s27 = smov (!%p134_p3), 104  }
   0xb   : > { %s916_s28 = smov (!%p134_p3), 56   ;;  %s917_s29 = smov (!%p134_p3), 48  }
   0xc   : > { %s918_s30 = smov (!%p134_p3), 40   ;;  %s919_s3 = smov (!%p134_p3), 8  }
   0xd   : > { %s920_s4 = smov (!%p134_p3), 16   ;;  %s921_s5 = smov (!%p134_p3), 24  }
   0xe   : > { %s1057_s9 = smov (!%p159_p4, %s895_s9), 1 }
   0xf   : > { %s745_s13 = sshll.u32 %s1057_s9, 2  ;;  %s165_s22 = scalar_lea.vmem %s1050_s1, %s1057_s9 }
  0x10   : > { %s162_s16 = scalar_lea.vmem %s1049_s0, %s745_s13  ;;  %v182_v7 = vld [vmem:[%s165_s22] sm:$0x1]  ;;  %s172_s8 = scalar_lea.vmem %s1051_s2, %s745_s13 }
  0x11   : > { %v969_v1 = vld [vmem:[%s162_s16] ss:$0 sps:$4 sm:$0xff]   ;;  %vm183_vm2 = vcmp.gt.f32.partialorder %v182_v7, 0.0 }
  0x12   : > { %195 = vrot.lane.b32.xlu0 %v969_v1, %s907_s17  ;;  %v180_v4 = vld [vmem:[%s162_s16] sm:$0xf]  ;;  %256 = vrot.lane.b32.xlu1 %v969_v1, %s908_s18  ;;  %v184_v11 = vsel %vm183_vm2, 0.0, %v910_v10 }
  0x13   : > { %v185_v5 = vmul.bf16 1052065461, %v180_v4  ;;  %v983_v12 = vrot.slane %v184_v11, %v189_v9 }
  0x15   : > { %v750_v26 = vcombine.low %v185_v5, %v185_v5 }
  0x16   : > { %310 = vrot.lane.b32.xlu1 %v969_v1, %s909_s19 }
  0x84   : > { %v196_v2 = vpop.permute.xlu0 %195  ;;  %v257_v19 = vpop.permute.xlu1 %256 }
  0x85   : > { %v202_v3 = vsel %vm197_vm1, %v196_v2, 0  ;;  %v263_v20 = vsel %vm261_vm3, %v257_v19, 0 }
  0x86   : > { %776 = vmatpush3.bf16.xpose.msra.mxu0 %v202_v3  ;;  %782 = vmatpush3.bf16.msra.mxu1 %v263_v20 }
  0x87   : > { %793 = vmatprep.subr.bf16.mxu0 %v905_v0  ;;  %787 = vmatprep.subr.bf16.mxu1 %v905_v0 }
  0x88   : > { %v311_v27 = vpop.permute.xlu1 %310 }
  0x89   : > { %v316_v33 = vsel %vm197_vm1, %v311_v27, 0 }
  0x8d   : > { %778 = vmatmul.mubr.msk.bf16.vlgmr.msra.gmra.mrb[0].mxu0 %vm197_vm1, %v185_v5 }
  0x8e   : > { %795 = vmatprep.mubr.msk.bf16.mxu0 %vm906_vm0, %v905_v0 }
 0x160   : > { %v238_v13 = vpop.f32.mrb[0].mxu0 }
 0x161   : > { %v239_v14 = vadd.f32 %v238_v13, %v983_v12  ;;  %v779_v15 = vpop.f32.mrb[1].mxu0 }
 0x162   : > { %v241_v16 = vpop.f32.mrb[2].mxu0 }
 0x163   : > { %v780_v17 = vpop.f32.mrb[3].mxu0  ;;  %v244_v18 = vsel %vm197_vm1, %v239_v14, -inf }
 0x164   : > { %245 = vmax.xlane.f32.xlu0 %v244_v18 }
 0x17a   : > { %530 = vrot.lane.b32.xlu0 %v969_v1, %s911_s23 }
 0x1f1   : > { %v246_v21 = vpop.xlane.xlu0 %245 }
 0x1f2   : > { %v247_v22 = vsub.f32 %v239_v14, %v246_v21 }
 0x1f4   : > { %v248_v23 = vmul.f32 1.442695, %v247_v22 }
 0x1f5   : > { %v531_v36 = vpop.permute.xlu0 %530 }
 0x1f6   : > { %865 = vpow2.f32 %v248_v23  ;;  %v536_v38 = vsel %vm197_vm1, %v531_v36, 0 }
 0x200   : > { %v866_v24 = vpop.eup %865 }
 0x201   : > { %v250_v25 = vsel %vm197_vm1, %v866_v24, 0.0 }
 0x202   : > { %251 = vadd.xlane.f32.xlu1 %v250_v25 }
 0x213   : > { %308 = vrot.lane.b32.xlu1 %v750_v26, %s912_s24 }
 0x217   : > { %420 = vrot.lane.b32.xlu1 %v969_v1, %s913_s25 }
 0x21b   : > { %418 = vrot.lane.b32.xlu1 %v750_v26, %s914_s26 }
 0x21f   : > { %528 = vrot.lane.b32.xlu1 %v750_v26, %s915_s27 }
 0x28f   : > { %v252_v28 = vpop.xlane.xlu1 %251 }
 0x290   : > { %867 = vrcp.f32 %v252_v28 }
 0x293   : > { %v309_v31 = vpop.permute.xlu1 %308 }
 0x297   : > { %v421_v34 = vpop.permute.xlu1 %420 }
 0x298   : > { %v426_v35 = vsel %vm197_vm1, %v421_v34, 0 }
 0x29a   : > { %v868_v29 = vpop.eup %867 }
 0x29b   : > { %v254_v30 = vmul.f32 %v868_v29, %v866_v24  ;;  %v419_v37 = vpop.permute.xlu1 %418 }
 0x29d   : > { %v255_v32 = vpack.c.bf16 %v254_v30, %v254_v30 }
 0x29f   : > { %784 = vmatmul.mubr.msk.bf16.vlgmr.msra.gmra.mrb[0].mxu1 %vm197_vm1, %v255_v32  ;;  %v529_v39 = vpop.permute.xlu1 %528 }
 0x2a0   : > { %788 = vmatpush3.bf16.xpose.msra.mxu1 %v316_v33  ;;  %789 = vmatprep.mubr.msk.bf16.mxu1 %vm906_vm0, %v905_v0 }
 0x2a1   : > { %799 = vmatprep.subr.bf16.mxu1 %v905_v0 }
 0x2a7   : > { %790 = vmatmul.mubr.msk.bf16.vlgmr.msra.gmra.mrb[4].mxu1 %vm197_vm1, %v309_v31 }
 0x2a8   : > { %800 = vmatpush3.bf16.xpose.msra.mxu1 %v426_v35  ;;  %801 = vmatprep.mubr.msk.bf16.mxu1 %vm906_vm0, %v905_v0 }
 0x2a9   : > { %811 = vmatprep.subr.bf16.mxu1 %v905_v0 }
 0x2af   : > { %802 = vmatmul.mubr.msk.bf16.vlgmr.msra.gmra.mrb[8].mxu1 %vm197_vm1, %v419_v37 }
 0x2b0   : > { %812 = vmatpush3.bf16.xpose.msra.mxu1 %v536_v38  ;;  %813 = vmatprep.mubr.msk.bf16.mxu1 %vm906_vm0, %v905_v0 }
 0x2b7   : > { %814 = vmatmul.mubr.msk.bf16.vlgmr.msra.gmra.mrb[12].mxu1 %vm197_vm1, %v529_v39 }
 0x372   : > { %v1007_v40 = vpop.f32.mrb[0].mxu1 }
 0x373   : > { %v785_v41 = vpop.f32.mrb[1].mxu1 }
 0x374   : > { %v302_v42 = vpop.f32.mrb[2].mxu1 }
 0x375   : > { %v786_v43 = vpop.f32.mrb[3].mxu1 }
 0x37a   : > { %v352_v44 = vpop.f32.mrb[4].mxu1 }
 0x37b   : > { %v353_v45 = vadd.f32 %v352_v44, %v983_v12  ;;  %v791_v46 = vpop.f32.mrb[5].mxu1 }
 0x37c   : > { %v355_v47 = vpop.f32.mrb[6].mxu1 }
 0x37d   : > { %v792_v48 = vpop.f32.mrb[7].mxu1  ;;  %v358_v49 = vsel %vm197_vm1, %v353_v45, -inf }
 0x37e   : > { %359 = vmax.xlane.f32.xlu1 %v358_v49 }
 0x382   : > { %v462_v50 = vpop.f32.mrb[8].mxu1 }
 0x383   : > { %v463_v51 = vadd.f32 %v462_v50, %v983_v12  ;;  %v803_v52 = vpop.f32.mrb[9].mxu1 }
 0x384   : > { %v465_v53 = vpop.f32.mrb[10].mxu1 }
 0x385   : > { %v468_v54 = vsel %vm197_vm1, %v463_v51, -inf  ;;  %v804_v55 = vpop.f32.mrb[11].mxu1 }
 0x386   : > { %469 = vmax.xlane.f32.xlu0 %v468_v54 }
 0x38a   : > { %v572_v56 = vpop.f32.mrb[12].mxu1 }
 0x38b   : > { %v573_v57 = vadd.f32 %v572_v56, %v983_v12  ;;  %v815_v58 = vpop.f32.mrb[13].mxu1 }
 0x38c   : > { %v575_v59 = vpop.f32.mrb[14].mxu1 }
 0x38d   : > { %v578_v60 = vsel %vm197_vm1, %v573_v57, -inf  ;;  %v816_v61 = vpop.f32.mrb[15].mxu1 }
 0x38e   : > { %579 = vmax.xlane.f32.xlu1 %v578_v60 }
 0x40b   : > { %v360_v62 = vpop.xlane.xlu1 %359 }
 0x40c   : > { %v361_v63 = vsub.f32 %v353_v45, %v360_v62 }
 0x40e   : > { %v362_v2 = vmul.f32 1.442695, %v361_v63 }
 0x410   : > { %869 = vpow2.f32 %v362_v2 }
 0x413   : > { %v470_v10 = vpop.xlane.xlu0 %469 }
 0x414   : > { %v471_v11 = vsub.f32 %v463_v51, %v470_v10 }
 0x416   : > { %v472_v12 = vmul.f32 1.442695, %v471_v11 }
 0x41a   : > { %v870_v3 = vpop.eup %869 }
 0x41b   : > { %v580_v4 = vpop.xlane.xlu1 %579  ;;  %v364_v5 = vsel %vm197_vm1, %v870_v3, 0.0 }
 0x41c   : > { %v581_v6 = vsub.f32 %v573_v57, %v580_v4  ;;  %365 = vadd.xlane.f32.xlu1 %v364_v5 }
 0x41e   : > { %v582_v7 = vmul.f32 1.442695, %v581_v6 }
 0x420   : > { %871 = vpow2.f32 %v582_v7 }
 0x421   : > { %873 = vpow2.f32 %v472_v12 }
 0x42a   : > { %v872_v8 = vpop.eup %871 }
 0x42b   : > { %v584_v9 = vsel %vm197_vm1, %v872_v8, 0.0  ;;  %v874_v13 = vpop.eup %873 }
 0x42c   : > { %585 = vadd.xlane.f32.xlu0 %v584_v9  ;;  %v474_v14 = vsel %vm197_vm1, %v874_v13, 0.0 }
 0x42d   : > { %370 = vrot.lane.b32.xlu1 %v969_v1, %s916_s28 }
 0x442   : > { %480 = vrot.lane.b32.xlu0 %v969_v1, %s917_s29 }
 0x451   : > { %475 = vadd.xlane.f32.xlu1 %v474_v14 }
 0x462   : > { %590 = vrot.lane.b32.xlu1 %v969_v1, %s918_s30 }
 0x4a9   : > { %v366_v15 = vpop.xlane.xlu1 %365 }
 0x4aa   : > { %875 = vrcp.f32 %v366_v15 }
 0x4ad   : > { %v371_v16 = vpop.permute.xlu1 %370 }
 0x4ae   : > { %v376_v17 = vsel %vm261_vm3, %v371_v16, 0 }
 0x4af   : > { %794 = vmatpush3.bf16.msra.mxu0 %v376_v17 }
 0x4b0   : > { %805 = vmatprep.subr.bf16.mxu0 %v905_v0 }
 0x4b4   : > { %v876_v18 = vpop.eup %875 }
 0x4b5   : > { %v368_v19 = vmul.f32 %v876_v18, %v870_v3 }
 0x4b7   : > { %v369_v20 = vpack.c.bf16 %v368_v19, %v368_v19 }
 0x4b9   : > { %796 = vmatmul.mubr.msk.bf16.vlgmr.msra.gmra.mrb[4].mxu0 %vm197_vm1, %v369_v20  ;;  %v586_v21 = vpop.xlane.xlu0 %585 }
 0x4ba   : > { %807 = vmatprep.mubr.msk.bf16.mxu0 %vm906_vm0, %v905_v0 }
 0x4bd   : > { %v481_v22 = vpop.permute.xlu0 %480 }
 0x4be   : > { %v486_v1 = vsel %vm261_vm3, %v481_v22, 0 }
 0x4bf   : > { %806 = vmatpush3.bf16.msra.mxu0 %v486_v1 }
 0x4c0   : > { %817 = vmatprep.subr.bf16.mxu0 %v905_v0 }
 0x4de   : > { %v476_v23 = vpop.xlane.xlu1 %475 }
 0x4df   : > { %877 = vrcp.f32 %v476_v23 }
 0x4e0   : > { %879 = vrcp.f32 %v586_v21 }
 0x4e2   : > { %v591_v25 = vpop.permute.xlu1 %590 }
 0x4e3   : > { %v596_v27 = vsel %vm261_vm3, %v591_v25, 0 }
 0x4e9   : > { %v878_v24 = vpop.eup %877 }
 0x4ea   : > { %v478_v26 = vmul.f32 %v878_v24, %v874_v13  ;;  %v880_v29 = vpop.eup %879 }
 0x4eb   : > { %v588_v30 = vmul.f32 %v880_v29, %v872_v8 }
 0x4ec   : > { %v479_v28 = vpack.c.bf16 %v478_v26, %v478_v26 }
 0x4ed   : > { %v589_v31 = vpack.c.bf16 %v588_v30, %v588_v30 }
 0x4ee   : > { %808 = vmatmul.mubr.msk.bf16.vlgmr.msra.gmra.mrb[8].mxu0 %vm197_vm1, %v479_v28 }
 0x4ef   : > { %818 = vmatpush3.bf16.msra.mxu0 %v596_v27  ;;  %819 = vmatprep.mubr.msk.bf16.mxu0 %vm906_vm0, %v905_v0 }
 0x4f6   : > { %820 = vmatmul.mubr.msk.bf16.vlgmr.msra.gmra.mrb[12].mxu0 %vm197_vm1, %v589_v31 }
 0x58c   : > { %v412_v32 = vpop.f32.mrb[4].mxu0 }
 0x58d   : > { %639 = vrot.lane.b32.xlu1 %v412_v32, %s919_s3  ;;  %v797_v33 = vpop.f32.mrb[5].mxu0 }
 0x58e   : > { %v415_v34 = vpop.f32.mrb[6].mxu0 }
 0x58f   : > { %v798_v35 = vpop.f32.mrb[7].mxu0 }
 0x5c1   : > { %v522_v36 = vpop.f32.mrb[8].mxu0 }
 0x5c2   : > { %643 = vrot.lane.b32.xlu0 %v522_v36, %s920_s4  ;;  %v809_v37 = vpop.f32.mrb[9].mxu0 }
 0x5c3   : > { %v525_v38 = vpop.f32.mrb[10].mxu0 }
 0x5c4   : > { %v810_v39 = vpop.f32.mrb[11].mxu0 }
 0x5c9   : > { %v632_v41 = vpop.f32.mrb[12].mxu0 }
 0x5ca   : > { %647 = vrot.lane.b32.xlu1 %v632_v41, %s921_s5  ;;  %v821_v0 = vpop.f32.mrb[13].mxu0 }
 0x5cb   : > { %v635_v42 = vpop.f32.mrb[14].mxu0 }
 0x5cc   : > { %v822_v43 = vpop.f32.mrb[15].mxu0 }
 0x5ff   : > { %v640_v44 = vpop.permute.xlu1 %639 }
 0x600   : > { %v650_v46 = vsel %vm197_vm1, %v1007_v40, %v640_v44 }
 0x634   : > { %v644_v45 = vpop.permute.xlu0 %643 }
 0x635   : > { %v652_v47 = vsel %vm651_vm4, %v650_v46, %v644_v45 }
 0x63c   : > { %v648_v48 = vpop.permute.xlu1 %647 }
 0x63d   : > { %v654_v49 = vsel %vm653_vm5, %v652_v47, %v648_v48 }
 0x63e   : > { %v655_v50 = vpack.c.bf16 %v654_v49, %v654_v49 }
 0x640   : > { %657 = vst.msk [vmem:[%s172_s8] sm:$0xf] %vm656_vm6, %v655_v50 }
 0x641 PF: > { %s12_s11 = sadd.s32 1, %s903_s11   ;;  %s1052_s9 = smov %s899_s10 }
 0x642   : > { %p9_p5 = scmp.ge.s32.totalorder %s12_s11, 4   ;;  %s1053_s10 = smov %s1055_s12 }
 0x644   :  { %11 = sbr.rel (!%p9_p5) target bundleno = 2 (0x2), region = 62 }

// kernel: transformer_forward.33
= control target key start
LH: loop header
LB: loop body
LE: loop exit
PB: predicated region body
PF: predicated region fallthrough
CT: control target
= control target key end

     0   :  { %vm22_vm0 = vcmask 261120   ;;  %v190_v0 = vmov 0.0   ;;  %vm191_vm1 = vmmov 0   ;;  %vm66_vm2 = vcmask 523264   ;;  %s248_s1 = inlined_call_operand.vmem [shape: bf16[64,32], index: 1, kind: input, shape index: {}]   ;;  %s249_s0 = inlined_call_operand.vmem [shape: bf16[16,64], index: 0, kind: input, shape index: {}]   ;;  %s250_s3 = inlined_call_operand.vmem [shape: bf16[16,32], index: 3, kind: input, shape index: {}]   ;;  %s251_s2 = inlined_call_operand.vmem [shape: f32[1,32], index: 2, kind: input, shape index: {}]   ;;  %s252_s4 = inlined_call_operand.vmem [shape: bf16[16,32], index: 4, kind: output, shape index: {}]  }
   0x1   :  { %171 = vmatprep.subr.bf16.mxu0 %v190_v0  ;;  %v185_v1 = vld [vmem:[%s248_s1] sm:$0xff]   ;;  %179 = vmatprep.mubr.msk.bf16.mxu0 %vm191_vm1, %v190_v0  ;;  %23 = vst.msk [vmem:[#allocation2] sm:$0xff] %vm22_vm0, %v190_v0  ;;  %24 = vst.msk [vmem:[#allocation2 + $0x8] sm:$0xff] %vm22_vm0, %v190_v0  ;;  %v186_v2 = vld [vmem:[%s248_s1 + $0x8] sm:$0xff]   ;;  %vm144_vm3 = vcmask 257024  }
   0x2   :  { %172 = vmatpush3.bf16.msra.mxu0 %v185_v1  ;;  %v187_v3 = vld [vmem:[%s248_s1 + $0x10] sm:$0xff]   ;;  %v188_v4 = vld [vmem:[%s248_s1 + $0x18] sm:$0xff]   ;;  %v189_v5 = vld [vmem:[%s249_s0] sm:$0xff]  }
   0x3   :  { %173 = vmatprep.subr.bf16.mxu0 %v190_v0  ;;  %v163_v14 = vld [vmem:[%s250_s3] sm:$0xff]  }
   0x4   :  { %v157_v15 = vld [vmem:[%s251_s2] ss:$0 sm:$0xff]  ;;  %v164_v16 = vunpack.c.l.bf16 %v163_v14  ;;  %v165_v19 = vunpack.c.h.bf16 %v163_v14 }
   0x6   :  { %174 = vmatpush3.bf16.msra.mxu0 %v186_v2 }
   0x7   :  { %175 = vmatprep.subr.bf16.mxu0 %v190_v0 }
   0x8   :  { %v25_v6 = vld [vmem:[#allocation2] sm:$0xff]  ;;  %v26_v8 = vld [vmem:[#allocation2 + $0x8] sm:$0xff] }
   0xa   :  { %176 = vmatpush3.bf16.msra.mxu0 %v187_v3 }
   0xb   :  { %177 = vmatprep.subr.bf16.mxu0 %v190_v0 }
   0xe   :  { %178 = vmatpush3.bf16.msra.mxu0 %v188_v4 }
  0x11   :  { %180 = vmatmul.mubr.msk.bf16.vlgmr.msra.gmra.mrb[0].mxu0 %vm66_vm2, %v189_v5 }
  0xe4   :  { %v104_v7 = vpop.f32.mrb[0].mxu0 }
  0xe5   :  { %v111_v9 = vadd.f32 %v104_v7, %v25_v6  ;;  %v181_v10 = vpop.f32.mrb[1].mxu0 }
  0xe6   :  { %v107_v11 = vpop.f32.mrb[2].mxu0 }
  0xe7   :  { %114 = vst.msk [vmem:[#allocation2] sm:$0xff] %vm22_vm0, %v111_v9  ;;  %v112_v12 = vadd.f32 %v107_v11, %v26_v8  ;;  %v182_v13 = vpop.f32.mrb[3].mxu0 }
  0xe9   :  { %115 = vst.msk [vmem:[#allocation2 + $0x8] sm:$0xff] %vm22_vm0, %v112_v12 }
  0xee   :  { %v119_v17 = vld [vmem:[#allocation2] sm:$0xff] }
  0xef   :  { %v128_v18 = vadd.f32 %v157_v15, %v119_v17 }
  0xf0   :  { %v120_v20 = vld [vmem:[#allocation2 + $0x8] sm:$0xff] }
  0xf1   :  { %v134_v21 = vadd.f32 %v164_v16, %v128_v18  ;;  %v129_v22 = vadd.f32 %v157_v15, %v120_v20 }
  0xf3   :  { %v160_v23 = vpack.c.bf16 %v134_v21, %v134_v21  ;;  %v135_v24 = vadd.f32 %v165_v19, %v129_v22 }
  0xf5   :  { %145 = vst.msk [vmem:[%s252_s4] sm:$0xf] %vm144_vm3, %v160_v23  ;;  %v161_v25 = vpack.c.bf16 %v135_v24, %v135_v24 }
  0xf7   :  { %146 = vst.msk [vmem:[%s252_s4 + $0x4] sm:$0xf] %vm144_vm3, %v161_v25 }

// kernel: transformer_forward.43
= control target key start
LH: loop header
LB: loop body
LE: loop exit
PB: predicated region body
PF: predicated region fallthrough
CT: control target
= control target key end

     0   :  { %vm19_vm0 = vcmask 523264   ;;  %v151_v0 = vmov 0.0   ;;  %vm152_vm1 = vmmov 0   ;;  %vm47_vm2 = vcmask 261120   ;;  %s195_s1 = inlined_call_operand.vmem [shape: bf16[32,64], index: 1, kind: input, shape index: {}]   ;;  %s196_s0 = inlined_call_operand.vmem [shape: bf16[16,32], index: 0, kind: input, shape index: {}]   ;;  %s197_s2 = inlined_call_operand.vmem [shape: f32[1,64], index: 2, kind: input, shape index: {}]   ;;  %s198_s3 = inlined_call_operand.vmem [shape: bf16[16,64], index: 3, kind: output, shape index: {}]  }
   0x1   :  { %138 = vmatprep.subr.bf16.mxu0 %v151_v0  ;;  %v148_v1 = vld [vmem:[%s195_s1] sm:$0xff]   ;;  %142 = vmatprep.mubr.msk.bf16.mxu0 %vm152_vm1, %v151_v0  ;;  %20 = vst.msk [vmem:[#allocation2] sm:$0xff] %vm19_vm0, %v151_v0  ;;  %21 = vst.msk [vmem:[#allocation2 + $0x8] sm:$0xff] %vm19_vm0, %v151_v0  ;;  %v149_v2 = vld [vmem:[%s195_s1 + $0x8] sm:$0xff]   ;;  %vm119_vm3 = vcmask 519168  }
   0x2   :  { %139 = vmatpush3.bf16.msra.mxu0 %v148_v1  ;;  %v150_v3 = vld [vmem:[%s196_s0] sm:$0xff]  }
   0x3   :  { %140 = vmatprep.subr.bf16.mxu0 %v151_v0  ;;  %v130_v12 = vld [vmem:[%s197_s2] ss:$0 sm:$0xff] }
   0x6   :  { %141 = vmatpush3.bf16.msra.mxu0 %v149_v2 }
   0x8   :  { %v22_v4 = vld [vmem:[#allocation2] sm:$0xff]  ;;  %v23_v6 = vld [vmem:[#allocation2 + $0x8] sm:$0xff] }
   0x9   :  { %143 = vmatmul.mubr.msk.bf16.vlgmr.msra.gmra.mrb[0].mxu0 %vm47_vm2, %v150_v3 }
  0xdc   :  { %v85_v5 = vpop.f32.mrb[0].mxu0 }
  0xdd   :  { %v92_v7 = vadd.f32 %v85_v5, %v22_v4  ;;  %v144_v8 = vpop.f32.mrb[1].mxu0 }
  0xde   :  { %v88_v9 = vpop.f32.mrb[2].mxu0 }
  0xdf   :  { %95 = vst.msk [vmem:[#allocation2] sm:$0xff] %vm19_vm0, %v92_v7  ;;  %v93_v10 = vadd.f32 %v88_v9, %v23_v6  ;;  %v145_v11 = vpop.f32.mrb[3].mxu0 }
  0xe1   :  { %96 = vst.msk [vmem:[#allocation2 + $0x8] sm:$0xff] %vm19_vm0, %v93_v10 }
  0xe6   :  { %v100_v13 = vld [vmem:[#allocation2] sm:$0xff] }
  0xe7   :  { %v109_v14 = vadd.f32 %v130_v12, %v100_v13 }
  0xe8   :  { %v101_v15 = vld [vmem:[#allocation2 + $0x8] sm:$0xff] }
  0xe9   :  { %v133_v16 = vpack.c.bf16 %v109_v14, %v109_v14  ;;  %v110_v17 = vadd.f32 %v130_v12, %v101_v15 }
  0xeb   :  { %120 = vst.msk [vmem:[%s198_s3] sm:$0xf] %vm119_vm3, %v133_v16  ;;  %v134_v18 = vpack.c.bf16 %v110_v17, %v110_v17 }
  0xed   :  { %121 = vst.msk [vmem:[%s198_s3 + $0x4] sm:$0xf] %vm119_vm3, %v134_v18 }

// kernel: transformer_forward.42
= control target key start
LH: loop header
LB: loop body
LE: loop exit
PB: predicated region body
PF: predicated region fallthrough
CT: control target
= control target key end

     0   :  { %vm29_vm0 = vcmask 261120   ;;  %v213_v16 = vmov 0.0   ;;  %vm214_vm1 = vmmov 0   ;;  %vm169_vm6 = vcmask 257024   ;;  %s275_s0 = inlined_call_operand.vmem [shape: bf16[16,32], index: 0, kind: input, shape index: {}]   ;;  %s276_s3 = inlined_call_operand.vmem [shape: bf16[32,32], index: 3, kind: input, shape index: {}]   ;;  %s277_s1 = inlined_call_operand.vmem [shape: f32[1,32], index: 1, kind: input, shape index: {}]   ;;  %s278_s2 = inlined_call_operand.vmem [shape: f32[1,32], index: 2, kind: input, shape index: {}]   ;;  %s279_s4 = inlined_call_operand.vmem [shape: f32[1,32], index: 4, kind: input, shape index: {}]   ;;  %s280_s5 = inlined_call_operand.vmem [shape: bf16[16,32], index: 5, kind: output, shape index: {}]  }
   0x1   :  { %v187_v0 = vld [vmem:[%s275_s0] sm:$0xff]   ;;  %193 = vmatprep.subr.bf16.mxu0 %v213_v16  ;;  %v204_v17 = vld [vmem:[%s276_s3 + $0x8] sm:$0xff]   ;;  %197 = vmatprep.mubr.msk.bf16.mxu0 %vm214_vm1, %v213_v16 }
   0x2   :  { %v188_v1 = vunpack.c.l.bf16 %v187_v0  ;;  %v189_v2 = vunpack.c.h.bf16 %v187_v0  ;;  %v203_v15 = vld [vmem:[%s276_s3] sm:$0xff]  }
   0x3   :  { %194 = vmatpush3.bf16.msra.mxu0 %v203_v15  ;;  %v176_v34 = vld [vmem:[%s277_s1] ss:$0 sm:$0xff] }
   0x4   :  { %v30_v3 = vsel %vm29_vm0, %v188_v1, 0.0  ;;  %v33_v4 = vsel %vm29_vm0, %v189_v2, 0.0  ;;  %195 = vmatprep.subr.bf16.mxu0 %v213_v16  ;;  %v177_v40 = vld [vmem:[%s278_s2] ss:$0 sm:$0xff] }
   0x5   :  { %31 = vadd.xlane.f32.xlu0 %v30_v3  ;;  %v178_v46 = vld [vmem:[%s279_s4] ss:$0 sm:$0xff] }
   0x7   :  { %196 = vmatpush3.bf16.msra.mxu0 %v204_v17 }
   0x9   :  { %34 = vadd.xlane.f32.xlu0 %v33_v4 }
  0x92   :  { %v32_v5 = vpop.xlane.xlu0 %31 }
  0x93   :  { %v37_v6 = vmul.f32 0.03125, %v32_v5 }
  0x95   :  { %v39_v7 = vsub.f32 %v188_v1, %v37_v6 }
  0x96   :  { %v35_v8 = vpop.xlane.xlu0 %34 }
  0x97   :  { %v38_v9 = vmul.f32 0.03125, %v35_v8  ;;  %v41_v10 = vmul.f32 %v39_v7, %v39_v7  ;;  %v59_v36 = vmul.f32 %v176_v34, %v39_v7 }
  0x99   :  { %v40_v11 = vsub.f32 %v189_v2, %v38_v9  ;;  %v43_v12 = vsel %vm29_vm0, %v41_v10, 0.0 }
  0x9a   :  { %44 = vadd.xlane.f32.xlu1 %v43_v12 }
  0x9b   :  { %v42_v13 = vmul.f32 %v40_v11, %v40_v11  ;;  %v60_v37 = vmul.f32 %v176_v34, %v40_v11 }
  0x9d   :  { %v46_v14 = vsel %vm29_vm0, %v42_v13, 0.0 }
  0x9e   :  { %47 = vadd.xlane.f32.xlu1 %v46_v14 }
 0x127   :  { %v45_v18 = vpop.xlane.xlu1 %44 }
 0x128   :  { %v50_v19 = vmul.f32 0.032258064, %v45_v18 }
 0x12a   :  { %205 = vrsqrt.f32 %v50_v19  ;;  %vm63_vm2 = vcmp.eq.f32.partialorder %v50_v19, inf  ;;  %v66_v24 = vand.u32 2147483648, %v50_v19  ;;  %vm65_vm3 = vcmp.eq.f32.partialorder %v50_v19, 0.0 }
 0x12b   :  { %v48_v20 = vpop.xlane.xlu1 %47 }
 0x12c   :  { %v51_v21 = vmul.f32 0.032258064, %v48_v20 }
 0x12e   :  { %207 = vrsqrt.f32 %v51_v21  ;;  %vm70_vm4 = vcmp.eq.f32.partialorder %v51_v21, inf  ;;  %v73_v30 = vand.u32 2147483648, %v51_v21  ;;  %vm72_vm5 = vcmp.eq.f32.partialorder %v51_v21, 0.0 }
 0x134   :  { %v206_v22 = vpop.eup %205 }
 0x135   :  { %v62_v23 = vmul.f32 %v206_v22, %v50_v19 }
 0x137   :  { %v64_v25 = vsel %vm63_vm2, %v50_v19, %v62_v23 }
 0x138   :  { %v208_v26 = vpop.eup %207  ;;  %v67_v27 = vsel %vm65_vm3, %v66_v24, %v64_v25 }
 0x139   :  { %v75_v28 = vadd.f32 1e-06, %v67_v27  ;;  %v69_v29 = vmul.f32 %v208_v26, %v51_v21 }
 0x13b   :  { %209 = vrcp.f32 %v75_v28  ;;  %v71_v31 = vsel %vm70_vm4, %v51_v21, %v69_v29 }
 0x13c   :  { %v74_v32 = vsel %vm72_vm5, %v73_v30, %v71_v31 }
 0x13d   :  { %v76_v33 = vadd.f32 1e-06, %v74_v32 }
 0x13f   :  { %211 = vrcp.f32 %v76_v33 }
 0x145   :  { %v210_v35 = vpop.eup %209 }
 0x146   :  { %v78_v38 = vmul.f32 %v210_v35, %v59_v36 }
 0x148   :  { %v88_v42 = vadd.f32 %v177_v40, %v78_v38 }
 0x149   :  { %v212_v39 = vpop.eup %211 }
 0x14a   :  { %v80_v41 = vmul.f32 %v212_v39, %v60_v37 }
 0x14c   :  { %v89_v43 = vadd.f32 %v177_v40, %v80_v41 }
 0x14e   :  { %v90_v44 = vpack.c.bf16 %v89_v43, %v88_v42 }
 0x150   :  { %91 = vst.msk [vmem:[#allocation2] sm:$0xff] %vm29_vm0, %v90_v44 }
 0x157   :  { %v92_v45 = vld [vmem:[#allocation2] sm:$0xff] }
 0x158   :  { %198 = vmatmul.mubr.msk.bf16.vlgmr.msra.gmra.mrb[0].mxu0 %vm29_vm0, %v92_v45 }
 0x22b   :  { %v154_v47 = vpop.f32.mrb[0].mxu0 }
 0x22c   :  { %v155_v48 = vadd.f32 %v178_v46, %v154_v47  ;;  %v199_v49 = vpop.f32.mrb[1].mxu0 }
 0x22d   :  { %v157_v50 = vpop.f32.mrb[2].mxu0 }
 0x22e   :  { %v184_v51 = vpack.c.bf16 %v155_v48, %v155_v48  ;;  %v158_v52 = vadd.f32 %v178_v46, %v157_v50  ;;  %v200_v53 = vpop.f32.mrb[3].mxu0 }
 0x230   :  { %170 = vst.msk [vmem:[%s280_s5] sm:$0xf] %vm169_vm6, %v184_v51  ;;  %v185_v54 = vpack.c.bf16 %v158_v52, %v158_v52 }
 0x232   :  { %171 = vst.msk [vmem:[%s280_s5 + $0x4] sm:$0xf] %vm169_vm6, %v185_v54 }

// kernel: transformer_forward.40
= control target key start
LH: loop header
LB: loop body
LE: loop exit
PB: predicated region body
PF: predicated region fallthrough
CT: control target
= control target key end

     0   :  { %s946_s9 = smov 0   ;;  %s948_s10 = smov 0   ;;  %s1058_s0 = inlined_call_operand.vmem [shape: bf16[2,8,96], index: 0, kind: input, shape index: {}]   ;;  %s1059_s1 = inlined_call_operand.vmem [shape: f32[2,1,8], index: 1, kind: input, shape index: {}]   ;;  %s1060_s2 = inlined_call_operand.vmem [shape: bf16[2,8,32], index: 2, kind: output, shape index: {}]  }
   0x1   :  { %s950_s11 = smov 0  }
   0x2 LB: > { %s24_s12 = sadd.s32 1, %s908_s10  ;;  %p753_p0 = scmp.ge.s32.totalorder %s912_s11, 1  ;;  %s912_s11 = sphi %s950_s11, %s12_s11   ;;  %s908_s10 = sphi %s948_s10, %s1062_s10   ;;  %s904_s9 = sphi %s946_s9, %s1061_s9  }
   0x3   : > { %p26_p1 = scmp.ge.s32.totalorder %s24_s12, 2  ;;  %p133_p2 = scmp.lt.s32.totalorder %s912_s11, 3 }
   0x5   : > { %s1064_s12 = smov (%p26_p1, %s24_s12), 0  ;;  %p134_p3 = pnand %p753_p0, %p133_p2 }
   0x6   : > { %p159_p4 = scmp.lt.s32.totalorder (!%p134_p3), %s904_s9, 1  ;;  %v914_v0 = vmov (!%p134_p3), 0.0   ;;  %vm915_vm0 = vmmov (!%p134_p3), 0   ;;  %s916_s17 = smov (!%p134_p3), 96   ;;  %vm206_vm1 = vcmask (!%p134_p3), 64512   ;;  %v185_v6 = vlaneseq (!%p134_p3) }
   0x7   : > { %137 = sbr.rel (%p134_p3) target bundleno = 1601 (0x641), region = 28  ;;  %784 = vmatprep.subr.bf16.mxu0 (!%p134_p3), %v914_v0  ;;  %786 = vmatprep.mubr.msk.bf16.mxu0 (!%p134_p3), %vm915_vm0, %v914_v0  ;;  %s917_s18 = smov (!%p134_p3), 64   ;;  %v919_v11 = vmov (!%p134_p3), -1e+09   ;;  %vm270_vm4 = vcmask (!%p134_p3), 1043456   ;;  %vm660_vm5 = vcmask (!%p134_p3), 130048  }
   0x8   : > { %790 = vmatprep.subr.bf16.mxu1 (!%p134_p3), %v914_v0  ;;  %792 = vmatprep.mubr.msk.bf16.mxu1 (!%p134_p3), %vm915_vm0, %v914_v0  ;;  %s918_s19 = smov (!%p134_p3), 88   ;;  %v186_v8 = vshrl.u32 (!%p134_p3), %v185_v6, 7  ;;  %v190_v9 = vand.u32 (!%p134_p3), 127, %v185_v6  ;;  %s920_s23 = smov (!%p134_p3), 72   ;;  %vm662_vm6 = vcmask (!%p134_p3), 195584   ;;  %vm665_vm7 = vcmask (!%p134_p3), 257024  }
   0x9   : > { %s921_s24 = smov (!%p134_p3), 120   ;;  %s922_s25 = smov (!%p134_p3), 80  }
   0xa   : > { %v196_v10 = vsub.s32 (!%p134_p3), 0, %v186_v8  ;;  %vm191_vm3 = vcmp.le.s32.totalorder (!%p134_p3), %v190_v9, %v186_v8  ;;  %s923_s26 = smov (!%p134_p3), 112   ;;  %s924_s27 = smov (!%p134_p3), 104  }
   0xb   : > { %v192_v14 = vsel (!%p134_p3), %vm191_vm3, 0.0, %v919_v11  ;;  %s925_s28 = smov (!%p134_p3), 56   ;;  %s926_s29 = smov (!%p134_p3), 48  }
   0xc   : > { %s927_s30 = smov (!%p134_p3), 40   ;;  %s928_s3 = smov (!%p134_p3), 8  }
   0xd   : > { %s929_s4 = smov (!%p134_p3), 16   ;;  %s930_s5 = smov (!%p134_p3), 24  }
   0xe   : > { %s1066_s9 = smov (!%p159_p4, %s904_s9), 1 }
   0xf   : > { %s754_s13 = sshll.u32 %s1066_s9, 2  ;;  %s165_s22 = scalar_lea.vmem %s1059_s1, %s1066_s9 }
  0x10   : > { %s162_s16 = scalar_lea.vmem %s1058_s0, %s754_s13  ;;  %v182_v7 = vld [vmem:[%s165_s22] sm:$0x1]  ;;  %s172_s8 = scalar_lea.vmem %s1060_s2, %s754_s13 }
  0x11   : > { %v978_v1 = vld [vmem:[%s162_s16] ss:$0 sps:$4 sm:$0xff]   ;;  %vm183_vm2 = vcmp.gt.f32.partialorder %v182_v7, 0.0 }
  0x12   : > { %204 = vrot.lane.b32.xlu0 %v978_v1, %s916_s17  ;;  %v180_v4 = vld [vmem:[%s162_s16] sm:$0xf]  ;;  %265 = vrot.lane.b32.xlu1 %v978_v1, %s917_s18  ;;  %v184_v12 = vsel %vm183_vm2, 0.0, %v919_v11 }
  0x13   : > { %v200_v5 = vmul.bf16 1052065461, %v180_v4  ;;  %v197_v13 = vrot.slane %v184_v12, %v196_v10 }
  0x15   : > { %v992_v15 = vadd.f32 %v197_v13, %v192_v14  ;;  %v759_v29 = vcombine.low %v200_v5, %v200_v5 }
  0x16   : > { %319 = vrot.lane.b32.xlu1 %v978_v1, %s918_s19 }
  0x84   : > { %v205_v2 = vpop.permute.xlu0 %204  ;;  %v266_v22 = vpop.permute.xlu1 %265 }
  0x85   : > { %v211_v3 = vsel %vm206_vm1, %v205_v2, 0  ;;  %v272_v23 = vsel %vm270_vm4, %v266_v22, 0 }
  0x86   : > { %785 = vmatpush3.bf16.xpose.msra.mxu0 %v211_v3  ;;  %791 = vmatpush3.bf16.msra.mxu1 %v272_v23 }
  0x87   : > { %802 = vmatprep.subr.bf16.mxu0 %v914_v0  ;;  %796 = vmatprep.subr.bf16.mxu1 %v914_v0 }
  0x88   : > { %v320_v30 = vpop.permute.xlu1 %319 }
  0x89   : > { %v325_v36 = vsel %vm206_vm1, %v320_v30, 0 }
  0x8d   : > { %787 = vmatmul.mubr.msk.bf16.vlgmr.msra.gmra.mrb[0].mxu0 %vm206_vm1, %v200_v5 }
  0x8e   : > { %804 = vmatprep.mubr.msk.bf16.mxu0 %vm915_vm0, %v914_v0 }
 0x160   : > { %v247_v16 = vpop.f32.mrb[0].mxu0 }
 0x161   : > { %v248_v17 = vadd.f32 %v247_v16, %v992_v15  ;;  %v788_v18 = vpop.f32.mrb[1].mxu0 }
 0x162   : > { %v250_v19 = vpop.f32.mrb[2].mxu0 }
 0x163   : > { %v789_v20 = vpop.f32.mrb[3].mxu0  ;;  %v253_v21 = vsel %vm206_vm1, %v248_v17, -inf }
 0x164   : > { %254 = vmax.xlane.f32.xlu0 %v253_v21 }
 0x17a   : > { %539 = vrot.lane.b32.xlu0 %v978_v1, %s920_s23 }
 0x1f1   : > { %v255_v24 = vpop.xlane.xlu0 %254 }
 0x1f2   : > { %v256_v25 = vsub.f32 %v248_v17, %v255_v24 }
 0x1f4   : > { %v257_v26 = vmul.f32 1.442695, %v256_v25 }
 0x1f5   : > { %v540_v39 = vpop.permute.xlu0 %539 }
 0x1f6   : > { %874 = vpow2.f32 %v257_v26  ;;  %v545_v41 = vsel %vm206_vm1, %v540_v39, 0 }
 0x200   : > { %v875_v27 = vpop.eup %874 }
 0x201   : > { %v259_v28 = vsel %vm206_vm1, %v875_v27, 0.0 }
 0x202   : > { %260 = vadd.xlane.f32.xlu1 %v259_v28 }
 0x213   : > { %317 = vrot.lane.b32.xlu1 %v759_v29, %s921_s24 }
 0x217   : > { %429 = vrot.lane.b32.xlu1 %v978_v1, %s922_s25 }
 0x21b   : > { %427 = vrot.lane.b32.xlu1 %v759_v29, %s923_s26 }
 0x21f   : > { %537 = vrot.lane.b32.xlu1 %v759_v29, %s924_s27 }
 0x28f   : > { %v261_v31 = vpop.xlane.xlu1 %260 }
 0x290   : > { %876 = vrcp.f32 %v261_v31 }
 0x293   : > { %v318_v34 = vpop.permute.xlu1 %317 }
 0x297   : > { %v430_v37 = vpop.permute.xlu1 %429 }
 0x298   : > { %v435_v38 = vsel %vm206_vm1, %v430_v37, 0 }
 0x29a   : > { %v877_v32 = vpop.eup %876 }
 0x29b   : > { %v263_v33 = vmul.f32 %v877_v32, %v875_v27  ;;  %v428_v40 = vpop.permute.xlu1 %427 }
 0x29d   : > { %v264_v35 = vpack.c.bf16 %v263_v33, %v263_v33 }
 0x29f   : > { %793 = vmatmul.mubr.msk.bf16.vlgmr.msra.gmra.mrb[0].mxu1 %vm206_vm1, %v264_v35  ;;  %v538_v42 = vpop.permute.xlu1 %537 }
 0x2a0   : > { %797 = vmatpush3.bf16.xpose.msra.mxu1 %v325_v36  ;;  %798 = vmatprep.mubr.msk.bf16.mxu1 %vm915_vm0, %v914_v0 }
 0x2a1   : > { %808 = vmatprep.subr.bf16.mxu1 %v914_v0 }
 0x2a7   : > { %799 = vmatmul.mubr.msk.bf16.vlgmr.msra.gmra.mrb[4].mxu1 %vm206_vm1, %v318_v34 }
 0x2a8   : > { %809 = vmatpush3.bf16.xpose.msra.mxu1 %v435_v38  ;;  %810 = vmatprep.mubr.msk.bf16.mxu1 %vm915_vm0, %v914_v0 }
 0x2a9   : > { %820 = vmatprep.subr.bf16.mxu1 %v914_v0 }
 0x2af   : > { %811 = vmatmul.mubr.msk.bf16.vlgmr.msra.gmra.mrb[8].mxu1 %vm206_vm1, %v428_v40 }
 0x2b0   : > { %821 = vmatpush3.bf16.xpose.msra.mxu1 %v545_v41  ;;  %822 = vmatprep.mubr.msk.bf16.mxu1 %vm915_vm0, %v914_v0 }
 0x2b7   : > { %823 = vmatmul.mubr.msk.bf16.vlgmr.msra.gmra.mrb[12].mxu1 %vm206_vm1, %v538_v42 }
 0x372   : > { %v1016_v43 = vpop.f32.mrb[0].mxu1 }
 0x373   : > { %v794_v44 = vpop.f32.mrb[1].mxu1 }
 0x374   : > { %v311_v45 = vpop.f32.mrb[2].mxu1 }
 0x375   : > { %v795_v46 = vpop.f32.mrb[3].mxu1 }
 0x37a   : > { %v361_v47 = vpop.f32.mrb[4].mxu1 }
 0x37b   : > { %v362_v48 = vadd.f32 %v361_v47, %v992_v15  ;;  %v800_v49 = vpop.f32.mrb[5].mxu1 }
 0x37c   : > { %v364_v50 = vpop.f32.mrb[6].mxu1 }
 0x37d   : > { %v801_v51 = vpop.f32.mrb[7].mxu1  ;;  %v367_v52 = vsel %vm206_vm1, %v362_v48, -inf }
 0x37e   : > { %368 = vmax.xlane.f32.xlu1 %v367_v52 }
 0x382   : > { %v471_v53 = vpop.f32.mrb[8].mxu1 }
 0x383   : > { %v472_v54 = vadd.f32 %v471_v53, %v992_v15  ;;  %v812_v55 = vpop.f32.mrb[9].mxu1 }
 0x384   : > { %v474_v56 = vpop.f32.mrb[10].mxu1 }
 0x385   : > { %v477_v57 = vsel %vm206_vm1, %v472_v54, -inf  ;;  %v813_v58 = vpop.f32.mrb[11].mxu1 }
 0x386   : > { %478 = vmax.xlane.f32.xlu0 %v477_v57 }
 0x38a   : > { %v581_v59 = vpop.f32.mrb[12].mxu1 }
 0x38b   : > { %v582_v60 = vadd.f32 %v581_v59, %v992_v15  ;;  %v824_v61 = vpop.f32.mrb[13].mxu1 }
 0x38c   : > { %v584_v62 = vpop.f32.mrb[14].mxu1 }
 0x38d   : > { %v587_v63 = vsel %vm206_vm1, %v582_v60, -inf  ;;  %v825_v2 = vpop.f32.mrb[15].mxu1 }
 0x38e   : > { %588 = vmax.xlane.f32.xlu1 %v587_v63 }
 0x40b   : > { %v369_v3 = vpop.xlane.xlu1 %368 }
 0x40c   : > { %v370_v4 = vsub.f32 %v362_v48, %v369_v3 }
 0x40e   : > { %v371_v5 = vmul.f32 1.442695, %v370_v4 }
 0x410   : > { %878 = vpow2.f32 %v371_v5 }
 0x413   : > { %v479_v13 = vpop.xlane.xlu0 %478 }
 0x414   : > { %v480_v14 = vsub.f32 %v472_v54, %v479_v13 }
 0x416   : > { %v481_v15 = vmul.f32 1.442695, %v480_v14 }
 0x41a   : > { %v879_v6 = vpop.eup %878 }
 0x41b   : > { %v589_v7 = vpop.xlane.xlu1 %588  ;;  %v373_v8 = vsel %vm206_vm1, %v879_v6, 0.0 }
 0x41c   : > { %v590_v9 = vsub.f32 %v582_v60, %v589_v7  ;;  %374 = vadd.xlane.f32.xlu1 %v373_v8 }
 0x41e   : > { %v591_v10 = vmul.f32 1.442695, %v590_v9 }
 0x420   : > { %880 = vpow2.f32 %v591_v10 }
 0x421   : > { %882 = vpow2.f32 %v481_v15 }
 0x42a   : > { %v881_v11 = vpop.eup %880 }
 0x42b   : > { %v593_v12 = vsel %vm206_vm1, %v881_v11, 0.0  ;;  %v883_v16 = vpop.eup %882 }
 0x42c   : > { %594 = vadd.xlane.f32.xlu0 %v593_v12  ;;  %v483_v17 = vsel %vm206_vm1, %v883_v16, 0.0 }
 0x42d   : > { %379 = vrot.lane.b32.xlu1 %v978_v1, %s925_s28 }
 0x442   : > { %489 = vrot.lane.b32.xlu0 %v978_v1, %s926_s29 }
 0x451   : > { %484 = vadd.xlane.f32.xlu1 %v483_v17 }
 0x462   : > { %599 = vrot.lane.b32.xlu1 %v978_v1, %s927_s30 }
 0x4a9   : > { %v375_v18 = vpop.xlane.xlu1 %374 }
 0x4aa   : > { %884 = vrcp.f32 %v375_v18 }
 0x4ad   : > { %v380_v19 = vpop.permute.xlu1 %379 }
 0x4ae   : > { %v385_v20 = vsel %vm270_vm4, %v380_v19, 0 }
 0x4af   : > { %803 = vmatpush3.bf16.msra.mxu0 %v385_v20 }
 0x4b0   : > { %814 = vmatprep.subr.bf16.mxu0 %v914_v0 }
 0x4b4   : > { %v885_v21 = vpop.eup %884 }
 0x4b5   : > { %v377_v22 = vmul.f32 %v885_v21, %v879_v6 }
 0x4b7   : > { %v378_v23 = vpack.c.bf16 %v377_v22, %v377_v22 }
 0x4b9   : > { %805 = vmatmul.mubr.msk.bf16.vlgmr.msra.gmra.mrb[4].mxu0 %vm206_vm1, %v378_v23  ;;  %v595_v24 = vpop.xlane.xlu0 %594 }
 0x4ba   : > { %816 = vmatprep.mubr.msk.bf16.mxu0 %vm915_vm0, %v914_v0 }
 0x4bd   : > { %v490_v25 = vpop.permute.xlu0 %489 }
 0x4be   : > { %v495_v1 = vsel %vm270_vm4, %v490_v25, 0 }
 0x4bf   : > { %815 = vmatpush3.bf16.msra.mxu0 %v495_v1 }
 0x4c0   : > { %826 = vmatprep.subr.bf16.mxu0 %v914_v0 }
 0x4de   : > { %v485_v26 = vpop.xlane.xlu1 %484 }
 0x4df   : > { %886 = vrcp.f32 %v485_v26 }
 0x4e0   : > { %888 = vrcp.f32 %v595_v24 }
 0x4e2   : > { %v600_v28 = vpop.permute.xlu1 %599 }
 0x4e3   : > { %v605_v30 = vsel %vm270_vm4, %v600_v28, 0 }
 0x4e9   : > { %v887_v27 = vpop.eup %886 }
 0x4ea   : > { %v487_v29 = vmul.f32 %v887_v27, %v883_v16  ;;  %v889_v32 = vpop.eup %888 }
 0x4eb   : > { %v597_v33 = vmul.f32 %v889_v32, %v881_v11 }
 0x4ec   : > { %v488_v31 = vpack.c.bf16 %v487_v29, %v487_v29 }
 0x4ed   : > { %v598_v34 = vpack.c.bf16 %v597_v33, %v597_v33 }
 0x4ee   : > { %817 = vmatmul.mubr.msk.bf16.vlgmr.msra.gmra.mrb[8].mxu0 %vm206_vm1, %v488_v31 }
 0x4ef   : > { %827 = vmatpush3.bf16.msra.mxu0 %v605_v30  ;;  %828 = vmatprep.mubr.msk.bf16.mxu0 %vm915_vm0, %v914_v0 }
 0x4f6   : > { %829 = vmatmul.mubr.msk.bf16.vlgmr.msra.gmra.mrb[12].mxu0 %vm206_vm1, %v598_v34 }
 0x58c   : > { %v421_v35 = vpop.f32.mrb[4].mxu0 }
 0x58d   : > { %648 = vrot.lane.b32.xlu1 %v421_v35, %s928_s3  ;;  %v806_v36 = vpop.f32.mrb[5].mxu0 }
 0x58e   : > { %v424_v37 = vpop.f32.mrb[6].mxu0 }
 0x58f   : > { %v807_v38 = vpop.f32.mrb[7].mxu0 }
 0x5c1   : > { %v531_v39 = vpop.f32.mrb[8].mxu0 }
 0x5c2   : > { %652 = vrot.lane.b32.xlu0 %v531_v39, %s929_s4  ;;  %v818_v40 = vpop.f32.mrb[9].mxu0 }
 0x5c3   : > { %v534_v41 = vpop.f32.mrb[10].mxu0 }
 0x5c4   : > { %v819_v42 = vpop.f32.mrb[11].mxu0 }
 0x5c9   : > { %v641_v44 = vpop.f32.mrb[12].mxu0 }
 0x5ca   : > { %656 = vrot.lane.b32.xlu1 %v641_v44, %s930_s5  ;;  %v830_v0 = vpop.f32.mrb[13].mxu0 }
 0x5cb   : > { %v644_v45 = vpop.f32.mrb[14].mxu0 }
 0x5cc   : > { %v831_v46 = vpop.f32.mrb[15].mxu0 }
 0x5ff   : > { %v649_v47 = vpop.permute.xlu1 %648 }
 0x600   : > { %v659_v49 = vsel %vm206_vm1, %v1016_v43, %v649_v47 }
 0x634   : > { %v653_v48 = vpop.permute.xlu0 %652 }
 0x635   : > { %v661_v50 = vsel %vm660_vm5, %v659_v49, %v653_v48 }
 0x63c   : > { %v657_v51 = vpop.permute.xlu1 %656 }
 0x63d   : > { %v663_v52 = vsel %vm662_vm6, %v661_v50, %v657_v51 }
 0x63e   : > { %v664_v53 = vpack.c.bf16 %v663_v52, %v663_v52 }
 0x640   : > { %666 = vst.msk [vmem:[%s172_s8] sm:$0xf] %vm665_vm7, %v664_v53 }
 0x641 PF: > { %s12_s11 = sadd.s32 1, %s912_s11   ;;  %s1061_s9 = smov %s908_s10 }
 0x642   : > { %p9_p5 = scmp.ge.s32.totalorder %s12_s11, 4   ;;  %s1062_s10 = smov %s1064_s12 }
 0x644   :  { %11 = sbr.rel (!%p9_p5) target bundleno = 2 (0x2), region = 62 }

// kernel: transformer_forward.57
= control target key start
LH: loop header
LB: loop body
LE: loop exit
PB: predicated region body
PF: predicated region fallthrough
CT: control target
= control target key end

     0   :  { %v176_v1 = vmov 0.0   ;;  %vm177_vm0 = vmmov 0   ;;  %s225_s0 = inlined_call_operand.vmem [shape: bf16[16,32], index: 0, kind: input, shape index: {}]   ;;  %s226_s1 = inlined_call_operand.vmem [shape: bf16[32,128], index: 1, kind: input, shape index: {}]   ;;  %s227_s2 = inlined_call_operand.vmem [shape: f32[1,128], index: 2, kind: input, shape index: {}]   ;;  %s228_s3 = inlined_call_operand.hbm [shape: f32[16,128], index: 3, kind: output, shape index: {}]  }
   0x1   :  { %v149_v0 = vld [vmem:[%s226_s1] sm:$0xff]   ;;  %136 = vmatprep.subr.bf16.mxu0 %v176_v1  ;;  %v150_v2 = vld [vmem:[%s226_s1 + $0x8] sm:$0xff]   ;;  %140 = vmatprep.mubr.msk.bf16.mxu0 %vm177_vm0, %v176_v1 }
   0x2   :  { %137 = vmatpush3.bf16.msra.mxu0 %v149_v0 }
   0x3   :  { %138 = vmatprep.subr.bf16.mxu0 %v176_v1 }
   0x4   :  { %8 = vsyncpa [#allocation4], 0  ;;  %v151_v3 = vld [vmem:[%s225_s0] sm:$0xff]   ;;  %vm47_vm1 = vcmask 261120   ;;  %s178_s20 = smov [#allocation3]  }
   0x5   :  { %v132_v4 = vld [vmem:[%s227_s2] ss:$0 sm:$0xff]  ;;  %s117_s21 = sshll.u32 %s178_s20, 4  ;;  %s118_s21 = int_to_ptr.vmem [resolvable:$true] %s117_s21 }
   0x6   :  { %139 = vmatpush3.bf16.msra.mxu0 %v150_v2  ;;  %s152_s1 = scalar_lea.vmem %s118_s21, 256  ;;  %p157_p1 = scmp.lt.s32.totalorder %s118_s21, %s118_s21 }
   0x7   :  { %p153_p0 = scmp.ne.s32.totalorder %s118_s21, %s152_s1  ;;  %p158_p2 = scmp.lt.s32.totalorder %s152_s1, %s152_s1 }
   0x9   :  { %141 = vmatmul.mubr.msk.bf16.vlgmr.msra.gmra.mrb[0].mxu0 %vm47_vm1, %v151_v3  ;;  %p159_p3 = por %p158_p2, %p157_p1 }
   0xb   :  { %p160_p4 = pnand %p159_p3, %p153_p0 }
  0xdc   :  { %v85_v5 = vpop.f32.mrb[0].mxu0 }
  0xdd   :  { %v108_v6 = vadd.f32 %v132_v4, %v85_v5  ;;  %v142_v7 = vpop.f32.mrb[1].mxu0 }
  0xde   :  { %v88_v8 = vpop.f32.mrb[2].mxu0 }
  0xdf   :  { %110 = vst [vmem:[#allocation3] sm:$0xff] %v108_v6  ;;  %v109_v9 = vadd.f32 %v132_v4, %v88_v8  ;;  %v143_v10 = vpop.f32.mrb[3].mxu0 }
  0xe1   :  { %111 = vst [vmem:[#allocation3 + $0x8] sm:$0xff] %v109_v9 }
  0xe2   :  { %163 = shalt.err (!%p160_p4)
}
  0xe3   :  { %s164_s22 = scalar_lea.hbm %s228_s3, 256 }
  0xe4   :  { %p165_p5 = scmp.ne.s32.totalorder %s228_s3, %s164_s22  ;;  %p168_p6 = scmp.lt.u32.totalorder %s164_s22, %s228_s3 }
  0xe6   :  { %p170_p7 = pnand %p168_p6, %p165_p5 }
  0xe8   :  { %173 = shalt.err (!%p170_p7)
}
  0xe9   :  { %s179_s27 = smov 128   ;;  %s180_s28 = smov 8  }
  0xea   :  { %123 = dma.vmem_to_hbm [thread:$0]  %s118_s21, 256, %s228_s3, [#allocation4], %s179_s27, %s179_s27, %s180_s28  }
  0xeb   :  { %174 = dma.done.wait [#allocation4], 256  }
  0xec   :  { %175 = vsyncadd [#allocation4], 4294967040 }
  0xed   :  { %127 = vsyncpa [#allocation4], 1 }

// kernel: transformer_forward.44
= control target key start
LH: loop header
LB: loop body
LE: loop exit
PB: predicated region body
PF: predicated region fallthrough
CT: control target
= control target key end

     0   :  { %s996_s12 = smov 0   ;;  %s998_s13 = smov 0   ;;  %s1107_s0 = inlined_call_operand.vmem [shape: bf16[2,8,32], index: 0, kind: input, shape index: {}]   ;;  %s1108_s1 = inlined_call_operand.vmem [shape: bf16[2,8,64], index: 1, kind: input, shape index: {}]   ;;  %s1109_s2 = inlined_call_operand.vmem [shape: f32[2,1,8], index: 2, kind: input, shape index: {}]   ;;  %s1110_s3 = inlined_call_operand.vmem [shape: bf16[2,8,32], index: 3, kind: output, shape index: {}]  }
   0x1   :  { %s1000_s14 = smov 0  }
   0x2 LB: > { %s25_s15 = sadd.s32 1, %s957_s13  ;;  %p805_p0 = scmp.ge.s32.totalorder %s961_s14, 1  ;;  %s961_s14 = sphi %s1000_s14, %s13_s14   ;;  %s957_s13 = sphi %s998_s13, %s1112_s13   ;;  %s953_s12 = sphi %s996_s12, %s1111_s12  }
   0x3   : > { %p27_p1 = scmp.ge.s32.totalorder %s25_s15, 2  ;;  %p172_p2 = scmp.lt.s32.totalorder %s961_s14, 3 }
   0x5   : > { %s1114_s15 = smov (%p27_p1, %s25_s15), 0  ;;  %p173_p3 = pnand %p805_p0, %p172_p2 }
   0x6   : > { %p207_p4 = scmp.lt.s32.totalorder (!%p173_p3), %s953_s12, 1  ;;  %v963_v0 = vmov (!%p173_p3), 0.0   ;;  %vm964_vm0 = vmmov (!%p173_p3), 0   ;;  %vm242_vm1 = vcmask (!%p173_p3), 64512   ;;  %v237_v5 = vlaneseq (!%p173_p3)  ;;  %s966_s26 = smov (!%p173_p3), 96  }
   0x7   : > { %176 = sbr.rel (%p173_p3) target bundleno = 1442 (0x5a2), region = 32  ;;  %837 = vmatprep.subr.bf16.mxu0 (!%p173_p3), %v963_v0  ;;  %839 = vmatprep.mubr.msk.bf16.mxu0 (!%p173_p3), %vm964_vm0, %v963_v0  ;;  %v965_v9 = vmov (!%p173_p3), -1e+09   ;;  %s967_s27 = smov (!%p173_p3), 120   ;;  %vm309_vm3 = vcmask (!%p173_p3), 1043456   ;;  %vm699_vm4 = vcmask (!%p173_p3), 130048  }
   0x8   : > { %843 = vmatprep.subr.bf16.mxu1 (!%p173_p3), %v963_v0  ;;  %845 = vmatprep.mubr.msk.bf16.mxu1 (!%p173_p3), %vm964_vm0, %v963_v0  ;;  %v238_v7 = vshrl.u32 (!%p173_p3), %v237_v5, 7  ;;  %s968_s28 = smov (!%p173_p3), 112   ;;  %s969_s29 = smov (!%p173_p3), 104   ;;  %vm701_vm5 = vcmask (!%p173_p3), 195584   ;;  %vm704_vm6 = vcmask (!%p173_p3), 257024  }
   0x9   : > { %s970_s30 = smov (!%p173_p3), 88   ;;  %s971_s4 = smov (!%p173_p3), 72  }
   0xa   : > { %v239_v8 = vsub.s32 (!%p173_p3), 0, %v238_v7  ;;  %s972_s5 = smov (!%p173_p3), 80   ;;  %s973_s6 = smov (!%p173_p3), 8  }
   0xb   : > { %s974_s7 = smov (!%p173_p3), 16   ;;  %s975_s8 = smov (!%p173_p3), 24  }
   0xe   : > { %s1116_s12 = smov (!%p207_p4, %s953_s12), 1 }
   0xf   : > { %s1020_s16 = sshll.u32 %s1116_s12, 2  ;;  %s220_s25 = scalar_lea.vmem %s1109_s2, %s1116_s12 }
  0x10   : > { %s213_s19 = scalar_lea.vmem %s1107_s0, %s1020_s16  ;;  %s217_s22 = scalar_lea.vmem %s1108_s1, %s1020_s16  ;;  %v231_v6 = vld [vmem:[%s220_s25] sm:$0x1] }
  0x11   : > { %v230_v1 = vld [vmem:[%s217_s22] sm:$0xf]  ;;  %vm232_vm2 = vcmp.gt.f32.partialorder %v231_v6, 0.0  ;;  %s227_s11 = scalar_lea.vmem %s1110_s3, %s1020_s16 }
  0x12   : > { %v247_v2 = vsel %vm242_vm1, %v230_v1, 0  ;;  %v234_v3 = vld [vmem:[%s213_s19] sm:$0xf]  ;;  %v233_v10 = vsel %vm232_vm2, 0.0, %v965_v9  ;;  %v1042_v18 = vcombine.low %v230_v1, %v230_v1 }
  0x13   : > { %838 = vmatpush3.bf16.xpose.msra.mxu0 %v247_v2  ;;  %v235_v4 = vmul.bf16 1052065461, %v234_v3  ;;  %v1038_v11 = vrot.slane %v233_v10, %v239_v8 }
  0x14   : > { %855 = vmatprep.subr.bf16.mxu0 %v963_v0  ;;  %304 = vrot.lane.b32.xlu1 %v1042_v18, %s966_s26 }
  0x15   : > { %v812_v19 = vcombine.low %v235_v4, %v235_v4 }
  0x18   : > { %358 = vrot.lane.b32.xlu1 %v1042_v18, %s967_s27 }
  0x1a   : > { %840 = vmatmul.mubr.msk.bf16.vlgmr.msra.gmra.mrb[0].mxu0 %vm242_vm1, %v235_v4 }
  0x1b   : > { %857 = vmatprep.mubr.msk.bf16.mxu0 %vm964_vm0, %v963_v0 }
  0x1c   : > { %468 = vrot.lane.b32.xlu1 %v1042_v18, %s968_s28 }
  0x20   : > { %466 = vrot.lane.b32.xlu1 %v812_v19, %s968_s28 }
  0x24   : > { %578 = vrot.lane.b32.xlu1 %v1042_v18, %s969_s29 }
  0x28   : > { %576 = vrot.lane.b32.xlu1 %v812_v19, %s969_s29 }
  0x86   : > { %v305_v25 = vpop.permute.xlu1 %304 }
  0x87   : > { %v311_v26 = vsel %vm309_vm3, %v305_v25, 0 }
  0x88   : > { %844 = vmatpush3.bf16.msra.mxu1 %v311_v26 }
  0x89   : > { %849 = vmatprep.subr.bf16.mxu1 %v963_v0 }
  0x8a   : > { %v359_v29 = vpop.permute.xlu1 %358 }
  0x8b   : > { %v364_v31 = vsel %vm242_vm1, %v359_v29, 0 }
  0x8e   : > { %v469_v33 = vpop.permute.xlu1 %468 }
  0x8f   : > { %v474_v36 = vsel %vm242_vm1, %v469_v33, 0 }
  0x92   : > { %v467_v35 = vpop.permute.xlu1 %466 }
  0x96   : > { %v579_v37 = vpop.permute.xlu1 %578 }
  0x97   : > { %v584_v38 = vsel %vm242_vm1, %v579_v37, 0 }
  0x9a   : > { %v577_v39 = vpop.permute.xlu1 %576 }
  0xed   : > { %v283_v12 = vpop.f32.mrb[0].mxu0 }
  0xee   : > { %v284_v13 = vadd.f32 %v283_v12, %v1038_v11  ;;  %v841_v14 = vpop.f32.mrb[1].mxu0 }
  0xef   : > { %v286_v15 = vpop.f32.mrb[2].mxu0 }
  0xf0   : > { %v842_v16 = vpop.f32.mrb[3].mxu0  ;;  %v289_v17 = vsel %vm242_vm1, %v284_v13, -inf }
  0xf1   : > { %290 = vmax.xlane.f32.xlu0 %v289_v17 }
 0x17e   : > { %v291_v20 = vpop.xlane.xlu0 %290 }
 0x17f   : > { %v292_v21 = vsub.f32 %v284_v13, %v291_v20 }
 0x181   : > { %v293_v22 = vmul.f32 1.442695, %v292_v21 }
 0x183   : > { %923 = vpow2.f32 %v293_v22 }
 0x18d   : > { %v924_v23 = vpop.eup %923 }
 0x18e   : > { %v295_v24 = vsel %vm242_vm1, %v924_v23, 0.0 }
 0x18f   : > { %296 = vadd.xlane.f32.xlu0 %v295_v24 }
 0x1a5   : > { %356 = vrot.lane.b32.xlu0 %v812_v19, %s967_s27 }
 0x21c   : > { %v297_v27 = vpop.xlane.xlu0 %296 }
 0x21d   : > { %925 = vrcp.f32 %v297_v27 }
 0x220   : > { %v357_v34 = vpop.permute.xlu0 %356 }
 0x227   : > { %v926_v28 = vpop.eup %925 }
 0x228   : > { %v299_v30 = vmul.f32 %v926_v28, %v924_v23 }
 0x22a   : > { %v300_v32 = vpack.c.bf16 %v299_v30, %v299_v30 }
 0x22c   : > { %846 = vmatmul.mubr.msk.bf16.vlgmr.msra.gmra.mrb[0].mxu1 %vm242_vm1, %v300_v32 }
 0x22d   : > { %850 = vmatpush3.bf16.xpose.msra.mxu1 %v364_v31  ;;  %851 = vmatprep.mubr.msk.bf16.mxu1 %vm964_vm0, %v963_v0 }
 0x22e   : > { %861 = vmatprep.subr.bf16.mxu1 %v963_v0 }
 0x234   : > { %852 = vmatmul.mubr.msk.bf16.vlgmr.msra.gmra.mrb[4].mxu1 %vm242_vm1, %v357_v34 }
 0x235   : > { %862 = vmatpush3.bf16.xpose.msra.mxu1 %v474_v36  ;;  %863 = vmatprep.mubr.msk.bf16.mxu1 %vm964_vm0, %v963_v0 }
 0x236   : > { %873 = vmatprep.subr.bf16.mxu1 %v963_v0 }
 0x23c   : > { %864 = vmatmul.mubr.msk.bf16.vlgmr.msra.gmra.mrb[8].mxu1 %vm242_vm1, %v467_v35 }
 0x23d   : > { %874 = vmatpush3.bf16.xpose.msra.mxu1 %v584_v38  ;;  %875 = vmatprep.mubr.msk.bf16.mxu1 %vm964_vm0, %v963_v0 }
 0x244   : > { %876 = vmatmul.mubr.msk.bf16.vlgmr.msra.gmra.mrb[12].mxu1 %vm242_vm1, %v577_v39 }
 0x2ff   : > { %v1066_v40 = vpop.f32.mrb[0].mxu1 }
 0x300   : > { %v847_v41 = vpop.f32.mrb[1].mxu1 }
 0x301   : > { %v350_v42 = vpop.f32.mrb[2].mxu1 }
 0x302   : > { %v848_v43 = vpop.f32.mrb[3].mxu1 }
 0x307   : > { %v400_v44 = vpop.f32.mrb[4].mxu1 }
 0x308   : > { %v401_v45 = vadd.f32 %v400_v44, %v1038_v11  ;;  %v853_v46 = vpop.f32.mrb[5].mxu1 }
 0x309   : > { %v403_v47 = vpop.f32.mrb[6].mxu1 }
 0x30a   : > { %v854_v48 = vpop.f32.mrb[7].mxu1  ;;  %v406_v49 = vsel %vm242_vm1, %v401_v45, -inf }
 0x30b   : > { %407 = vmax.xlane.f32.xlu1 %v406_v49 }
 0x30f   : > { %v510_v50 = vpop.f32.mrb[8].mxu1 }
 0x310   : > { %v511_v51 = vadd.f32 %v510_v50, %v1038_v11  ;;  %v865_v52 = vpop.f32.mrb[9].mxu1 }
 0x311   : > { %v513_v53 = vpop.f32.mrb[10].mxu1 }
 0x312   : > { %v866_v54 = vpop.f32.mrb[11].mxu1  ;;  %v516_v55 = vsel %vm242_vm1, %v511_v51, -inf }
 0x313   : > { %517 = vmax.xlane.f32.xlu0 %v516_v55 }
 0x317   : > { %v620_v56 = vpop.f32.mrb[12].mxu1 }
 0x318   : > { %v621_v57 = vadd.f32 %v620_v56, %v1038_v11  ;;  %v877_v58 = vpop.f32.mrb[13].mxu1 }
 0x319   : > { %v623_v59 = vpop.f32.mrb[14].mxu1 }
 0x31a   : > { %v878_v60 = vpop.f32.mrb[15].mxu1  ;;  %v626_v61 = vsel %vm242_vm1, %v621_v57, -inf }
 0x31b   : > { %627 = vmax.xlane.f32.xlu1 %v626_v61 }
 0x32c   : > { %418 = vrot.lane.b32.xlu1 %v1042_v18, %s970_s30 }
 0x398   : > { %v408_v62 = vpop.xlane.xlu1 %407 }
 0x399   : > { %v409_v63 = vsub.f32 %v401_v45, %v408_v62 }
 0x39b   : > { %v410_v1 = vmul.f32 1.442695, %v409_v63 }
 0x39d   : > { %927 = vpow2.f32 %v410_v1 }
 0x3a0   : > { %v518_v2 = vpop.xlane.xlu0 %517 }
 0x3a1   : > { %v519_v3 = vsub.f32 %v511_v51, %v518_v2 }
 0x3a3   : > { %v520_v4 = vmul.f32 1.442695, %v519_v3 }
 0x3a5   : > { %929 = vpow2.f32 %v520_v4 }
 0x3a7   : > { %v928_v5 = vpop.eup %927 }
 0x3a8   : > { %v628_v6 = vpop.xlane.xlu1 %627  ;;  %v412_v7 = vsel %vm242_vm1, %v928_v5, 0.0 }
 0x3a9   : > { %v629_v8 = vsub.f32 %v621_v57, %v628_v6  ;;  %413 = vadd.xlane.f32.xlu0 %v412_v7 }
 0x3ab   : > { %v630_v9 = vmul.f32 1.442695, %v629_v8 }
 0x3ac   : > { %v419_v10 = vpop.permute.xlu1 %418 }
 0x3ad   : > { %931 = vpow2.f32 %v630_v9  ;;  %v424_v11 = vsel %vm309_vm3, %v419_v10, 0 }
 0x3ae   : > { %856 = vmatpush3.bf16.msra.mxu0 %v424_v11 }
 0x3af   : > { %v930_v12 = vpop.eup %929  ;;  %867 = vmatprep.subr.bf16.mxu0 %v963_v0 }
 0x3b0   : > { %v522_v13 = vsel %vm242_vm1, %v930_v12, 0.0 }
 0x3b1   : > { %523 = vadd.xlane.f32.xlu1 %v522_v13 }
 0x3b7   : > { %v932_v14 = vpop.eup %931 }
 0x3b8   : > { %v632_v15 = vsel %vm242_vm1, %v932_v14, 0.0 }
 0x3b9   : > { %633 = vadd.xlane.f32.xlu0 %v632_v15 }
 0x3c2   : > { %638 = vrot.lane.b32.xlu1 %v1042_v18, %s971_s4 }
 0x3cf   : > { %528 = vrot.lane.b32.xlu0 %v1042_v18, %s972_s5 }
 0x436   : > { %v414_v16 = vpop.xlane.xlu0 %413 }
 0x437   : > { %933 = vrcp.f32 %v414_v16 }
 0x43e   : > { %v524_v17 = vpop.xlane.xlu1 %523 }
 0x43f   : > { %935 = vrcp.f32 %v524_v17 }
 0x441   : > { %v934_v19 = vpop.eup %933 }
 0x442   : > { %v416_v20 = vmul.f32 %v934_v19, %v928_v5  ;;  %v639_v26 = vpop.permute.xlu1 %638 }
 0x443   : > { %v644_v28 = vsel %vm309_vm3, %v639_v26, 0 }
 0x444   : > { %v417_v21 = vpack.c.bf16 %v416_v20, %v416_v20 }
 0x446   : > { %v634_v22 = vpop.xlane.xlu0 %633  ;;  %858 = vmatmul.mubr.msk.bf16.vlgmr.msra.gmra.mrb[4].mxu0 %vm242_vm1, %v417_v21 }
 0x447   : > { %937 = vrcp.f32 %v634_v22  ;;  %869 = vmatprep.mubr.msk.bf16.mxu0 %vm964_vm0, %v963_v0 }
 0x449   : > { %v936_v23 = vpop.eup %935 }
 0x44a   : > { %v526_v24 = vmul.f32 %v936_v23, %v930_v12  ;;  %v529_v25 = vpop.permute.xlu0 %528 }
 0x44b   : > { %v534_v18 = vsel %vm309_vm3, %v529_v25, 0 }
 0x44c   : > { %868 = vmatpush3.bf16.msra.mxu0 %v534_v18  ;;  %v527_v27 = vpack.c.bf16 %v526_v24, %v526_v24 }
 0x44d   : > { %879 = vmatprep.subr.bf16.mxu0 %v963_v0 }
 0x44f   : > { %870 = vmatmul.mubr.msk.bf16.vlgmr.msra.gmra.mrb[8].mxu0 %vm242_vm1, %v527_v27 }
 0x450   : > { %880 = vmatpush3.bf16.msra.mxu0 %v644_v28  ;;  %881 = vmatprep.mubr.msk.bf16.mxu0 %vm964_vm0, %v963_v0 }
 0x451   : > { %v938_v29 = vpop.eup %937 }
 0x452   : > { %v636_v30 = vmul.f32 %v938_v29, %v932_v14 }
 0x454   : > { %v637_v31 = vpack.c.bf16 %v636_v30, %v636_v30 }
 0x457   : > { %882 = vmatmul.mubr.msk.bf16.vlgmr.msra.gmra.mrb[12].mxu0 %vm242_vm1, %v637_v31 }
 0x519   : > { %v460_v32 = vpop.f32.mrb[4].mxu0 }
 0x51a   : > { %687 = vrot.lane.b32.xlu1 %v460_v32, %s973_s6  ;;  %v859_v33 = vpop.f32.mrb[5].mxu0 }
 0x51b   : > { %v463_v34 = vpop.f32.mrb[6].mxu0 }
 0x51c   : > { %v860_v35 = vpop.f32.mrb[7].mxu0 }
 0x522   : > { %v570_v36 = vpop.f32.mrb[8].mxu0 }
 0x523   : > { %691 = vrot.lane.b32.xlu0 %v570_v36, %s974_s7  ;;  %v871_v37 = vpop.f32.mrb[9].mxu0 }
 0x524   : > { %v573_v38 = vpop.f32.mrb[10].mxu0 }
 0x525   : > { %v872_v39 = vpop.f32.mrb[11].mxu0 }
 0x52a   : > { %v680_v41 = vpop.f32.mrb[12].mxu0 }
 0x52b   : > { %695 = vrot.lane.b32.xlu1 %v680_v41, %s975_s8  ;;  %v883_v0 = vpop.f32.mrb[13].mxu0 }
 0x52c   : > { %v683_v42 = vpop.f32.mrb[14].mxu0 }
 0x52d   : > { %v884_v43 = vpop.f32.mrb[15].mxu0 }
 0x58c   : > { %v688_v44 = vpop.permute.xlu1 %687 }
 0x58d   : > { %v698_v46 = vsel %vm242_vm1, %v1066_v40, %v688_v44 }
 0x595   : > { %v692_v45 = vpop.permute.xlu0 %691 }
 0x596   : > { %v700_v47 = vsel %vm699_vm4, %v698_v46, %v692_v45 }
 0x59d   : > { %v696_v48 = vpop.permute.xlu1 %695 }
 0x59e   : > { %v702_v49 = vsel %vm701_vm5, %v700_v47, %v696_v48 }
 0x59f   : > { %v703_v50 = vpack.c.bf16 %v702_v49, %v702_v49 }
 0x5a1   : > { %705 = vst.msk [vmem:[%s227_s11] sm:$0xf] %vm704_vm6, %v703_v50 }
 0x5a2 PF: > { %s13_s14 = sadd.s32 1, %s961_s14   ;;  %s1111_s12 = smov %s957_s13 }
 0x5a3   : > { %p10_p5 = scmp.ge.s32.totalorder %s13_s14, 4   ;;  %s1112_s13 = smov %s1114_s15 }
 0x5a5   :  { %12 = sbr.rel (!%p10_p5) target bundleno = 2 (0x2), region = 68 }

</bundles_post_ra>
